<compile_context>
chip_gen: v6e
topology: v6e:2x2x1
jax: 0.10.0
libtpu: 0.0.40
codegen_flags: <defaults>
</compile_context>

<pallas_src>
import math

import jax
import jax.numpy as jnp
from jax import lax
from jax.experimental import pallas as pl
from jax.experimental.pallas import tpu as pltpu

RMS_EPS = 1.1920929e-07          # torch.finfo(float32).eps  (F.rms_norm default)
NEG_INF = -1e30
VMEM_LIMIT = 48 * 1024 * 1024    # safe on v5e/v6e (128 MiB) and v7x (64 MiB)


def _rms(x):
    return x * lax.rsqrt(jnp.mean(x * x, axis=-1, keepdims=True) + RMS_EPS)


# ---------------------------------------------------------------------------
# Kernel 1: the transformer stack (all layers), layer loop on the grid.
# ---------------------------------------------------------------------------
def _make_stack_kernel(Bblk, T, E, H):
    hs = E // H
    M = Bblk * T
    scale = 1.0 / math.sqrt(hs)
    bf16 = jnp.bfloat16

    def kernel(x_ref, cos_ref, sin_ref, mask_ref,
               wq_ref, wqs_ref, wk_ref, wv_ref, wvs_ref, wp_ref,
               w1_ref, w2_ref, o_ref, x_acc):
        l = pl.program_id(1)

        @pl.when(l == 0)
        def _():
            x_acc[...] = x_ref[...].reshape(M, E)

        cosf = cos_ref[...]          # (M, E) f32, [cos, cos] per head
        sinf = sin_ref[...]          # (M, E) f32, [sin, -sin] per head
        mask = mask_ref[...]         # (T, T) additive causal mask

        # ---------------- attention sub-block ----------------
        x = x_acc[...]                                   # (M, E) f32 residual
        h = _rms(x).astype(bf16)

        q = jnp.dot(h, wq_ref[0], preferred_element_type=jnp.float32)
        qs = jnp.dot(h, wqs_ref[0], preferred_element_type=jnp.float32)
        k = jnp.dot(h, wk_ref[0], preferred_element_type=jnp.float32)
        v = jnp.dot(h, wv_ref[0], preferred_element_type=jnp.float32)
        vs = jnp.dot(h, wvs_ref[0], preferred_element_type=jnp.float32)

        # Full-width RoPE (reference rotates q and v; k stays unrotated).
        q = q * cosf + qs * sinf
        v = v * cosf + vs * sinf

        attn_rows = []
        for bb in range(Bblk):                           # small static unroll
            r0 = bb * T
            q3 = jnp.transpose(q[r0:r0 + T].reshape(T, H, hs), (1, 0, 2))
            k3 = jnp.transpose(k[r0:r0 + T].reshape(T, H, hs), (1, 0, 2))
            v3 = jnp.transpose(v[r0:r0 + T].reshape(T, H, hs), (1, 0, 2))
            q3 = _rms(q3) * scale                        # per-head QK RMSNorm
            k3 = _rms(k3)
            s = jnp.einsum('hqd,hkd->hqk',
                           q3.astype(bf16), k3.astype(bf16),
                           preferred_element_type=jnp.float32)
            s = s + mask
            s = s - jnp.max(s, axis=-1, keepdims=True)
            p = jnp.exp(s)
            denom = jnp.sum(p, axis=-1, keepdims=True)
            o3 = jnp.einsum('hqk,hkd->hqd',
                            p.astype(bf16), v3.astype(bf16),
                            preferred_element_type=jnp.float32)
            o3 = o3 * pl.reciprocal(denom, approx=True)
            attn_rows.append(jnp.transpose(o3, (1, 0, 2)).reshape(T, E))
        attn = attn_rows[0] if Bblk == 1 else jnp.concatenate(attn_rows, axis=0)

        x = x + jnp.dot(attn.astype(bf16), wp_ref[0],
                        preferred_element_type=jnp.float32)

        # ---------------- feed-forward sub-block ----------------
        h2 = _rms(x).astype(bf16)
        f = jnp.dot(h2, w1_ref[0], preferred_element_type=jnp.float32)
        f = jnp.maximum(f, 0.0)
        f = f * f
        x = x + jnp.dot(f.astype(bf16), w2_ref[0],
                        preferred_element_type=jnp.float32)

        x_acc[...] = x

        @pl.when(l == pl.num_programs(1) - 1)
        def _():
            o_ref[...] = _rms(x).astype(jnp.bfloat16).reshape(Bblk, T, E)

    return kernel


# ---------------------------------------------------------------------------
# Kernel 2: lm_head + 30*tanh(./30) soft cap, tiled over vocab.
# ---------------------------------------------------------------------------
def _make_lm_kernel(Bblk, T, E, tile_v):
    M = Bblk * T

    def kernel(h_ref, w_ref, o_ref):
        h = h_ref[...].reshape(M, E)
        logits = jnp.dot(h, w_ref[...], preferred_element_type=jnp.float32)
        logits = 30.0 * jnp.tanh(logits * (1.0 / 30.0))
        o_ref[...] = logits.reshape(Bblk, T, tile_v)

    return kernel


def _pick_batch_block(B, T):
    for cand in range(min(B, 8), 0, -1):
        if B % cand == 0 and cand * T <= 512:
            return cand
    return 1


def _pick_vocab_tile(V):
    for cand in (8192, 4096, 2048, 1024, 512, 256, 128):
        if V % cand == 0:
            return cand
    return V


# ---------------------------------------------------------------------------
# Wrapper
# ---------------------------------------------------------------------------
def minigpt_forward(idx, params, config):
    B, T = idx.shape
    E = config["n_embed"]
    V = config["vocab_size"]
    H = config["n_heads"]
    L = config["n_layers"]
    hs = E // H
    d = hs // 2
    F_ = 4 * E
    bf16 = jnp.bfloat16

    Bblk = _pick_batch_block(B, T)
    M = Bblk * T
    tile_v = _pick_vocab_tile(V)

    # ---- plain-JAX glue: embedding gather + table / weight prep ------------
    # TODO(synk): token-embedding gather stays as a plain XLA gather.
    x = jnp.take(params["emb"], idx, axis=0).astype(jnp.float32)      # (B,T,E)

    # RoPE tables (rounded through bf16 like the torch cos/sin cache), tiled
    # to full width: [cos, cos] / [sin, -sin] per head, replicated Bblk times.
    thetas = 10000.0 ** (-2.0 * jnp.arange(d, dtype=jnp.float32) / hs)
    freqs = jnp.arange(T, dtype=jnp.float32)[:, None] * thetas[None, :]
    cos = jnp.cos(freqs).astype(bf16).astype(jnp.float32)             # (T, d)
    sin = jnp.sin(freqs).astype(bf16).astype(jnp.float32)
    cosf = jnp.tile(jnp.concatenate([cos, cos], axis=-1), (Bblk, H))  # (M, E)
    sinf = jnp.tile(jnp.concatenate([sin, -sin], axis=-1), (Bblk, H))

    # Additive causal mask.
    r = jnp.arange(T)
    mask = jnp.where(r[:, None] >= r[None, :], 0.0, NEG_INF).astype(jnp.float32)

    # Weights: torch (out, in) -> (in, out), bf16; plus half-swapped copies of
    # Wq / Wv so RoPE needs no per-head lane slicing inside the kernel.
    def to_t(w):
        return jnp.swapaxes(w, -1, -2).astype(bf16)

    def swap_halves(w_t):            # swap the two halves of each head's columns
        return jnp.flip(w_t.reshape(L, E, H, 2, d), axis=3).reshape(L, E, E)

    wq_t = to_t(params["wq"])
    wk_t = to_t(params["wk"])
    wv_t = to_t(params["wv"])
    wp_t = to_t(params["wp"])
    w1_t = to_t(params["w1"])
    w2_t = to_t(params["w2"])
    wqs_t = swap_halves(wq_t)
    wvs_t = swap_halves(wv_t)
    wlm_t = params["wlm"].T.astype(bf16)                               # (E, V)

    # ---- kernel 1: transformer stack ---------------------------------------
    stack_kernel = _make_stack_kernel(Bblk, T, E, H)

    def xmap(b, l):
        return (b, 0, 0)

    def cmap(b, l):
        return (0, 0)

    def wmap(b, l):
        return (l, 0, 0)

    stack_cost = pl.CostEstimate(
        flops=int(2 * B * T * L * 14 * E * E + 4 * B * L * H * T * T * hs),
        transcendentals=int(B * L * H * T * T + 4 * B * T * L),
        bytes_accessed=int(6 * B * T * E + 2 * L * 14 * E * E
                           + 8 * M * E + 4 * T * T),
    )

    hidden = pl.pallas_call(
        stack_kernel,
        out_shape=jax.ShapeDtypeStruct((B, T, E), bf16),
        grid_spec=pltpu.PrefetchScalarGridSpec(
            num_scalar_prefetch=0,
            grid=(B // Bblk, L),
            in_specs=[
                pl.BlockSpec((Bblk, T, E), xmap),     # token embeddings
                pl.BlockSpec((M, E), cmap),           # cos table
                pl.BlockSpec((M, E), cmap),           # signed sin table
                pl.BlockSpec((T, T), cmap),           # additive causal mask
                pl.BlockSpec((1, E, E), wmap),        # Wq^T
                pl.BlockSpec((1, E, E), wmap),        # Wq^T half-swapped
                pl.BlockSpec((1, E, E), wmap),        # Wk^T
                pl.BlockSpec((1, E, E), wmap),        # Wv^T
                pl.BlockSpec((1, E, E), wmap),        # Wv^T half-swapped
                pl.BlockSpec((1, E, E), wmap),        # Wproj^T
                pl.BlockSpec((1, E, F_), wmap),       # W1^T
                pl.BlockSpec((1, F_, E), wmap),       # W2^T
            ],
            out_specs=pl.BlockSpec((Bblk, T, E), xmap),
            scratch_shapes=[pltpu.VMEM((M, E), jnp.float32)],
        ),
        compiler_params=pltpu.CompilerParams(
            dimension_semantics=("parallel", "arbitrary"),
            vmem_limit_bytes=VMEM_LIMIT),
        cost_estimate=stack_cost,
    )(x, cosf, sinf, mask, wq_t, wqs_t, wk_t, wv_t, wvs_t, wp_t, w1_t, w2_t)

    # ---- kernel 2: lm_head tiled over vocab (lane-dense outputs) -----------
    lm_kernel = _make_lm_kernel(Bblk, T, E, tile_v)
    lm_cost = pl.CostEstimate(
        flops=int(2 * B * T * E * V),
        transcendentals=int(B * T * V),
        bytes_accessed=int(2 * B * T * E + 2 * E * V + 4 * B * T * V),
    )
    logits = pl.pallas_call(
        lm_kernel,
        out_shape=jax.ShapeDtypeStruct((B, T, V), jnp.float32),
        grid_spec=pltpu.PrefetchScalarGridSpec(
            num_scalar_prefetch=0,
            grid=(B // Bblk, V // tile_v),
            in_specs=[
                pl.BlockSpec((Bblk, T, E), lambda b, vt: (b, 0, 0)),
                pl.BlockSpec((E, tile_v), lambda b, vt: (0, vt)),
            ],
            out_specs=pl.BlockSpec((Bblk, T, tile_v), lambda b, vt: (b, 0, vt)),
        ),
        compiler_params=pltpu.CompilerParams(
            dimension_semantics=("parallel", "arbitrary"),
            vmem_limit_bytes=VMEM_LIMIT),
        cost_estimate=lm_cost,
    )(hidden, wlm_t)

    return logits


# ---------------------------------------------------------------------------
# Pure-JAX reference (mirrors the kernel's bf16 matmul precision) for checking.
# ---------------------------------------------------------------------------
def minigpt_reference(idx, params, config):
    B, T = idx.shape
    E = config["n_embed"]
    H = config["n_heads"]
    L = config["n_layers"]
    hs = E // H
    d = hs // 2
    bf16 = jnp.bfloat16
    f32 = jnp.float32
    scale = 1.0 / math.sqrt(hs)

    def bdot(a, b):
        return jnp.dot(a.astype(bf16), b.astype(bf16), preferred_element_type=f32)

    x = jnp.take(params["emb"], idx, axis=0).astype(f32)               # (B,T,E)

    thetas = 10000.0 ** (-2.0 * jnp.arange(d, dtype=f32) / hs)
    freqs = jnp.arange(T, dtype=f32)[:, None] * thetas[None, :]
    cos = jnp.cos(freqs).astype(bf16).astype(f32)[None, :, None, :]
    sin = jnp.sin(freqs).astype(bf16).astype(f32)[None, :, None, :]

    def rope(u):                                                        # (B,T,H,hs)
        u1, u2 = u[..., :d], u[..., d:]
        return jnp.concatenate([u1 * cos + u2 * sin,
                                -u1 * sin + u2 * cos], axis=-1)

    causal = jnp.tril(jnp.ones((T, T), dtype=bool))

    for l in range(L):
        h = _rms(x)
        q = bdot(h, params["wq"][l].T).reshape(B, T, H, hs)
        k = bdot(h, params["wk"][l].T).reshape(B, T, H, hs)
        v = bdot(h, params["wv"][l].T).reshape(B, T, H, hs)
        q = rope(q)
        v = rope(v)
        q = _rms(q) * scale
        k = _rms(k)
        s = jnp.einsum('bqhd,bkhd->bhqk', q.astype(bf16), k.astype(bf16),
                       preferred_element_type=f32)
        s = jnp.where(causal, s, NEG_INF)
        s = s - jnp.max(s, axis=-1, keepdims=True)
        p = jnp.exp(s)
        denom = jnp.sum(p, axis=-1, keepdims=True)
        o = jnp.einsum('bhqk,bkhd->bhqd', p.astype(bf16), v.astype(bf16),
                       preferred_element_type=f32) / denom
        o = jnp.transpose(o, (0, 2, 1, 3)).reshape(B, T, E)
        x = x + bdot(o, params["wp"][l].T)
        h2 = _rms(x)
        f = bdot(h2, params["w1"][l].T)
        f = jnp.maximum(f, 0.0)
        f = f * f
        x = x + bdot(f, params["w2"][l].T)

    x = _rms(x).astype(bf16)
    logits = jnp.dot(x, params["wlm"].T.astype(bf16), preferred_element_type=f32)
    return 30.0 * jnp.tanh(logits * (1.0 / 30.0))


def init_params(key, config):
    V = config["vocab_size"]
    E = config["n_embed"]
    L = config["n_layers"]
    std = 0.05
    ks = jax.random.split(key, 8)
    # nn.Linear weights kept in torch (out, in) layout; f32 like the reference.
    return dict(
        emb=std * jax.random.normal(ks[0], (V, E), jnp.float32),
        wq=std * jax.random.normal(ks[1], (L, E, E), jnp.float32),
        wk=std * jax.random.normal(ks[2], (L, E, E), jnp.float32),
        wv=std * jax.random.normal(ks[3], (L, E, E), jnp.float32),
        wp=std * jax.random.normal(ks[4], (L, E, E), jnp.float32),
        w1=std * jax.random.normal(ks[5], (L, 4 * E, E), jnp.float32),
        w2=std * jax.random.normal(ks[6], (L, E, 4 * E), jnp.float32),
        wlm=std * jax.random.normal(ks[7], (V, E), jnp.float32),
    )


if __name__ == "__main__":
    config = dict(vocab_size=256, n_embed=128, n_heads=4, n_layers=3,
                  context_length=16)
    key = jax.random.PRNGKey(0)
    pkey, ikey = jax.random.split(key)
    params = init_params(pkey, config)

    B, T = 2, config["context_length"]
    idx = jax.random.randint(ikey, (B, T), 0, config["vocab_size"], jnp.int32)

    logits = minigpt_forward(idx, params, config)
    jax.block_until_ready(logits)

    assert logits.shape == (B, T, config["vocab_size"])
    assert logits.dtype == jnp.float32
    assert bool(jnp.all(jnp.isfinite(logits)))

    ref = minigpt_reference(idx, params, config)
    err = float(jnp.max(jnp.abs(logits - ref)))
    assert err < 0.1, f"max |kernel - reference| = {err}"

    print("KERNEL_OK")
</pallas_src>

<mosaic_0001>
module attributes {stable_mosaic.version = 11 : i64} {
  func.func @kernel(%arg0: i32, %arg1: i32, %arg2: memref<2x16x128xf32, #tpu.memory_space<vmem>>, %arg3: memref<32x128xf32, #tpu.memory_space<vmem>>, %arg4: memref<32x128xf32, #tpu.memory_space<vmem>>, %arg5: memref<16x16xf32, #tpu.memory_space<vmem>>, %arg6: memref<1x128x128xbf16, #tpu.memory_space<vmem>>, %arg7: memref<1x128x128xbf16, #tpu.memory_space<vmem>>, %arg8: memref<1x128x128xbf16, #tpu.memory_space<vmem>>, %arg9: memref<1x128x128xbf16, #tpu.memory_space<vmem>>, %arg10: memref<1x128x128xbf16, #tpu.memory_space<vmem>>, %arg11: memref<1x128x128xbf16, #tpu.memory_space<vmem>>, %arg12: memref<1x128x512xbf16, #tpu.memory_space<vmem>>, %arg13: memref<1x512x128xbf16, #tpu.memory_space<vmem>>, %arg14: memref<2x16x128xbf16, #tpu.memory_space<vmem>>, %arg15: memref<32x128xf32, #tpu.memory_space<vmem>>) attributes {dimension_semantics = [#tpu.dimension_semantics<parallel>, #tpu.dimension_semantics<arbitrary>], iteration_bounds = array<i64: 1, 3>, scalar_prefetch = 0 : i64, scratch_operands = 1 : i64, tpu.core_type = #tpu.core_type<tc>, window_params = [{transform_indices = @transform_0, window_bounds = array<i64: 2, 16, 128>}, {pipeline_mode = #tpu.pipeline_mode<synchronous>, transform_indices = @transform_1, window_bounds = array<i64: 32, 128>}, {pipeline_mode = #tpu.pipeline_mode<synchronous>, transform_indices = @transform_2, window_bounds = array<i64: 32, 128>}, {pipeline_mode = #tpu.pipeline_mode<synchronous>, transform_indices = @transform_3, window_bounds = array<i64: 16, 16>}, {transform_indices = @transform_4, window_bounds = array<i64: 1, 128, 128>}, {transform_indices = @transform_5, window_bounds = array<i64: 1, 128, 128>}, {transform_indices = @transform_6, window_bounds = array<i64: 1, 128, 128>}, {transform_indices = @transform_7, window_bounds = array<i64: 1, 128, 128>}, {transform_indices = @transform_8, window_bounds = array<i64: 1, 128, 128>}, {transform_indices = @transform_9, window_bounds = array<i64: 1, 128, 128>}, {transform_indices = @transform_10, window_bounds = array<i64: 1, 128, 512>}, {transform_indices = @transform_11, window_bounds = array<i64: 1, 512, 128>}, {transform_indices = @transform_12, window_bounds = array<i64: 2, 16, 128>}]} {
    %c0_i32 = arith.constant 0 : i32
    %0 = arith.cmpi eq, %arg1, %c0_i32 : i32
    %1 = arith.extui %0 : i1 to i32
    %c0_i32_0 = arith.constant 0 : i32
    %2 = arith.cmpi ne, %1, %c0_i32_0 : i32
    scf.if %2 {
      %c0_71 = arith.constant 0 : index
      %c0_72 = arith.constant 0 : index
      %c0_73 = arith.constant 0 : index
      %175 = vector.load %arg2[%c0_71, %c0_72, %c0_73] : memref<2x16x128xf32, #tpu.memory_space<vmem>>, vector<2x16x128xf32>
      %176 = vector.shape_cast %175 : vector<2x16x128xf32> to vector<32x128xf32>
      %c0_74 = arith.constant 0 : index
      %c0_75 = arith.constant 0 : index
      %177 = vector.load %arg15[%c0_74, %c0_75] : memref<32x128xf32, #tpu.memory_space<vmem>>, vector<32x128xf32>
      tpu.vector_store %arg15[%c0_74, %c0_75], %176 {strides = array<i32>} : memref<32x128xf32, #tpu.memory_space<vmem>>, vector<32x128xf32>,
    } else {
    }
    %c0 = arith.constant 0 : index
    %c0_1 = arith.constant 0 : index
    %3 = vector.load %arg3[%c0, %c0_1] : memref<32x128xf32, #tpu.memory_space<vmem>>, vector<32x128xf32>
    %c0_2 = arith.constant 0 : index
    %c0_3 = arith.constant 0 : index
    %4 = vector.load %arg4[%c0_2, %c0_3] : memref<32x128xf32, #tpu.memory_space<vmem>>, vector<32x128xf32>
    %c0_4 = arith.constant 0 : index
    %c0_5 = arith.constant 0 : index
    %5 = vector.load %arg5[%c0_4, %c0_5] : memref<16x16xf32, #tpu.memory_space<vmem>>, vector<16x16xf32>
    %c0_6 = arith.constant 0 : index
    %c0_7 = arith.constant 0 : index
    %6 = vector.load %arg15[%c0_6, %c0_7] : memref<32x128xf32, #tpu.memory_space<vmem>>, vector<32x128xf32>
    %7 = arith.mulf %6, %6 : vector<32x128xf32>
    %cst = arith.constant dense<0.000000e+00> : vector<32xf32>
    %8 = vector.multi_reduction <add>, %7, %cst [1] : vector<32x128xf32> to vector<32xf32>
    %9 = vector.shape_cast %8 : vector<32xf32> to vector<32x1xf32>
    %cst_8 = arith.constant 1.280000e+02 : f32
    %10 = vector.broadcast %cst_8 : f32 to vector<32x1xf32>
    %11 = arith.divf %9, %10 : vector<32x1xf32>
    %cst_9 = arith.constant 1.1920929E-7 : f32
    %12 = vector.broadcast %cst_9 : f32 to vector<32x1xf32>
    %13 = arith.addf %11, %12 : vector<32x1xf32>
    %14 = math.rsqrt %13 : vector<32x1xf32>
    %15 = vector.broadcast %14 : vector<32x1xf32> to vector<32x128xf32>
    %16 = arith.mulf %6, %15 : vector<32x128xf32>
    %17 = arith.truncf %16 : vector<32x128xf32> to vector<32x128xbf16>
    %c0_10 = arith.constant 0 : index
    %c0_11 = arith.constant 0 : index
    %c0_12 = arith.constant 0 : index
    %18 = vector.load %arg6[%c0_10, %c0_11, %c0_12] : memref<1x128x128xbf16, #tpu.memory_space<vmem>>, vector<1x128x128xbf16>
    %19 = vector.shape_cast %18 : vector<1x128x128xbf16> to vector<128x128xbf16>
    %cst_13 = arith.constant dense<0.000000e+00> : vector<32x128xf32>
    %20 = tpu.matmul %17, %19, %cst_13 {dimension_numbers = #tpu.dot_dimension_numbers<[1], [0], [0], [1], [0, 0, 1, 1], [], []>} : vector<32x128xbf16>, vector<128x128xbf16>, vector<32x128xf32> -> vector<32x128xf32>
    %c0_14 = arith.constant 0 : index
    %c0_15 = arith.constant 0 : index
    %c0_16 = arith.constant 0 : index
    %21 = vector.load %arg7[%c0_14, %c0_15, %c0_16] : memref<1x128x128xbf16, #tpu.memory_space<vmem>>, vector<1x128x128xbf16>
    %22 = vector.shape_cast %21 : vector<1x128x128xbf16> to vector<128x128xbf16>
    %cst_17 = arith.constant dense<0.000000e+00> : vector<32x128xf32>
    %23 = tpu.matmul %17, %22, %cst_17 {dimension_numbers = #tpu.dot_dimension_numbers<[1], [0], [0], [1], [0, 0, 1, 1], [], []>} : vector<32x128xbf16>, vector<128x128xbf16>, vector<32x128xf32> -> vector<32x128xf32>
    %c0_18 = arith.constant 0 : index
    %c0_19 = arith.constant 0 : index
    %c0_20 = arith.constant 0 : index
    %24 = vector.load %arg8[%c0_18, %c0_19, %c0_20] : memref<1x128x128xbf16, #tpu.memory_space<vmem>>, vector<1x128x128xbf16>
    %25 = vector.shape_cast %24 : vector<1x128x128xbf16> to vector<128x128xbf16>
    %cst_21 = arith.constant dense<0.000000e+00> : vector<32x128xf32>
    %26 = tpu.matmul %17, %25, %cst_21 {dimension_numbers = #tpu.dot_dimension_numbers<[1], [0], [0], [1], [0, 0, 1, 1], [], []>} : vector<32x128xbf16>, vector<128x128xbf16>, vector<32x128xf32> -> vector<32x128xf32>
    %c0_22 = arith.constant 0 : index
    %c0_23 = arith.constant 0 : index
    %c0_24 = arith.constant 0 : index
    %27 = vector.load %arg9[%c0_22, %c0_23, %c0_24] : memref<1x128x128xbf16, #tpu.memory_space<vmem>>, vector<1x128x128xbf16>
    %28 = vector.shape_cast %27 : vector<1x128x128xbf16> to vector<128x128xbf16>
    %cst_25 = arith.constant dense<0.000000e+00> : vector<32x128xf32>
    %29 = tpu.matmul %17, %28, %cst_25 {dimension_numbers = #tpu.dot_dimension_numbers<[1], [0], [0], [1], [0, 0, 1, 1], [], []>} : vector<32x128xbf16>, vector<128x128xbf16>, vector<32x128xf32> -> vector<32x128xf32>
    %c0_26 = arith.constant 0 : index
    %c0_27 = arith.constant 0 : index
    %c0_28 = arith.constant 0 : index
    %30 = vector.load %arg10[%c0_26, %c0_27, %c0_28] : memref<1x128x128xbf16, #tpu.memory_space<vmem>>, vector<1x128x128xbf16>
    %31 = vector.shape_cast %30 : vector<1x128x128xbf16> to vector<128x128xbf16>
    %cst_29 = arith.constant dense<0.000000e+00> : vector<32x128xf32>
    %32 = tpu.matmul %17, %31, %cst_29 {dimension_numbers = #tpu.dot_dimension_numbers<[1], [0], [0], [1], [0, 0, 1, 1], [], []>} : vector<32x128xbf16>, vector<128x128xbf16>, vector<32x128xf32> -> vector<32x128xf32>
    %33 = arith.mulf %20, %3 : vector<32x128xf32>
    %34 = arith.mulf %23, %4 : vector<32x128xf32>
    %35 = arith.addf %33, %34 : vector<32x128xf32>
    %36 = arith.mulf %29, %3 : vector<32x128xf32>
    %37 = arith.mulf %32, %4 : vector<32x128xf32>
    %38 = arith.addf %36, %37 : vector<32x128xf32>
    %39 = vector.extract_strided_slice %35 {offsets = [0, 0], sizes = [16, 128], strides = [1, 1]} : vector<32x128xf32> to vector<16x128xf32>
    %40 = vector.shape_cast %39 : vector<16x128xf32> to vector<16x4x32xf32>
    %41 = tpu.transpose %40, [1, 0, 2] : vector<16x4x32xf32> -> vector<4x16x32xf32>
    %42 = vector.extract_strided_slice %26 {offsets = [0, 0], sizes = [16, 128], strides = [1, 1]} : vector<32x128xf32> to vector<16x128xf32>
    %43 = vector.shape_cast %42 : vector<16x128xf32> to vector<16x4x32xf32>
    %44 = tpu.transpose %43, [1, 0, 2] : vector<16x4x32xf32> -> vector<4x16x32xf32>
    %45 = vector.extract_strided_slice %38 {offsets = [0, 0], sizes = [16, 128], strides = [1, 1]} : vector<32x128xf32> to vector<16x128xf32>
    %46 = vector.shape_cast %45 : vector<16x128xf32> to vector<16x4x32xf32>
    %47 = tpu.transpose %46, [1, 0, 2] : vector<16x4x32xf32> -> vector<4x16x32xf32>
    %48 = arith.mulf %41, %41 : vector<4x16x32xf32>
    %cst_30 = arith.constant dense<0.000000e+00> : vector<4x16xf32>
    %49 = vector.multi_reduction <add>, %48, %cst_30 [2] : vector<4x16x32xf32> to vector<4x16xf32>
    %50 = vector.shape_cast %49 : vector<4x16xf32> to vector<4x16x1xf32>
    %cst_31 = arith.constant 3.200000e+01 : f32
    %51 = vector.broadcast %cst_31 : f32 to vector<4x16x1xf32>
    %52 = arith.divf %50, %51 : vector<4x16x1xf32>
    %cst_32 = arith.constant 1.1920929E-7 : f32
    %53 = vector.broadcast %cst_32 : f32 to vector<4x16x1xf32>
    %54 = arith.addf %52, %53 : vector<4x16x1xf32>
    %55 = math.rsqrt %54 : vector<4x16x1xf32>
    %56 = vector.broadcast %55 : vector<4x16x1xf32> to vector<4x16x32xf32>
    %57 = arith.mulf %41, %56 : vector<4x16x32xf32>
    %cst_33 = arith.constant 0.176776692 : f32
    %58 = vector.broadcast %cst_33 : f32 to vector<4x16x32xf32>
    %59 = arith.mulf %57, %58 : vector<4x16x32xf32>
    %60 = arith.mulf %44, %44 : vector<4x16x32xf32>
    %cst_34 = arith.constant dense<0.000000e+00> : vector<4x16xf32>
    %61 = vector.multi_reduction <add>, %60, %cst_34 [2] : vector<4x16x32xf32> to vector<4x16xf32>
    %62 = vector.shape_cast %61 : vector<4x16xf32> to vector<4x16x1xf32>
    %cst_35 = arith.constant 3.200000e+01 : f32
    %63 = vector.broadcast %cst_35 : f32 to vector<4x16x1xf32>
    %64 = arith.divf %62, %63 : vector<4x16x1xf32>
    %cst_36 = arith.constant 1.1920929E-7 : f32
    %65 = vector.broadcast %cst_36 : f32 to vector<4x16x1xf32>
    %66 = arith.addf %64, %65 : vector<4x16x1xf32>
    %67 = math.rsqrt %66 : vector<4x16x1xf32>
    %68 = vector.broadcast %67 : vector<4x16x1xf32> to vector<4x16x32xf32>
    %69 = arith.mulf %44, %68 : vector<4x16x32xf32>
    %70 = arith.truncf %59 : vector<4x16x32xf32> to vector<4x16x32xbf16>
    %71 = arith.truncf %69 : vector<4x16x32xf32> to vector<4x16x32xbf16>
    "tpu.trace_start"() <{level = 10 : i32, message = "hqd,hkd->hqk"}> : () -> ()
    %cst_37 = arith.constant dense<0.000000e+00> : vector<4x16x16xf32>
    %72 = tpu.matmul %70, %71, %cst_37 {dimension_numbers = #tpu.dot_dimension_numbers<[2], [2], [1], [1], [0, 0, 0, 1, 1, 1], [0], [0]>} : vector<4x16x32xbf16>, vector<4x16x32xbf16>, vector<4x16x16xf32> -> vector<4x16x16xf32>
    "tpu.trace_stop"() : () -> ()
    %73 = vector.shape_cast %5 : vector<16x16xf32> to vector<1x16x16xf32>
    %74 = vector.broadcast %73 : vector<1x16x16xf32> to vector<4x16x16xf32>
    %75 = arith.addf %72, %74 : vector<4x16x16xf32>
    %cst_38 = arith.constant dense<0xFF800000> : vector<4x16xf32>
    %76 = vector.multi_reduction <maximumf>, %75, %cst_38 [2] : vector<4x16x16xf32> to vector<4x16xf32>
    %77 = vector.shape_cast %76 : vector<4x16xf32> to vector<4x16x1xf32>
    %78 = vector.broadcast %77 : vector<4x16x1xf32> to vector<4x16x16xf32>
    %79 = arith.subf %75, %78 : vector<4x16x16xf32>
    %80 = math.exp %79 : vector<4x16x16xf32>
    %cst_39 = arith.constant dense<0.000000e+00> : vector<4x16xf32>
    %81 = vector.multi_reduction <add>, %80, %cst_39 [2] : vector<4x16x16xf32> to vector<4x16xf32>
    %82 = vector.shape_cast %81 : vector<4x16xf32> to vector<4x16x1xf32>
    %83 = arith.truncf %80 : vector<4x16x16xf32> to vector<4x16x16xbf16>
    %84 = arith.truncf %47 : vector<4x16x32xf32> to vector<4x16x32xbf16>
    "tpu.trace_start"() <{level = 10 : i32, message = "hqk,hkd->hqd"}> : () -> ()
    %cst_40 = arith.constant dense<0.000000e+00> : vector<4x16x32xf32>
    %85 = tpu.matmul %83, %84, %cst_40 {dimension_numbers = #tpu.dot_dimension_numbers<[2], [1], [1], [2], [0, 0, 0, 1, 1, 2], [0], [0]>} : vector<4x16x16xbf16>, vector<4x16x32xbf16>, vector<4x16x32xf32> -> vector<4x16x32xf32>
    "tpu.trace_stop"() : () -> ()
    %86 = tpu.reciprocal %82 {approx = true} : vector<4x16x1xf32> -> vector<4x16x1xf32>
    %87 = vector.broadcast %86 : vector<4x16x1xf32> to vector<4x16x32xf32>
    %88 = arith.mulf %85, %87 : vector<4x16x32xf32>
    %89 = tpu.transpose %88, [1, 0, 2] : vector<4x16x32xf32> -> vector<16x4x32xf32>
    %90 = vector.shape_cast %89 : vector<16x4x32xf32> to vector<16x128xf32>
    %91 = vector.extract_strided_slice %35 {offsets = [16, 0], sizes = [16, 128], strides = [1, 1]} : vector<32x128xf32> to vector<16x128xf32>
    %92 = vector.shape_cast %91 : vector<16x128xf32> to vector<16x4x32xf32>
    %93 = tpu.transpose %92, [1, 0, 2] : vector<16x4x32xf32> -> vector<4x16x32xf32>
    %94 = vector.extract_strided_slice %26 {offsets = [16, 0], sizes = [16, 128], strides = [1, 1]} : vector<32x128xf32> to vector<16x128xf32>
    %95 = vector.shape_cast %94 : vector<16x128xf32> to vector<16x4x32xf32>
    %96 = tpu.transpose %95, [1, 0, 2] : vector<16x4x32xf32> -> vector<4x16x32xf32>
    %97 = vector.extract_strided_slice %38 {offsets = [16, 0], sizes = [16, 128], strides = [1, 1]} : vector<32x128xf32> to vector<16x128xf32>
    %98 = vector.shape_cast %97 : vector<16x128xf32> to vector<16x4x32xf32>
    %99 = tpu.transpose %98, [1, 0, 2] : vector<16x4x32xf32> -> vector<4x16x32xf32>
    %100 = arith.mulf %93, %93 : vector<4x16x32xf32>
    %cst_41 = arith.constant dense<0.000000e+00> : vector<4x16xf32>
    %101 = vector.multi_reduction <add>, %100, %cst_41 [2] : vector<4x16x32xf32> to vector<4x16xf32>
    %102 = vector.shape_cast %101 : vector<4x16xf32> to vector<4x16x1xf32>
    %cst_42 = arith.constant 3.200000e+01 : f32
    %103 = vector.broadcast %cst_42 : f32 to vector<4x16x1xf32>
    %104 = arith.divf %102, %103 : vector<4x16x1xf32>
    %cst_43 = arith.constant 1.1920929E-7 : f32
    %105 = vector.broadcast %cst_43 : f32 to vector<4x16x1xf32>
    %106 = arith.addf %104, %105 : vector<4x16x1xf32>
    %107 = math.rsqrt %106 : vector<4x16x1xf32>
    %108 = vector.broadcast %107 : vector<4x16x1xf32> to vector<4x16x32xf32>
    %109 = arith.mulf %93, %108 : vector<4x16x32xf32>
    %cst_44 = arith.constant 0.176776692 : f32
    %110 = vector.broadcast %cst_44 : f32 to vector<4x16x32xf32>
    %111 = arith.mulf %109, %110 : vector<4x16x32xf32>
    %112 = arith.mulf %96, %96 : vector<4x16x32xf32>
    %cst_45 = arith.constant dense<0.000000e+00> : vector<4x16xf32>
    %113 = vector.multi_reduction <add>, %112, %cst_45 [2] : vector<4x16x32xf32> to vector<4x16xf32>
    %114 = vector.shape_cast %113 : vector<4x16xf32> to vector<4x16x1xf32>
    %cst_46 = arith.constant 3.200000e+01 : f32
    %115 = vector.broadcast %cst_46 : f32 to vector<4x16x1xf32>
    %116 = arith.divf %114, %115 : vector<4x16x1xf32>
    %cst_47 = arith.constant 1.1920929E-7 : f32
    %117 = vector.broadcast %cst_47 : f32 to vector<4x16x1xf32>
    %118 = arith.addf %116, %117 : vector<4x16x1xf32>
    %119 = math.rsqrt %118 : vector<4x16x1xf32>
    %120 = vector.broadcast %119 : vector<4x16x1xf32> to vector<4x16x32xf32>
    %121 = arith.mulf %96, %120 : vector<4x16x32xf32>
    %122 = arith.truncf %111 : vector<4x16x32xf32> to vector<4x16x32xbf16>
    %123 = arith.truncf %121 : vector<4x16x32xf32> to vector<4x16x32xbf16>
    "tpu.trace_start"() <{level = 10 : i32, message = "hqd,hkd->hqk"}> : () -> ()
    %cst_48 = arith.constant dense<0.000000e+00> : vector<4x16x16xf32>
    %124 = tpu.matmul %122, %123, %cst_48 {dimension_numbers = #tpu.dot_dimension_numbers<[2], [2], [1], [1], [0, 0, 0, 1, 1, 1], [0], [0]>} : vector<4x16x32xbf16>, vector<4x16x32xbf16>, vector<4x16x16xf32> -> vector<4x16x16xf32>
    "tpu.trace_stop"() : () -> ()
    %125 = vector.shape_cast %5 : vector<16x16xf32> to vector<1x16x16xf32>
    %126 = vector.broadcast %125 : vector<1x16x16xf32> to vector<4x16x16xf32>
    %127 = arith.addf %124, %126 : vector<4x16x16xf32>
    %cst_49 = arith.constant dense<0xFF800000> : vector<4x16xf32>
    %128 = vector.multi_reduction <maximumf>, %127, %cst_49 [2] : vector<4x16x16xf32> to vector<4x16xf32>
    %129 = vector.shape_cast %128 : vector<4x16xf32> to vector<4x16x1xf32>
    %130 = vector.broadcast %129 : vector<4x16x1xf32> to vector<4x16x16xf32>
    %131 = arith.subf %127, %130 : vector<4x16x16xf32>
    %132 = math.exp %131 : vector<4x16x16xf32>
    %cst_50 = arith.constant dense<0.000000e+00> : vector<4x16xf32>
    %133 = vector.multi_reduction <add>, %132, %cst_50 [2] : vector<4x16x16xf32> to vector<4x16xf32>
    %134 = vector.shape_cast %133 : vector<4x16xf32> to vector<4x16x1xf32>
    %135 = arith.truncf %132 : vector<4x16x16xf32> to vector<4x16x16xbf16>
    %136 = arith.truncf %99 : vector<4x16x32xf32> to vector<4x16x32xbf16>
    "tpu.trace_start"() <{level = 10 : i32, message = "hqk,hkd->hqd"}> : () -> ()
    %cst_51 = arith.constant dense<0.000000e+00> : vector<4x16x32xf32>
    %137 = tpu.matmul %135, %136, %cst_51 {dimension_numbers = #tpu.dot_dimension_numbers<[2], [1], [1], [2], [0, 0, 0, 1, 1, 2], [0], [0]>} : vector<4x16x16xbf16>, vector<4x16x32xbf16>, vector<4x16x32xf32> -> vector<4x16x32xf32>
    "tpu.trace_stop"() : () -> ()
    %138 = tpu.reciprocal %134 {approx = true} : vector<4x16x1xf32> -> vector<4x16x1xf32>
    %139 = vector.broadcast %138 : vector<4x16x1xf32> to vector<4x16x32xf32>
    %140 = arith.mulf %137, %139 : vector<4x16x32xf32>
    %141 = tpu.transpose %140, [1, 0, 2] : vector<4x16x32xf32> -> vector<16x4x32xf32>
    %142 = vector.shape_cast %141 : vector<16x4x32xf32> to vector<16x128xf32>
    %143 = tpu.concatenate %90, %142 in 0 : vector<16x128xf32>, vector<16x128xf32> -> vector<32x128xf32>
    %144 = arith.truncf %143 : vector<32x128xf32> to vector<32x128xbf16>
    %c0_52 = arith.constant 0 : index
    %c0_53 = arith.constant 0 : index
    %c0_54 = arith.constant 0 : index
    %145 = vector.load %arg11[%c0_52, %c0_53, %c0_54] : memref<1x128x128xbf16, #tpu.memory_space<vmem>>, vector<1x128x128xbf16>
    %146 = vector.shape_cast %145 : vector<1x128x128xbf16> to vector<128x128xbf16>
    %cst_55 = arith.constant dense<0.000000e+00> : vector<32x128xf32>
    %147 = tpu.matmul %144, %146, %cst_55 {dimension_numbers = #tpu.dot_dimension_numbers<[1], [0], [0], [1], [0, 0, 1, 1], [], []>} : vector<32x128xbf16>, vector<128x128xbf16>, vector<32x128xf32> -> vector<32x128xf32>
    %148 = arith.addf %6, %147 : vector<32x128xf32>
    %149 = arith.mulf %148, %148 : vector<32x128xf32>
    %cst_56 = arith.constant dense<0.000000e+00> : vector<32xf32>
    %150 = vector.multi_reduction <add>, %149, %cst_56 [1] : vector<32x128xf32> to vector<32xf32>
    %151 = vector.shape_cast %150 : vector<32xf32> to vector<32x1xf32>
    %cst_57 = arith.constant 1.280000e+02 : f32
    %152 = vector.broadcast %cst_57 : f32 to vector<32x1xf32>
    %153 = arith.divf %151, %152 : vector<32x1xf32>
    %cst_58 = arith.constant 1.1920929E-7 : f32
    %154 = vector.broadcast %cst_58 : f32 to vector<32x1xf32>
    %155 = arith.addf %153, %154 : vector<32x1xf32>
    %156 = math.rsqrt %155 : vector<32x1xf32>
    %157 = vector.broadcast %156 : vector<32x1xf32> to vector<32x128xf32>
    %158 = arith.mulf %148, %157 : vector<32x128xf32>
    %159 = arith.truncf %158 : vector<32x128xf32> to vector<32x128xbf16>
    %c0_59 = arith.constant 0 : index
    %c0_60 = arith.constant 0 : index
    %c0_61 = arith.constant 0 : index
    %160 = vector.load %arg12[%c0_59, %c0_60, %c0_61] : memref<1x128x512xbf16, #tpu.memory_space<vmem>>, vector<1x128x512xbf16>
    %161 = vector.shape_cast %160 : vector<1x128x512xbf16> to vector<128x512xbf16>
    %cst_62 = arith.constant dense<0.000000e+00> : vector<32x512xf32>
    %162 = tpu.matmul %159, %161, %cst_62 {dimension_numbers = #tpu.dot_dimension_numbers<[1], [0], [0], [1], [0, 0, 1, 1], [], []>} : vector<32x128xbf16>, vector<128x512xbf16>, vector<32x512xf32> -> vector<32x512xf32>
    %cst_63 = arith.constant 0.000000e+00 : f32
    %163 = vector.broadcast %cst_63 : f32 to vector<32x512xf32>
    %164 = arith.maximumf %162, %163 : vector<32x512xf32>
    %165 = arith.mulf %164, %164 : vector<32x512xf32>
    %166 = arith.truncf %165 : vector<32x512xf32> to vector<32x512xbf16>
    %c0_64 = arith.constant 0 : index
    %c0_65 = arith.constant 0 : index
    %c0_66 = arith.constant 0 : index
    %167 = vector.load %arg13[%c0_64, %c0_65, %c0_66] : memref<1x512x128xbf16, #tpu.memory_space<vmem>>, vector<1x512x128xbf16>
    %168 = vector.shape_cast %167 : vector<1x512x128xbf16> to vector<512x128xbf16>
    %cst_67 = arith.constant dense<0.000000e+00> : vector<32x128xf32>
    %169 = tpu.matmul %166, %168, %cst_67 {dimension_numbers = #tpu.dot_dimension_numbers<[1], [0], [0], [1], [0, 0, 1, 1], [], []>} : vector<32x512xbf16>, vector<512x128xbf16>, vector<32x128xf32> -> vector<32x128xf32>
    %170 = arith.addf %148, %169 : vector<32x128xf32>
    %c0_68 = arith.constant 0 : index
    %c0_69 = arith.constant 0 : index
    %171 = vector.load %arg15[%c0_68, %c0_69] : memref<32x128xf32, #tpu.memory_space<vmem>>, vector<32x128xf32>
    tpu.vector_store %arg15[%c0_68, %c0_69], %170 {strides = array<i32>} : memref<32x128xf32, #tpu.memory_space<vmem>>, vector<32x128xf32>,
    %c2_i32 = arith.constant 2 : i32
    %172 = arith.cmpi eq, %arg1, %c2_i32 : i32
    %173 = arith.extui %172 : i1 to i32
    %c0_i32_70 = arith.constant 0 : i32
    %174 = arith.cmpi ne, %173, %c0_i32_70 : i32
    scf.if %174 {
      %175 = arith.mulf %170, %170 : vector<32x128xf32>
      %cst_71 = arith.constant dense<0.000000e+00> : vector<32xf32>
      %176 = vector.multi_reduction <add>, %175, %cst_71 [1] : vector<32x128xf32> to vector<32xf32>
      %177 = vector.shape_cast %176 : vector<32xf32> to vector<32x1xf32>
      %cst_72 = arith.constant 1.280000e+02 : f32
      %178 = vector.broadcast %cst_72 : f32 to vector<32x1xf32>
      %179 = arith.divf %177, %178 : vector<32x1xf32>
      %cst_73 = arith.constant 1.1920929E-7 : f32
      %180 = vector.broadcast %cst_73 : f32 to vector<32x1xf32>
      %181 = arith.addf %179, %180 : vector<32x1xf32>
      %182 = math.rsqrt %181 : vector<32x1xf32>
      %183 = vector.broadcast %182 : vector<32x1xf32> to vector<32x128xf32>
      %184 = arith.mulf %170, %183 : vector<32x128xf32>
      %185 = arith.truncf %184 : vector<32x128xf32> to vector<32x128xbf16>
      %186 = vector.shape_cast %185 : vector<32x128xbf16> to vector<2x16x128xbf16>
      %c0_74 = arith.constant 0 : index
      %c0_75 = arith.constant 0 : index
      %c0_76 = arith.constant 0 : index
      %187 = vector.load %arg14[%c0_74, %c0_75, %c0_76] : memref<2x16x128xbf16, #tpu.memory_space<vmem>>, vector<2x16x128xbf16>
      tpu.vector_store %arg14[%c0_74, %c0_75, %c0_76], %186 {strides = array<i32>} : memref<2x16x128xbf16, #tpu.memory_space<vmem>>, vector<2x16x128xbf16>,
    } else {
    }
    return
  }
  func.func @transform_0(%arg0: i32, %arg1: i32) -> (i32, i32, i32) {
    %c0_i32 = arith.constant 0 : i32
    %c0_i32_0 = arith.constant 0 : i32
    %c0_i32_1 = arith.constant 0 : i32
    return %arg0, %c0_i32, %c0_i32_0 : i32, i32, i32
  }
  func.func @transform_1(%arg0: i32, %arg1: i32) -> (i32, i32) {
    %c0_i32 = arith.constant 0 : i32
    %c0_i32_0 = arith.constant 0 : i32
    %c0_i32_1 = arith.constant 0 : i32
    return %c0_i32, %c0_i32_0 : i32, i32
  }
  func.func @transform_2(%arg0: i32, %arg1: i32) -> (i32, i32) {
    %c0_i32 = arith.constant 0 : i32
    %c0_i32_0 = arith.constant 0 : i32
    %c0_i32_1 = arith.constant 0 : i32
    return %c0_i32, %c0_i32_0 : i32, i32
  }
  func.func @transform_3(%arg0: i32, %arg1: i32) -> (i32, i32) {
    %c0_i32 = arith.constant 0 : i32
    %c0_i32_0 = arith.constant 0 : i32
    %c0_i32_1 = arith.constant 0 : i32
    return %c0_i32, %c0_i32_0 : i32, i32
  }
  func.func @transform_4(%arg0: i32, %arg1: i32) -> (i32, i32, i32) {
    %c0_i32 = arith.constant 0 : i32
    %c0_i32_0 = arith.constant 0 : i32
    %c0_i32_1 = arith.constant 0 : i32
    return %arg1, %c0_i32, %c0_i32_0 : i32, i32, i32
  }
  func.func @transform_5(%arg0: i32, %arg1: i32) -> (i32, i32, i32) {
    %c0_i32 = arith.constant 0 : i32
    %c0_i32_0 = arith.constant 0 : i32
    %c0_i32_1 = arith.constant 0 : i32
    return %arg1, %c0_i32, %c0_i32_0 : i32, i32, i32
  }
  func.func @transform_6(%arg0: i32, %arg1: i32) -> (i32, i32, i32) {
    %c0_i32 = arith.constant 0 : i32
    %c0_i32_0 = arith.constant 0 : i32
    %c0_i32_1 = arith.constant 0 : i32
    return %arg1, %c0_i32, %c0_i32_0 : i32, i32, i32
  }
  func.func @transform_7(%arg0: i32, %arg1: i32) -> (i32, i32, i32) {
    %c0_i32 = arith.constant 0 : i32
    %c0_i32_0 = arith.constant 0 : i32
    %c0_i32_1 = arith.constant 0 : i32
    return %arg1, %c0_i32, %c0_i32_0 : i32, i32, i32
  }
  func.func @transform_8(%arg0: i32, %arg1: i32) -> (i32, i32, i32) {
    %c0_i32 = arith.constant 0 : i32
    %c0_i32_0 = arith.constant 0 : i32
    %c0_i32_1 = arith.constant 0 : i32
    return %arg1, %c0_i32, %c0_i32_0 : i32, i32, i32
  }
  func.func @transform_9(%arg0: i32, %arg1: i32) -> (i32, i32, i32) {
    %c0_i32 = arith.constant 0 : i32
    %c0_i32_0 = arith.constant 0 : i32
    %c0_i32_1 = arith.constant 0 : i32
    return %arg1, %c0_i32, %c0_i32_0 : i32, i32, i32
  }
  func.func @transform_10(%arg0: i32, %arg1: i32) -> (i32, i32, i32) {
    %c0_i32 = arith.constant 0 : i32
    %c0_i32_0 = arith.constant 0 : i32
    %c0_i32_1 = arith.constant 0 : i32
    return %arg1, %c0_i32, %c0_i32_0 : i32, i32, i32
  }
  func.func @transform_11(%arg0: i32, %arg1: i32) -> (i32, i32, i32) {
    %c0_i32 = arith.constant 0 : i32
    %c0_i32_0 = arith.constant 0 : i32
    %c0_i32_1 = arith.constant 0 : i32
    return %arg1, %c0_i32, %c0_i32_0 : i32, i32, i32
  }
  func.func @transform_12(%arg0: i32, %arg1: i32) -> (i32, i32, i32) {
    %c0_i32 = arith.constant 0 : i32
    %c0_i32_0 = arith.constant 0 : i32
    %c0_i32_1 = arith.constant 0 : i32
    return %arg0, %c0_i32, %c0_i32_0 : i32, i32, i32
  }
}

</mosaic_0001>

<bundles_post_ra>
// kernel: tpu_custom_call.1
= control target key start
LH: loop header
LB: loop body
LE: loop exit
PB: predicated region body
PF: predicated region fallthrough
CT: control target
= control target key end

     0   :  { %s9264_s0 = inlined_call_operand.hbm [shape: f32[2,16,128], index: 0, kind: input, shape index: {}]   ;;  %s9265_s1 = inlined_call_operand.hbm [shape: f32[32,128], index: 1, kind: input, shape index: {}]   ;;  %s9266_s2 = inlined_call_operand.hbm [shape: f32[32,128], index: 2, kind: input, shape index: {}]   ;;  %s9267_s3 = inlined_call_operand.hbm [shape: f32[16,16], index: 3, kind: input, shape index: {}]   ;;  %s9268_s4 = inlined_call_operand.hbm [shape: bf16[3,128,128], index: 4, kind: input, shape index: {}]   ;;  %s9269_s5 = inlined_call_operand.hbm [shape: bf16[3,128,128], index: 5, kind: input, shape index: {}]   ;;  %s9270_s6 = inlined_call_operand.hbm [shape: bf16[3,128,128], index: 6, kind: input, shape index: {}]   ;;  %s9271_s7 = inlined_call_operand.hbm [shape: bf16[3,128,128], index: 7, kind: input, shape index: {}]   ;;  %s9272_s8 = inlined_call_operand.hbm [shape: bf16[3,128,128], index: 8, kind: input, shape index: {}]   ;;  %s9273_s9 = inlined_call_operand.hbm [shape: bf16[3,128,128], index: 9, kind: input, shape index: {}]   ;;  %s9274_s10 = inlined_call_operand.hbm [shape: bf16[3,128,512], index: 10, kind: input, shape index: {}]   ;;  %s9275_s11 = inlined_call_operand.hbm [shape: bf16[3,512,128], index: 11, kind: input, shape index: {}]   ;;  %s9276_s12 = inlined_call_operand.hbm [shape: bf16[2,16,128], index: 12, kind: output, shape index: {}]  }
   0x1   :  { %9296 = sst [smem:[#allocation33_spill]] %s9264_s0 }
   0x2   :  { %9297 = sst [smem:[#allocation34_spill]] %s9268_s4 }
   0x3   :  { %9298 = sst [smem:[#allocation35_spill]] %s9276_s12 }
   0x4   :  { %17 = vsyncpa [#allocation4], 0 }
   0x5   :  { %18 = vsyncpa [#allocation7], 0 }
   0x6   :  { %19 = vsyncpa [#allocation10], 0 }
   0x7   :  { %20 = vsyncpa [#allocation5], 0  ;;  %s7715_s21 = smov 0   ;;  %s7717_s22 = smov 0  }
   0x8   :  { %s7719_s23 = smov 0   ;;  %s7721_s24 = smov 0  }
   0x9   :  { %s7723_s25 = smov 0   ;;  %s7725_s26 = smov 0  }
   0xa LB: > { %9299 = sst [smem:[#allocation25_spill]] %s7604_s22  ;;  %s7744_s27 = sadd.s32 4294967295, %s7620_s26   ;;  %s7620_s26 = sphi %s7725_s26, %s26_s26   ;;  %s7616_s25 = sphi %s7723_s25, %s9343_s25   ;;  %s7612_s24 = sphi %s7721_s24, %s9342_s24   ;;  %s7608_s23 = sphi %s7719_s23, %s9341_s23   ;;  %s7604_s22 = sphi %s7717_s22, %s9340_s22   ;;  %s7600_s21 = sphi %s7715_s21, %s9337_s21  }
   0xb   : > { %9300 = sst [smem:[#allocation26_spill]] %s7612_s24  ;;  %p141_p0 = scmp.ne.s32.totalorder %s7608_s23, %s7604_s22 }
   0xc   : > { %9301 = sst [smem:[#allocation27_spill]] %s7620_s26  ;;  %p142_p1 = scmp.eq.s32.totalorder %s7620_s26, 0 }
   0xd   : > { %9302 = sst [smem:[#allocation28_spill]] %s7744_s27  ;;  %p147_p2 = scmp.ne.s32.totalorder %s7604_s22, %s7600_s21 }
   0xe   : > { %p9277_p3 = scmp.eq.s32.totalorder %s7744_s27, 0  ;;  %p143_p4 = por %p142_p1, %p141_p0 }
   0xf   : > { %p6135_p5 = scmp.ge.s32.totalorder %s7620_s26, 1  ;;  %p366_p7 = scmp.lt.s32.totalorder %s7620_s26, 4 }
  0x10   : > { %p7755_p6 = por %p9277_p3, %p147_p2  ;;  %s7622_s13 = smov [#allocation3]  }
  0x11   : > { %p7760_p8 = pnand %p6135_p5, %p366_p7  ;;  %s382_s14 = sshll.u32 %s7622_s13, 4  ;;  %s383_s14 = int_to_ptr.vmem [resolvable:$true] %s382_s14 }
  0x12   : > { %s9303_s29 = scalar_select %p7755_p6, 1, 0 }
  0x13   : > { %s9305_s30 = scalar_select %p7760_p8, 1, 0 }
  0x14   : > { %9304 = sst [smem:[#allocation29_spill]] %s9303_s29  ;;  %p6771_p9 = pneg %p7760_p8 }
  0x15   : > { %9306 = sst [smem:[#allocation30_spill]] %s9305_s30  ;;  %p6813_p10 = scmp.lt.s32.totalorder %s7620_s26, 3 }
  0x16   : > { %p7769_p11 = pnand %p6771_p9, %p9277_p3  ;;  %s35_s17 = sadd.s32 1, %s7616_s25 }
  0x17   : > { %p7773_p12 = pnand %p6813_p10, %p143_p4  ;;  %s7213_s18 = scalar_lea.vmem %s383_s14, 512 }
  0x18   : > { %p7204_p13 = pneg %p7769_p11  ;;  %p7214_p0 = scmp.ne.s32.totalorder %s383_s14, %s7213_s18 }
  0x19   : > { %p7221_p5 = scmp.lt.s32.totalorder %s383_s14, %s383_s14  ;;  %p7222_p7 = scmp.lt.s32.totalorder %s7213_s18, %s7213_s18 }
  0x1a   : > { %p7216_p1 = pnand %p7214_p0, %p7204_p13 }
  0x1b   : > { %p7223_p9 = por %p7222_p7, %p7221_p5 }
  0x1c   : > { %p7217_p2 = pneg %p7216_p1 }
  0x1e   : > { %p7224_p3 = pnand %p7223_p9, %p7217_p2 }
  0x20   : > { %7227 = shalt.err (!%p7224_p3)
}
  0x21   : > { %s9284_s19 = smov 128   ;;  %s9286_s20 = smov 8  }
  0x22   : > { %s9309_s0 = sld [smem:[#allocation33_spill]]  ;;  %p36_p3 = scmp.ge.s32.totalorder %s35_s17, 3 }
  0x23   : > { %s435_s18 = sand.u32 1, %s7620_s26   ;;  %s9288_s28 = sand.u32 1, %s7608_s23  }
  0x24   : > { %s9345_s17 = smov (%p36_p3, %s35_s17), 0  ;;  %s7797_s12 = sshll.u32 %s9288_s28, 6 }
  0x25   : > { %9310 = sst [smem:[#allocation31_spill]] %s9345_s17  ;;  %s131_s24 = ssub.s32 %s7616_s25, %s9345_s17 }
  0x26   : > { %p132_p4 = scmp.eq.s32.totalorder %s131_s24, 0  ;;  %s7802_s29 = sshll.u32 %s7616_s25, 10 }
  0x27   : > { %s9311_s4 = sld [smem:[#allocation34_spill]]  ;;  %p7818_p10 = pneg %p7773_p12 }
  0x28   : > { %6774 = dma.hbm_to_vmem [thread:$0]  (!%p7769_p11), %s9309_s0, 512, %s383_s14, [#allocation4], %s9284_s19, %s9284_s19, %s9286_s20  }
  0x29   : > { %s439_s14 = scalar_lea.vmem [#allocation11], %s7797_s12  ;;  %s9312_s19 = sadd.s32 1, %s7608_s23 }
  0x2a   : > { %s446_s13 = sshll.u32 %s439_s14, 4  ;;  %s7814_s0 = scalar_lea.sflag [#allocation4], %s435_s18  ;;  %s447_s13 = int_to_ptr.vmem [resolvable:$true] %s446_s13 }
  0x2b   : > { %s7812_s20 = scalar_select %p132_p4, %s7608_s23, %s9312_s19  }
  0x2c   : > { %s7241_s24 = scalar_lea.vmem %s447_s13, 1024  ;;  %s7625_s22 = smov [#allocation11]  }
  0x2d   : > { %s445_s21 = scalar_lea.hbm %s9311_s4, %s7802_s29  ;;  %9313 = sst [smem:[#allocation32_spill]] %s7812_s20 }
  0x2e   : > { %p7242_p0 = scmp.ne.s32.totalorder %s447_s13, %s7241_s24  ;;  %s7246_s27 = sshll.u32 %s7625_s22, 4  ;;  %s7247_s27 = int_to_ptr.vmem [resolvable:$false] %s7246_s27 }
  0x2f   : > { %s7248_s14 = scalar_lea.vmem %s7247_s27, 2048  ;;  %p7249_p5 = scmp.lt.s32.totalorder %s447_s13, %s7247_s27 }
  0x30   : > { %p7244_p1 = pnand %p7242_p0, %p7818_p10  ;;  %p7250_p7 = scmp.lt.s32.totalorder %s7248_s14, %s7241_s24 }
  0x32   : > { %p7245_p2 = pneg %p7244_p1  ;;  %p7251_p9 = por %p7250_p7, %p7249_p5 }
  0x34   : > { %p7252_p3 = pnand %p7251_p9, %p7245_p2 }
  0x36   : > { %7255 = shalt.err (!%p7252_p3)
}
  0x37   : > { %s9292_s19 = smov 64   ;;  %s9293_s18 = smov 4  }
  0x38   : > { %6787 = dma.hbm_to_vmem [thread:$0]  (!%p7773_p12), %s445_s21, 1024, %s447_s13, %s7814_s0, %s9292_s19, %s9292_s19, %s9293_s18  }
  0x39   : > { %s466_s27 = scalar_lea.hbm %s9269_s5, %s7802_s29  ;;  %s460_s24 = scalar_lea.vmem [#allocation12], %s7797_s12 }
  0x3a   : > { %s467_s14 = sshll.u32 %s460_s24, 4  ;;  %s7628_s20 = smov [#allocation12]   ;;  %s468_s14 = int_to_ptr.vmem [resolvable:$true] %s467_s14 }
  0x3b   : > { %s7269_s17 = scalar_lea.vmem %s468_s14, 1024  ;;  %s7274_s26 = sshll.u32 %s7628_s20, 4  ;;  %s7275_s26 = int_to_ptr.vmem [resolvable:$false] %s7274_s26 }
  0x3c   : > { %p7270_p4 = scmp.ne.s32.totalorder %s468_s14, %s7269_s17  ;;  %s7276_s30 = scalar_lea.vmem %s7275_s26, 2048 }
  0x3d   : > { %p7277_p2 = scmp.lt.s32.totalorder %s468_s14, %s7275_s26  ;;  %p7278_p5 = scmp.lt.s32.totalorder %s7276_s30, %s7269_s17 }
  0x3e   : > { %p7272_p0 = pnand %p7270_p4, %p7818_p10 }
  0x3f   : > { %p7279_p7 = por %p7278_p5, %p7277_p2 }
  0x40   : > { %p7273_p1 = pneg %p7272_p0 }
  0x42   : > { %p7280_p9 = pnand %p7279_p7, %p7273_p1 }
  0x44   : > { %7283 = shalt.err (!%p7280_p9)
}
  0x45   : > { %6790 = dma.hbm_to_vmem [thread:$0]  (!%p7773_p12), %s466_s27, 1024, %s468_s14, %s7814_s0, %s9292_s19, %s9292_s19, %s9293_s18  }
  0x46   : > { %s487_s20 = scalar_lea.hbm %s9270_s6, %s7802_s29  ;;  %s481_s13 = scalar_lea.vmem [#allocation13], %s7797_s12 }
  0x47   : > { %s488_s26 = sshll.u32 %s481_s13, 4  ;;  %s7629_s17 = smov [#allocation13]   ;;  %s489_s26 = int_to_ptr.vmem [resolvable:$true] %s488_s26 }
  0x48   : > { %s7297_s30 = scalar_lea.vmem %s489_s26, 1024  ;;  %s7302_s22 = sshll.u32 %s7629_s17, 4  ;;  %s7303_s22 = int_to_ptr.vmem [resolvable:$false] %s7302_s22 }
  0x49   : > { %p7298_p3 = scmp.ne.s32.totalorder %s489_s26, %s7297_s30  ;;  %s7304_s24 = scalar_lea.vmem %s7303_s22, 2048 }
  0x4a   : > { %p7305_p1 = scmp.lt.s32.totalorder %s489_s26, %s7303_s22  ;;  %p7306_p2 = scmp.lt.s32.totalorder %s7304_s24, %s7297_s30 }
  0x4b   : > { %p7300_p4 = pnand %p7298_p3, %p7818_p10 }
  0x4c   : > { %p7307_p5 = por %p7306_p2, %p7305_p1 }
  0x4d   : > { %p7301_p0 = pneg %p7300_p4 }
  0x4f   : > { %p7308_p7 = pnand %p7307_p5, %p7301_p0 }
  0x51   : > { %7311 = shalt.err (!%p7308_p7)
}
  0x52   : > { %6793 = dma.hbm_to_vmem [thread:$0]  (!%p7773_p12), %s487_s20, 1024, %s489_s26, %s7814_s0, %s9292_s19, %s9292_s19, %s9293_s18  }
  0x53   : > { %s508_s4 = scalar_lea.hbm %s9271_s7, %s7802_s29  ;;  %s502_s21 = scalar_lea.vmem [#allocation14], %s7797_s12 }
  0x54   : > { %s509_s13 = sshll.u32 %s502_s21, 4  ;;  %s7630_s17 = smov [#allocation14]   ;;  %s510_s13 = int_to_ptr.vmem [resolvable:$true] %s509_s13 }
  0x55   : > { %s7325_s30 = scalar_lea.vmem %s510_s13, 1024  ;;  %s7330_s22 = sshll.u32 %s7630_s17, 4  ;;  %s7331_s22 = int_to_ptr.vmem [resolvable:$false] %s7330_s22 }
  0x56   : > { %p7326_p9 = scmp.ne.s32.totalorder %s510_s13, %s7325_s30  ;;  %s7332_s24 = scalar_lea.vmem %s7331_s22, 2048 }
  0x57   : > { %p7333_p0 = scmp.lt.s32.totalorder %s510_s13, %s7331_s22  ;;  %p7334_p1 = scmp.lt.s32.totalorder %s7332_s24, %s7325_s30 }
  0x58   : > { %p7328_p3 = pnand %p7326_p9, %p7818_p10 }
  0x59   : > { %p7335_p2 = por %p7334_p1, %p7333_p0 }
  0x5a   : > { %p7329_p4 = pneg %p7328_p3 }
  0x5c   : > { %p7336_p5 = pnand %p7335_p2, %p7329_p4 }
  0x5e   : > { %7339 = shalt.err (!%p7336_p5)
}
  0x5f   : > { %6796 = dma.hbm_to_vmem [thread:$0]  (!%p7773_p12), %s508_s4, 1024, %s510_s13, %s7814_s0, %s9292_s19, %s9292_s19, %s9293_s18  }
  0x60   : > { %s529_s27 = scalar_lea.hbm %s9272_s8, %s7802_s29  ;;  %s523_s14 = scalar_lea.vmem [#allocation15], %s7797_s12 }
  0x61   : > { %s530_s21 = sshll.u32 %s523_s14, 4  ;;  %s7631_s17 = smov [#allocation15]   ;;  %s531_s21 = int_to_ptr.vmem [resolvable:$true] %s530_s21 }
  0x62   : > { %s7353_s30 = scalar_lea.vmem %s531_s21, 1024  ;;  %s7358_s22 = sshll.u32 %s7631_s17, 4  ;;  %s7359_s22 = int_to_ptr.vmem [resolvable:$false] %s7358_s22 }
  0x63   : > { %p7354_p7 = scmp.ne.s32.totalorder %s531_s21, %s7353_s30  ;;  %s7360_s24 = scalar_lea.vmem %s7359_s22, 2048 }
  0x64   : > { %p7361_p4 = scmp.lt.s32.totalorder %s531_s21, %s7359_s22  ;;  %p7362_p0 = scmp.lt.s32.totalorder %s7360_s24, %s7353_s30 }
  0x65   : > { %p7356_p9 = pnand %p7354_p7, %p7818_p10 }
  0x66   : > { %p7363_p1 = por %p7362_p0, %p7361_p4 }
  0x67   : > { %p7357_p3 = pneg %p7356_p9 }
  0x69   : > { %p7364_p2 = pnand %p7363_p1, %p7357_p3 }
  0x6b   : > { %7367 = shalt.err (!%p7364_p2)
}
  0x6c   : > { %6799 = dma.hbm_to_vmem [thread:$0]  (!%p7773_p12), %s529_s27, 1024, %s531_s21, %s7814_s0, %s9292_s19, %s9292_s19, %s9293_s18  }
  0x6d   : > { %s550_s20 = scalar_lea.hbm %s9273_s9, %s7802_s29  ;;  %s544_s26 = scalar_lea.vmem [#allocation16], %s7797_s12 }
  0x6e   : > { %s551_s14 = sshll.u32 %s544_s26, 4  ;;  %s7632_s17 = smov [#allocation16]   ;;  %s552_s14 = int_to_ptr.vmem [resolvable:$true] %s551_s14 }
  0x6f   : > { %s7381_s30 = scalar_lea.vmem %s552_s14, 1024  ;;  %s7386_s22 = sshll.u32 %s7632_s17, 4  ;;  %s7387_s22 = int_to_ptr.vmem [resolvable:$false] %s7386_s22 }
  0x70   : > { %p7382_p5 = scmp.ne.s32.totalorder %s552_s14, %s7381_s30  ;;  %s7388_s24 = scalar_lea.vmem %s7387_s22, 2048 }
  0x71   : > { %p7389_p3 = scmp.lt.s32.totalorder %s552_s14, %s7387_s22  ;;  %p7390_p4 = scmp.lt.s32.totalorder %s7388_s24, %s7381_s30 }
  0x72   : > { %p7384_p7 = pnand %p7382_p5, %p7818_p10 }
  0x73   : > { %p7391_p0 = por %p7390_p4, %p7389_p3 }
  0x74   : > { %p7385_p9 = pneg %p7384_p7 }
  0x76   : > { %p7392_p1 = pnand %p7391_p0, %p7385_p9 }
  0x78   : > { %7395 = shalt.err (!%p7392_p1)
}
  0x79   : > { %6802 = dma.hbm_to_vmem [thread:$0]  (!%p7773_p12), %s550_s20, 1024, %s552_s14, %s7814_s0, %s9292_s19, %s9292_s19, %s9293_s18  }
  0x7a   : > { %s7633_s12 = smov [#allocation6]   ;;  %s9315_s27 = sand.u32 1, %s7608_s23  }
  0x7b   : > { %s395_s29 = sshll.u32 %s7633_s12, 4  ;;  %s7897_s21 = sshll.u32 %s9315_s27, 8  ;;  %s396_s29 = int_to_ptr.vmem [resolvable:$true] %s395_s29 }
  0x7c   : > { %s7407_s4 = scalar_lea.vmem %s396_s29, 512  ;;  %p7415_p9 = scmp.lt.s32.totalorder %s396_s29, %s396_s29 }
  0x7d   : > { %p7408_p2 = scmp.ne.s32.totalorder %s396_s29, %s7407_s4  ;;  %p7416_p3 = scmp.lt.s32.totalorder %s7407_s4, %s7407_s4 }
  0x7f   : > { %p7410_p5 = pnand %p7408_p2, %p7204_p13  ;;  %p7417_p4 = por %p7416_p3, %p7415_p9 }
  0x81   : > { %p7411_p7 = pneg %p7410_p5 }
  0x83   : > { %p7418_p0 = pnand %p7417_p4, %p7411_p7 }
  0x85   : > { %7421 = shalt.err (!%p7418_p0)
}
  0x86   : > { %s9316_s13 = smov 8   ;;  %s9317_s20 = smov 128  }
  0x87   : > { %6777 = dma.hbm_to_vmem [thread:$0]  (!%p7769_p11), %s9265_s1, 512, %s396_s29, [#allocation7], %s9317_s20, %s9317_s20, %s9316_s13  }
  0x88   : > { %s9294_s30 = sshll.u32 %s7616_s25, 12  ;;  %s565_s17 = scalar_lea.vmem [#allocation17], %s7897_s21 }
  0x89   : > { %s572_s22 = sshll.u32 %s565_s17, 4  ;;  %s571_s27 = scalar_lea.hbm %s9274_s10, %s9294_s30  ;;  %s573_s22 = int_to_ptr.vmem [resolvable:$true] %s572_s22 }
  0x8a   : > { %s7435_s4 = scalar_lea.vmem %s573_s22, 4096  ;;  %s7634_s26 = smov [#allocation17]  }
  0x8b   : > { %p7436_p1 = scmp.ne.s32.totalorder %s573_s22, %s7435_s4  ;;  %s7440_s14 = sshll.u32 %s7634_s26, 4  ;;  %s7441_s14 = int_to_ptr.vmem [resolvable:$false] %s7440_s14 }
  0x8c   : > { %s7442_s19 = scalar_lea.vmem %s7441_s14, 8192  ;;  %p7443_p7 = scmp.lt.s32.totalorder %s573_s22, %s7441_s14 }
  0x8d   : > { %p7438_p2 = pnand %p7436_p1, %p7818_p10  ;;  %p7444_p9 = scmp.lt.s32.totalorder %s7442_s19, %s7435_s4 }
  0x8f   : > { %p7439_p5 = pneg %p7438_p2  ;;  %p7445_p3 = por %p7444_p9, %p7443_p7 }
  0x91   : > { %p7446_p4 = pnand %p7445_p3, %p7439_p5 }
  0x93   : > { %7449 = shalt.err (!%p7446_p4)
}
  0x94   : > { %s7635_s29 = smov 256   ;;  %s7636_s17 = smov 16  }
  0x95   : > { %6805 = dma.hbm_to_vmem [thread:$0]  (!%p7773_p12), %s571_s27, 4096, %s573_s22, %s7814_s0, %s7635_s29, %s7635_s29, %s7636_s17  }
  0x96   : > { %s7637_s24 = smov [#allocation8]   ;;  %s7638_s18 = smov [#allocation9]  }
  0x97   : > { %s408_s12 = sshll.u32 %s7637_s24, 4  ;;  %s421_s30 = sshll.u32 %s7638_s18, 4  ;;  %s409_s12 = int_to_ptr.vmem [resolvable:$true] %s408_s12  ;;  %s422_s30 = int_to_ptr.vmem [resolvable:$true] %s421_s30 }
  0x98   : > { %s7461_s26 = scalar_lea.vmem %s409_s12, 512  ;;  %p7469_p5 = scmp.lt.s32.totalorder %s409_s12, %s409_s12 }
  0x99   : > { %p7462_p0 = scmp.ne.s32.totalorder %s409_s12, %s7461_s26  ;;  %p7470_p7 = scmp.lt.s32.totalorder %s7461_s26, %s7461_s26 }
  0x9b   : > { %p7464_p1 = pnand %p7462_p0, %p7204_p13  ;;  %p7471_p9 = por %p7470_p7, %p7469_p5 }
  0x9d   : > { %p7465_p2 = pneg %p7464_p1 }
  0x9f   : > { %p7472_p3 = pnand %p7471_p9, %p7465_p2 }
  0xa1   : > { %7475 = shalt.err (!%p7472_p3)
}
  0xa2   : > { %6780 = dma.hbm_to_vmem [thread:$0]  (!%p7769_p11), %s9266_s2, 512, %s409_s12, [#allocation7], %s9317_s20, %s9317_s20, %s9316_s13  }
  0xa3   : > { %s7487_s22 = scalar_lea.vmem %s422_s30, 256  ;;  %p7495_p6 = scmp.lt.s32.totalorder %s422_s30, %s422_s30 }
  0xa4   : > { %p7488_p4 = scmp.ne.s32.totalorder %s422_s30, %s7487_s22  ;;  %p7496_p5 = scmp.lt.s32.totalorder %s7487_s22, %s7487_s22 }
  0xa6   : > { %p7490_p0 = pnand %p7488_p4, %p7204_p13  ;;  %p7497_p2 = por %p7496_p5, %p7495_p6 }
  0xa8   : > { %p7491_p1 = pneg %p7490_p0 }
  0xaa   : > { %p7498_p7 = pnand %p7497_p2, %p7491_p1 }
  0xac   : > { %7501 = shalt.err (!%p7498_p7)
}
  0xad   : > { %6783 = dma.hbm_to_vmem [thread:$0]  (!%p7769_p11), %s9267_s3, 256, %s422_s30, [#allocation10], %s9317_s20, %s9317_s20, %s9316_s13  }
  0xae   : > { %s9318_s14 = sshll.u32 %s7616_s25, 12  ;;  %s586_s12 = scalar_lea.vmem [#allocation18], %s7897_s21 }
  0xaf   : > { %s592_s24 = scalar_lea.hbm %s9275_s11, %s9318_s14  ;;  %s593_s26 = sshll.u32 %s586_s12, 4  ;;  %s594_s26 = int_to_ptr.vmem [resolvable:$true] %s593_s26 }
  0xb0   : > { %s7515_s19 = scalar_lea.vmem %s594_s26, 4096  ;;  %s7639_s15 = smov [#allocation18]  }
  0xb1   : > { %p7516_p6 = scmp.ne.s32.totalorder %s594_s26, %s7515_s19  ;;  %s7520_s18 = sshll.u32 %s7639_s15, 4  ;;  %s7521_s18 = int_to_ptr.vmem [resolvable:$false] %s7520_s18 }
  0xb2   : > { %s7522_s22 = scalar_lea.vmem %s7521_s18, 8192  ;;  %p7523_p3 = scmp.lt.s32.totalorder %s594_s26, %s7521_s18 }
  0xb3   : > { %p7518_p13 = pnand %p7516_p6, %p7818_p10  ;;  %p7524_p4 = scmp.lt.s32.totalorder %s7522_s22, %s7515_s19 }
  0xb5   : > { %p7519_p9 = pneg %p7518_p13  ;;  %p7525_p11 = por %p7524_p4, %p7523_p3 }
  0xb7   : > { %p7526_p0 = pnand %p7525_p11, %p7519_p9 }
  0xb9   : > { %7529 = shalt.err (!%p7526_p0)
}
  0xba   : > { %s9319_s13 = smov 4   ;;  %s9320_s21 = smov 64  }
  0xbb   : > { %6808 = dma.hbm_to_vmem [thread:$0]  (!%p7773_p12), %s592_s24, 4096, %s594_s26, %s7814_s0, %s9320_s21, %s9320_s21, %s9319_s13  }
  0xbc   : > { %605 = sbr.rel (%p7760_p8) target bundleno = 3116 (0xc2c), region = 68  ;;  %s9322_s28 = sld [smem:[#allocation28_spill]] (!%p7760_p8) }
  0xc2   : > { %p9323_p10 = scmp.eq.s32.totalorder %s9322_s28, 0 }
  0xc4   : > { %7579 = dma.done.wait (%p9323_p10), [#allocation4], 512   ;;  %p9324_p1 = pmov %p9323_p10 }
  0xc6   : > { %7581 = vsyncadd (%p9324_p1), [#allocation4], 4294966784  ;;  %p9325_p5 = pmov %p9324_p1 }
  0xc7   : > { %p9326_p2 = pmov %p9324_p1 }
  0xc8   : > { %7583 = dma.done.wait (%p9325_p5), [#allocation7], 1024  }
  0xc9   : > { %7585 = vsyncadd (%p9326_p2), [#allocation7], 4294966272  ;;  %p9327_p7 = pmov %p9324_p1 }
  0xca   : > { %p9328_p12 = pmov %p9324_p1 }
  0xcb   : > { %7587 = dma.done.wait (%p9327_p7), [#allocation10], 256  }
  0xcc   : > { %7589 = vsyncadd (%p9328_p12), [#allocation10], 4294967040  ;;  %s9329_s0 = sld [smem:[#allocation25_spill]]  ;;  %s623_s30 = sand.u32 1, %s9322_s28  }
  0xcd   : > { %s9330_s16 = sld [smem:[#allocation29_spill]]  ;;  %s624_s14 = scalar_lea.sflag [#allocation4], %s623_s30 }
  0xd2   : > { %s625_s27 = sand.u32 1, %s9329_s0  }
  0xd3   : > { %s6170_s4 = sshll.u32 %s625_s27, 6  ;;  %p9331_p8 = scmp.ne.s32.totalorder %s9330_s16, 0 }
  0xd4   : > { %s7974_s29 = scalar_lea.vmem [#allocation11], %s6170_s4 }
  0xd5   : > { %7591 = dma.done.wait (%p9331_p8), %s624_s14, 14336  }
  0xd6   : > { %7593 = vsyncadd (%p9331_p8), %s624_s14, 4294952960  ;;  %s6176_s17 = sshll.u32 %s625_s27, 8  ;;  %s7980_s24 = scalar_lea.vmem [#allocation12], %s6170_s4 }
  0xd7   : > { %s7982_s12 = scalar_lea.vmem [#allocation13], %s6170_s4  ;;  %s7984_s26 = scalar_lea.vmem [#allocation14], %s6170_s4 }
  0xd8   : > { %s7986_s19 = scalar_lea.vmem [#allocation15], %s6170_s4  ;;  %s7988_s15 = scalar_lea.vmem [#allocation16], %s6170_s4 }
  0xd9   : > { %s7990_s18 = scalar_lea.vmem [#allocation17], %s6176_s17  ;;  %s7992_s22 = scalar_lea.vmem [#allocation18], %s6176_s17 }
  0xda   : > { %s9332_s13 = sld [smem:[#allocation26_spill]] }
  0xe0   : > { %p6178_p6 = scmp.ne.s32.totalorder %s9332_s13, 0 }
  0xe2   : > { %767 = sbr.rel (%p6178_p6) target bundleno = 234 (0xea), region = 120 }
  0xe7   : > { %v768_v0 = vld [vmem:[#allocation3] sm:$0xff]  ;;  %v769_v1 = vld [vmem:[#allocation3 + $0x8] sm:$0xff]  ;;  %v770_v2 = vld [vmem:[#allocation3 + $0x10] sm:$0xff] }
  0xe8   : > { %772 = vst [vmem:[#allocation2 + $0x10] sm:$0xff] %v768_v0  ;;  %773 = vst [vmem:[#allocation2] sm:$0xff] %v769_v1  ;;  %v771_v3 = vld [vmem:[#allocation3 + $0x18] sm:$0xff] }
  0xe9   : > { %774 = vst [vmem:[#allocation2 + $0x18] sm:$0xff] %v770_v2  ;;  %775 = vst [vmem:[#allocation2 + $0x8] sm:$0xff] %v771_v3 }
  0xea PF: > { %v6918_v10 = vld [vmem:[%s7974_s29 + $0x38] sm:$0xff]   ;;  %v6920_v14 = vld [vmem:[%s7974_s29 + $0x30] sm:$0xff]   ;;  %v6922_v16 = vld [vmem:[%s7974_s29 + $0x28] sm:$0xff]   ;;  %s7640_s21 = smov 96   ;;  %s7641_s20 = smov 64   ;;  %vm2294_vm0 = vcmask 261120  }
  0xeb   : > { %v6919_v13 = vld [vmem:[%s7980_s24 + $0x38] sm:$0xff]   ;;  %6519 = vmatprep.subr.bf16.mxu0 %v6918_v10  ;;  %v6921_v15 = vld [vmem:[%s7980_s24 + $0x30] sm:$0xff]   ;;  %v6923_v17 = vld [vmem:[%s7980_s24 + $0x28] sm:$0xff]   ;;  %s7642_s28 = smov 32   ;;  %vm7646_vm1 = vmmov 0   ;;  %vm2620_vm2 = vcmask 130048  }
  0xec   : > { %6539 = vmatprep.subr.bf16.mxu1 %v6919_v13  ;;  %6520 = vmatpush3.bf16.msra.mxu0 %v6918_v10  ;;  %v6924_v18 = vld [vmem:[%s7974_s29 + $0x20] sm:$0xff]   ;;  %v6926_v20 = vld [vmem:[%s7974_s29 + $0x18] sm:$0xff]   ;;  %v6928_v22 = vld [vmem:[%s7974_s29 + $0x10] sm:$0xff]   ;;  %vm3191_vm3 = vcmask 523264   ;;  %vm3194_vm4 = vcmask 785408   ;;  %s9333_s0 = sld [smem:[#allocation26_spill]] }
  0xed   : > { %6540 = vmatpush3.bf16.msra.mxu1 %v6919_v13  ;;  %6521 = vmatprep.subr.bf16.mxu0 %v6920_v14  ;;  %v6925_v19 = vld [vmem:[%s7980_s24 + $0x20] sm:$0xff]   ;;  %v6927_v21 = vld [vmem:[%s7980_s24 + $0x18] sm:$0xff]   ;;  %v6929_v23 = vld [vmem:[%s7980_s24 + $0x10] sm:$0xff]  }
  0xee   : > { %6541 = vmatprep.subr.bf16.mxu1 %v6921_v15  ;;  %v6930_v24 = vld [vmem:[%s7974_s29 + $0x8] sm:$0xff]   ;;  %v6932_v26 = vld [vmem:[%s7974_s29] sm:$0xff]   ;;  %v6934_v28 = vld [vmem:[%s7982_s12 + $0x38] sm:$0xff]  }
  0xef   : > { %v7997_v5 = vld [vmem:[#allocation2 + $0x10] sm:$0xff]  ;;  %v8005_v9 = vld [vmem:[#allocation2] sm:$0xff]  ;;  %v6931_v25 = vld [vmem:[%s7980_s24 + $0x8] sm:$0xff]  }
  0xf0   : > { %v7995_v4 = vld [vmem:[#allocation2 + $0x18] sm:$0xff]  ;;  %v7999_v6 = vld [vmem:[#allocation2 + $0x8] sm:$0xff]  ;;  %v790_v8 = vmul.f32 %v7997_v5, %v7997_v5  ;;  %v791_v12 = vmul.f32 %v8005_v9, %v8005_v9  ;;  %6522 = vmatpush3.bf16.msra.mxu0 %v6920_v14  ;;  %v6933_v27 = vld [vmem:[%s7980_s24] sm:$0xff]  }
  0xf1   : > { %v792_v7 = vmul.f32 %v7995_v4, %v7995_v4  ;;  %v793_v11 = vmul.f32 %v7999_v6, %v7999_v6  ;;  %6542 = vmatpush3.bf16.msra.mxu1 %v6921_v15  ;;  %6523 = vmatprep.subr.bf16.mxu0 %v6922_v16  ;;  %v6935_v29 = vld [vmem:[%s7984_s26 + $0x38] sm:$0xff]   ;;  %v6936_v52 = vld [vmem:[%s7982_s12 + $0x30] sm:$0xff]   ;;  %v6938_v54 = vld [vmem:[%s7982_s12 + $0x28] sm:$0xff]  }
  0xf2   : > { %794 = vadd.xlane.f32.xlu0 %v790_v8  ;;  %6543 = vmatprep.subr.bf16.mxu1 %v6923_v17  ;;  %v6937_v53 = vld [vmem:[%s7984_s26 + $0x30] sm:$0xff]   ;;  %v6939_v55 = vld [vmem:[%s7984_s26 + $0x28] sm:$0xff]   ;;  %v6940_v56 = vld [vmem:[%s7982_s12 + $0x20] sm:$0xff]   ;;  %p6339_p13 = scmp.ne.s32.totalorder %s9333_s0, 2 }
  0xf3   : > { %798 = vadd.xlane.f32.xlu1 %v792_v7  ;;  %v6941_v57 = vld [vmem:[%s7984_s26 + $0x20] sm:$0xff]   ;;  %v6942_v58 = vld [vmem:[%s7982_s12 + $0x18] sm:$0xff]   ;;  %v6944_v60 = vld [vmem:[%s7982_s12 + $0x10] sm:$0xff]  }
  0xf4   : > { %6524 = vmatpush3.bf16.msra.mxu0 %v6922_v16  ;;  %v6943_v59 = vld [vmem:[%s7984_s26 + $0x18] sm:$0xff]   ;;  %v6945_v61 = vld [vmem:[%s7984_s26 + $0x10] sm:$0xff]   ;;  %v6946_v62 = vld [vmem:[%s7982_s12 + $0x8] sm:$0xff]  }
  0xf5   : > { %6544 = vmatpush3.bf16.msra.mxu1 %v6923_v17  ;;  %6525 = vmatprep.subr.bf16.mxu0 %v6924_v18  ;;  %v6947_v63 = vld [vmem:[%s7984_s26 + $0x8] sm:$0xff]   ;;  %v6948_v0 = vld [vmem:[%s7982_s12] sm:$0xff]   ;;  %v6950_v2 = vld [vmem:[%s7986_s19 + $0x38] sm:$0xff]  }
  0xf6   : > { %796 = vadd.xlane.f32.xlu0 %v791_v12  ;;  %6545 = vmatprep.subr.bf16.mxu1 %v6925_v19  ;;  %v6949_v1 = vld [vmem:[%s7984_s26] sm:$0xff]   ;;  %v6951_v3 = vld [vmem:[%s7986_s19 + $0x30] sm:$0xff]   ;;  %v6956_v8 = vld [vmem:[%s7986_s19 + $0x8] sm:$0xff]  }
  0xf7   : > { %800 = vadd.xlane.f32.xlu1 %v793_v11  ;;  %v6955_v7 = vld [vmem:[%s7986_s19 + $0x10] sm:$0xff]   ;;  %v778_v10 = vld [vmem:[#allocation6 + $0x10] sm:$0xff] }
  0xf8   : > { %6526 = vmatpush3.bf16.msra.mxu0 %v6924_v18  ;;  %v782_v11 = vld [vmem:[#allocation8 + $0x10] sm:$0xff]  ;;  %v776_v14 = vld [vmem:[#allocation6] sm:$0xff] }
  0xf9   : > { %6546 = vmatpush3.bf16.msra.mxu1 %v6925_v19  ;;  %6527 = vmatprep.subr.bf16.mxu0 %v6926_v20  ;;  %v780_v15 = vld [vmem:[#allocation8] sm:$0xff] }
  0xfa   : > { %6547 = vmatprep.subr.bf16.mxu1 %v6927_v21 }
  0xfc   : > { %6528 = vmatpush3.bf16.msra.mxu0 %v6926_v20  ;;  %v779_v20 = vld [vmem:[#allocation6 + $0x18] sm:$0xff] }
  0xfd   : > { %6548 = vmatpush3.bf16.msra.mxu1 %v6927_v21  ;;  %6529 = vmatprep.subr.bf16.mxu0 %v6928_v22  ;;  %v783_v21 = vld [vmem:[#allocation8 + $0x18] sm:$0xff] }
  0xfe   : > { %6549 = vmatprep.subr.bf16.mxu1 %v6929_v23 }
 0x100   : > { %6530 = vmatpush3.bf16.msra.mxu0 %v6928_v22 }
 0x101   : > { %6550 = vmatpush3.bf16.msra.mxu1 %v6929_v23  ;;  %6531 = vmatprep.subr.bf16.mxu0 %v6930_v24 }
 0x102   : > { %6551 = vmatprep.subr.bf16.mxu1 %v6931_v25 }
 0x104   : > { %6532 = vmatpush3.bf16.msra.mxu0 %v6930_v24 }
 0x105   : > { %6552 = vmatpush3.bf16.msra.mxu1 %v6931_v25  ;;  %6533 = vmatprep.subr.bf16.mxu0 %v6932_v26 }
 0x106   : > { %6553 = vmatprep.subr.bf16.mxu1 %v6933_v27 }
 0x108   : > { %6534 = vmatpush3.bf16.msra.mxu0 %v6932_v26 }
 0x109   : > { %6554 = vmatpush3.bf16.msra.mxu1 %v6933_v27  ;;  %6559 = vmatprep.subr.bf16.mxu0 %v6934_v28  ;;  %v777_v27 = vld [vmem:[#allocation6 + $0x8] sm:$0xff] }
 0x10a   : > { %6579 = vmatprep.subr.bf16.mxu1 %v6935_v29 }
 0x17b   : > { %v795_v31 = vpop.xlane.xlu0 %794 }
 0x17c   : > { %v799_v30 = vpop.xlane.xlu1 %798  ;;  %v803_v33 = vmul.f32 0.0078125, %v795_v31 }
 0x17d   : > { %v805_v32 = vmul.f32 0.0078125, %v799_v30 }
 0x17e   : > { %v807_v35 = vadd.f32 1.1920929e-07, %v803_v33 }
 0x17f   : > { %v809_v34 = vadd.f32 1.1920929e-07, %v805_v32  ;;  %v797_v37 = vpop.xlane.xlu0 %796 }
 0x180   : > { %v801_v36 = vpop.xlane.xlu1 %800  ;;  %v804_v39 = vmul.f32 0.0078125, %v797_v37 }
 0x181   : > { %v806_v38 = vmul.f32 0.0078125, %v801_v36  ;;  %7046 = vrsqrt.f32 %v809_v34 }
 0x182   : > { %v808_v41 = vadd.f32 1.1920929e-07, %v804_v39  ;;  %7048 = vrsqrt.f32 %v807_v35 }
 0x183   : > { %v810_v40 = vadd.f32 1.1920929e-07, %v806_v38 }
 0x185   : > { %7050 = vrsqrt.f32 %v810_v40 }
 0x186   : > { %7052 = vrsqrt.f32 %v808_v41 }
 0x18e   : > { %v7047_v42 = vpop.eup %7046 }
 0x18f   : > { %v7049_v43 = vpop.eup %7048  ;;  %v817_v46 = vmul.f32 %v7047_v42, %v7995_v4  ;;  %v6952_v4 = vld [vmem:[%s7986_s19 + $0x28] sm:$0xff]  }
 0x190   : > { %v815_v48 = vmul.f32 %v7049_v43, %v7997_v5  ;;  %v6953_v5 = vld [vmem:[%s7986_s19 + $0x20] sm:$0xff]  }
 0x192   : > { %v7051_v44 = vpop.eup %7050 }
 0x193   : > { %v7053_v45 = vpop.eup %7052  ;;  %v818_v47 = vmul.f32 %v7051_v44, %v7999_v6  ;;  %v6954_v6 = vld [vmem:[%s7986_s19 + $0x18] sm:$0xff]  }
 0x194   : > { %v816_v49 = vmul.f32 %v7053_v45, %v8005_v9  ;;  %v6957_v9 = vld [vmem:[%s7986_s19] sm:$0xff]  }
 0x195   : > { %v8033_v50 = vpack.c.bf16 %v818_v47, %v817_v46 }
 0x196   : > { %v819_v51 = vpack.c.bf16 %v816_v49, %v815_v48 }
 0x198   : > { %6535 = vmatprep.mubr.bf16.mxu0 %v819_v51  ;;  %6555 = vmatprep.mubr.bf16.mxu1 %v819_v51 }
 0x199   : > { %6536 = vmatmul.mubr.bf16.vlgmr.msra.gmra.mxu0 %v8033_v50  ;;  %6556 = vmatmul.mubr.bf16.vlgmr.msra.gmra.mxu1 %v8033_v50 }
 0x19a   : > { %6560 = vmatpush3.bf16.msra.mxu0 %v6934_v28  ;;  %6580 = vmatpush3.bf16.msra.mxu1 %v6935_v29  ;;  %v781_v28 = vld [vmem:[#allocation8 + $0x8] sm:$0xff] }
 0x19b   : > { %6575 = vmatprep.mubr.bf16.mxu0 %v819_v51  ;;  %6595 = vmatprep.mubr.bf16.mxu1 %v819_v51 }
 0x19c   : > { %6561 = vmatprep.subr.bf16.mxu0 %v6936_v52  ;;  %6581 = vmatprep.subr.bf16.mxu1 %v6937_v53 }
 0x19e   : > { %6562 = vmatpush3.bf16.msra.mxu0 %v6936_v52  ;;  %6582 = vmatpush3.bf16.msra.mxu1 %v6937_v53 }
 0x19f   : > { %6563 = vmatprep.subr.bf16.mxu0 %v6938_v54  ;;  %6583 = vmatprep.subr.bf16.mxu1 %v6939_v55 }
 0x1a2   : > { %6564 = vmatpush3.bf16.msra.mxu0 %v6938_v54  ;;  %6584 = vmatpush3.bf16.msra.mxu1 %v6939_v55 }
 0x1a3   : > { %6565 = vmatprep.subr.bf16.mxu0 %v6940_v56  ;;  %6585 = vmatprep.subr.bf16.mxu1 %v6941_v57 }
 0x1a6   : > { %6566 = vmatpush3.bf16.msra.mxu0 %v6940_v56  ;;  %6586 = vmatpush3.bf16.msra.mxu1 %v6941_v57 }
 0x1a7   : > { %6567 = vmatprep.subr.bf16.mxu0 %v6942_v58  ;;  %6587 = vmatprep.subr.bf16.mxu1 %v6943_v59 }
 0x1aa   : > { %6568 = vmatpush3.bf16.msra.mxu0 %v6942_v58  ;;  %6588 = vmatpush3.bf16.msra.mxu1 %v6943_v59 }
 0x1ab   : > { %6569 = vmatprep.subr.bf16.mxu0 %v6944_v60  ;;  %6589 = vmatprep.subr.bf16.mxu1 %v6945_v61 }
 0x1ae   : > { %6570 = vmatpush3.bf16.msra.mxu0 %v6944_v60  ;;  %6590 = vmatpush3.bf16.msra.mxu1 %v6945_v61 }
 0x1af   : > { %6571 = vmatprep.subr.bf16.mxu0 %v6946_v62  ;;  %6591 = vmatprep.subr.bf16.mxu1 %v6947_v63 }
 0x1b2   : > { %6572 = vmatpush3.bf16.msra.mxu0 %v6946_v62  ;;  %6592 = vmatpush3.bf16.msra.mxu1 %v6947_v63  ;;  %v7643_v62 = vmov 1983009808  }
 0x1b3   : > { %6573 = vmatprep.subr.bf16.mxu0 %v6948_v0  ;;  %6593 = vmatprep.subr.bf16.mxu1 %v6949_v1  ;;  %v1433_v63 = vunpack.c.l.s4 %v7643_v62 }
 0x1b6   : > { %6574 = vmatpush3.bf16.msra.mxu0 %v6948_v0  ;;  %6594 = vmatpush3.bf16.msra.mxu1 %v6949_v1  ;;  %v1435_v0 = vlaneseq }
 0x1b7   : > { %6599 = vmatprep.subr.bf16.mxu0 %v6950_v2 }
 0x1b9   : > { %6576 = vmatmul.mubr.bf16.vlgmr.msra.gmra.mxu0 %v8033_v50  ;;  %6596 = vmatmul.mubr.bf16.vlgmr.msra.gmra.mxu1 %v8033_v50 }
 0x1ba   : > { %6600 = vmatpush3.bf16.msra.mxu0 %v6950_v2  ;;  %6615 = vmatprep.mubr.bf16.mxu0 %v819_v51 }
 0x1bb   : > { %6601 = vmatprep.subr.bf16.mxu0 %v6951_v3 }
 0x1be   : > { %6602 = vmatpush3.bf16.msra.mxu0 %v6951_v3  ;;  %v7644_v3 = vmov 1934713408  }
 0x1bf   : > { %6603 = vmatprep.subr.bf16.mxu0 %v6952_v4 }
 0x1c2   : > { %6604 = vmatpush3.bf16.msra.mxu0 %v6952_v4  ;;  %v1465_v4 = vunpack.c.l.s4 %v7644_v3 }
 0x1c3   : > { %6605 = vmatprep.subr.bf16.mxu0 %v6953_v5 }
 0x1c6   : > { %6606 = vmatpush3.bf16.msra.mxu0 %v6953_v5  ;;  %v1434_v5 = vunpack.c.0.s8 %v1433_v63 }
 0x1c7   : > { %6607 = vmatprep.subr.bf16.mxu0 %v6954_v6 }
 0x1ca   : > { %6608 = vmatpush3.bf16.msra.mxu0 %v6954_v6  ;;  %v1436_v6 = vshrl.u32 %v1435_v0, 7 }
 0x1cb   : > { %6609 = vmatprep.subr.bf16.mxu0 %v6955_v7 }
 0x1ce   : > { %6610 = vmatpush3.bf16.msra.mxu0 %v6955_v7 }
 0x1cf   : > { %6611 = vmatprep.subr.bf16.mxu0 %v6956_v8 }
 0x1d2   : > { %6612 = vmatpush3.bf16.msra.mxu0 %v6956_v8 }
 0x1d3   : > { %6613 = vmatprep.subr.bf16.mxu0 %v6957_v9 }
 0x1d6   : > { %6614 = vmatpush3.bf16.msra.mxu0 %v6957_v9  ;;  %v1466_v9 = vunpack.c.0.s8 %v1465_v4 }
 0x1d9   : > { %6616 = vmatmul.mubr.bf16.vlgmr.msra.gmra.mxu0 %v8033_v50 }
 0x259   : > { %v6537_v12 = vpop.f32.mrf.mxu0  ;;  %v6557_v13 = vpop.f32.mrf.mxu1 }
 0x25a   : > { %v1388_v16 = vmul.f32 %v6537_v12, %v778_v10  ;;  %v1392_v17 = vmul.f32 %v6557_v13, %v782_v11 }
 0x25b   : > { %v919_v18 = vpop.f32.mrf.mxu0  ;;  %v1032_v19 = vpop.f32.mrf.mxu1 }
 0x25c   : > { %v8062_v22 = vadd.f32 %v1392_v17, %v1388_v16  ;;  %v1386_v23 = vmul.f32 %v919_v18, %v776_v14  ;;  %v1390_v24 = vmul.f32 %v1032_v19, %v780_v15  ;;  %v8109_v17 = vsub.s32 %v1466_v9, %v1436_v6 }
 0x25d   : > { %v6538_v25 = vpop.f32.mrf.mxu0  ;;  %v6558_v26 = vpop.f32.mrf.mxu1 }
 0x25e   : > { %v8064_v29 = vadd.f32 %v1390_v24, %v1386_v23  ;;  %v1389_v30 = vmul.f32 %v6538_v25, %v779_v20  ;;  %v1393_v31 = vmul.f32 %v6558_v26, %v783_v21 }
 0x25f   : > { %v922_v32 = vpop.f32.mrf.mxu0  ;;  %v1035_v33 = vpop.f32.mrf.mxu1 }
 0x260   : > { %v8066_v34 = vadd.f32 %v1393_v31, %v1389_v30  ;;  %v1387_v35 = vmul.f32 %v922_v32, %v777_v27  ;;  %v1391_v36 = vmul.f32 %v1035_v33, %v781_v28  ;;  %1412 = vrot.lane.b32.xlu0 %v8064_v29, %s7640_s21 }
 0x262   : > { %v8070_v37 = vadd.f32 %v1391_v36, %v1387_v35 }
 0x264   : > { %1414 = vrot.lane.b32.xlu1 %v8070_v37, %s7640_s21 }
 0x279   : > { %v8074_v38 = vpop.f32.mrf.mxu0  ;;  %v6597_v39 = vpop.f32.mrf.mxu1 }
 0x27a   : > { %v1400_v40 = vmul.f32 %v6597_v39, %v778_v10  ;;  %v8107_v10 = vsub.s32 %v1434_v5, %v1436_v6 }
 0x27b   : > { %v1145_v41 = vpop.f32.mrf.mxu0  ;;  %v1258_v42 = vpop.f32.mrf.mxu1 }
 0x27c   : > { %1710 = vrot.lane.b32.xlu1 %v1145_v41, %s7641_s20  ;;  %1704 = vrot.lane.b32.xlu0 %v1145_v41, %s7640_s21  ;;  %v1398_v50 = vmul.f32 %v1258_v42, %v776_v14 }
 0x27d   : > { %v8078_v43 = vpop.f32.mrf.mxu0  ;;  %v6598_v44 = vpop.f32.mrf.mxu1 }
 0x27e   : > { %v1401_v45 = vmul.f32 %v6598_v44, %v779_v20 }
 0x27f   : > { %v8080_v46 = vpop.f32.mrf.mxu0  ;;  %v1261_v53 = vpop.f32.mrf.mxu1 }
 0x280   : > { %1706 = vrot.lane.b32.xlu1 %v8080_v46, %s7640_s21  ;;  %1716 = vrot.lane.b32.xlu0 %v1145_v41, %s7642_s28  ;;  %v1399_v58 = vmul.f32 %v1261_v53, %v777_v27 }
 0x284   : > { %1712 = vrot.lane.b32.xlu1 %v8080_v46, %s7641_s20  ;;  %1418 = vrot.lane.b32.xlu0 %v8064_v29, %s7641_s20 }
 0x288   : > { %1718 = vrot.lane.b32.xlu1 %v8080_v46, %s7642_s28  ;;  %1424 = vrot.lane.b32.xlu0 %v8064_v29, %s7642_s28 }
 0x28c   : > { %1420 = vrot.lane.b32.xlu1 %v8070_v37, %s7641_s20 }
 0x290   : > { %1426 = vrot.lane.b32.xlu1 %v8070_v37, %s7642_s28 }
 0x299   : > { %v6617_v47 = vpop.f32.mrf.mxu0 }
 0x29a   : > { %v1404_v48 = vmul.f32 %v6617_v47, %v782_v11 }
 0x29b   : > { %v1371_v49 = vpop.f32.mrf.mxu0 }
 0x29c   : > { %v8097_v51 = vadd.f32 %v1404_v48, %v1400_v40  ;;  %v1402_v52 = vmul.f32 %v1371_v49, %v780_v15 }
 0x29d   : > { %v6618_v54 = vpop.f32.mrf.mxu0 }
 0x29e   : > { %v8099_v55 = vadd.f32 %v1402_v52, %v1398_v50  ;;  %v1405_v56 = vmul.f32 %v6618_v54, %v783_v21 }
 0x29f   : > { %v1374_v57 = vpop.f32.mrf.mxu0 }
 0x2a0   : > { %v8101_v59 = vadd.f32 %v1405_v56, %v1401_v45  ;;  %v1403_v60 = vmul.f32 %v1374_v57, %v781_v28 }
 0x2a2   : > { %v8103_v61 = vadd.f32 %v1403_v60, %v1399_v58 }
 0x2d2   : > { %v1413_v1 = vpop.permute.xlu0 %1412 }
 0x2d6   : > { %v8105_v2 = vpop.permute.xlu1 %1414 }
 0x2ee   : > { %v1711_v7 = vpop.permute.xlu1 %1710  ;;  %v1705_v8 = vpop.permute.xlu0 %1704 }
 0x2ef   : > { %v1722_v11 = vcombine.low %v1145_v41, %v1711_v7  ;;  %v1723_v12 = vcombine.high %v1145_v41, %v1711_v7 }
 0x2f1   : > { %v1730_v18 = vrot.slane %v1722_v11, %v8107_v10  ;;  %v1737_v19 = vrot.slane %v1723_v12, %v8107_v10 }
 0x2f2   : > { %v1707_v13 = vpop.permute.xlu1 %1706  ;;  %v1717_v14 = vpop.permute.xlu0 %1716 }
 0x2f3   : > { %v1738_v15 = vcombine.low %v1705_v8, %v1717_v14  ;;  %v1739_v16 = vcombine.high %v1705_v8, %v1717_v14 }
 0x2f5   : > { %v1746_v20 = vrot.slane %v1738_v15, %v8107_v10  ;;  %v1753_v21 = vrot.slane %v1739_v16, %v8107_v10 }
 0x2f6   : > { %v1713_v23 = vpop.permute.xlu1 %1712  ;;  %v1419_v24 = vpop.permute.xlu0 %1418 }
 0x2f7   : > { %v1754_v25 = vcombine.low %v1730_v18, %v1746_v20  ;;  %v1755_v26 = vcombine.high %v1730_v18, %v1746_v20  ;;  %v1770_v27 = vcombine.low %v1737_v19, %v1753_v21  ;;  %v1771_v28 = vcombine.high %v1737_v19, %v1753_v21 }
 0x2f8   : > { %v1790_v30 = vcombine.low %v8080_v46, %v1713_v23  ;;  %v1791_v31 = vcombine.high %v8080_v46, %v1713_v23  ;;  %v1430_v32 = vcombine.low %v8064_v29, %v1419_v24  ;;  %v1431_v33 = vcombine.high %v8064_v29, %v1419_v24 }
 0x2f9   : > { %v1762_v35 = vrot.slane %v1754_v25, %v8109_v17  ;;  %v1769_v36 = vrot.slane %v1755_v26, %v8109_v17  ;;  %v1778_v39 = vrot.slane %v1770_v27, %v8109_v17  ;;  %v1785_v40 = vrot.slane %v1771_v28, %v8109_v17 }
 0x2fa   : > { %v1798_v41 = vrot.slane %v1790_v30, %v8107_v10  ;;  %v1805_v42 = vrot.slane %v1791_v31, %v8107_v10  ;;  %v1438_v44 = vrot.slane %v1430_v32, %v8107_v10  ;;  %v1445_v45 = vrot.slane %v1431_v33, %v8107_v10  ;;  %v1719_v46 = vpop.permute.xlu1 %1718  ;;  %v1425_v47 = vpop.permute.xlu0 %1424 }
 0x2fb   : > { %v1858_v48 = vcombine.low %v1762_v35, %v1769_v36  ;;  %v6223_v29 = vcombine.high %v1762_v35, %v1769_v36  ;;  %v1874_v49 = vcombine.low %v1778_v39, %v1785_v40  ;;  %v6224_v50 = vcombine.high %v1778_v39, %v1785_v40 }
 0x2fc   : > { %v1806_v52 = vcombine.low %v1707_v13, %v1719_v46  ;;  %v1807_v53 = vcombine.high %v1707_v13, %v1719_v46  ;;  %v1446_v54 = vcombine.low %v1413_v1, %v1425_v47  ;;  %v1447_v56 = vcombine.high %v1413_v1, %v1425_v47 }
 0x2fd   : > { %v8128_v57 = vrot.slane %v1858_v48, %v8107_v10  ;;  %v8131_v58 = vrot.slane %v6223_v29, %v8107_v10  ;;  %v8134_v60 = vrot.slane %v1874_v49, %v8107_v10  ;;  %v8137_v62 = vrot.slane %v6224_v50, %v8107_v10 }
 0x2fe   : > { %v1814_v63 = vrot.slane %v1806_v52, %v8107_v10  ;;  %v1821_v0 = vrot.slane %v1807_v53, %v8107_v10  ;;  %v1454_v3 = vrot.slane %v1446_v54, %v8107_v10  ;;  %v1461_v1 = vrot.slane %v1447_v56, %v8107_v10  ;;  %v1421_v4 = vpop.permute.xlu1 %1420 }
 0x2ff   : > { %v1498_v5 = vcombine.low %v8070_v37, %v1421_v4  ;;  %v1499_v6 = vcombine.high %v8070_v37, %v1421_v4  ;;  %v1890_v7 = vcombine.low %v8128_v57, %v8131_v58  ;;  %v1906_v8 = vcombine.low %v8134_v60, %v8137_v62 }
 0x300   : > { %v1822_v9 = vcombine.low %v1798_v41, %v1814_v63  ;;  %v1823_v11 = vcombine.high %v1798_v41, %v1814_v63  ;;  %v1838_v12 = vcombine.low %v1805_v42, %v1821_v0  ;;  %v1839_v13 = vcombine.high %v1805_v42, %v1821_v0 }
 0x301   : > { %v1462_v14 = vcombine.low %v1438_v44, %v1454_v3  ;;  %v1463_v15 = vcombine.high %v1438_v44, %v1454_v3  ;;  %v1478_v16 = vcombine.low %v1445_v45, %v1461_v1  ;;  %v1479_v18 = vcombine.high %v1445_v45, %v1461_v1 }
 0x302   : > { %v1830_v19 = vrot.slane %v1822_v9, %v8109_v17  ;;  %v1837_v20 = vrot.slane %v1823_v11, %v8109_v17  ;;  %v1846_v37 = vrot.slane %v1838_v12, %v8109_v17  ;;  %v1853_v21 = vrot.slane %v1839_v13, %v8109_v17  ;;  %v1427_v27 = vpop.permute.xlu1 %1426 }
 0x303   : > { %v1470_v23 = vrot.slane %v1462_v14, %v8109_v17  ;;  %v1477_v24 = vrot.slane %v1463_v15, %v8109_v17  ;;  %v1486_v25 = vrot.slane %v1478_v16, %v8109_v17  ;;  %v1493_v26 = vrot.slane %v1479_v18, %v8109_v17 }
 0x304   : > { %v1926_v28 = vcombine.low %v1830_v19, %v1837_v20  ;;  %v6225_v30 = vcombine.high %v1830_v19, %v1837_v20  ;;  %v1942_v31 = vcombine.low %v1846_v37, %v1853_v21  ;;  %v6226_v32 = vcombine.high %v1846_v37, %v1853_v21 }
 0x305   : > { %v1566_v33 = vcombine.low %v1470_v23, %v1477_v24  ;;  %v6219_v35 = vcombine.high %v1470_v23, %v1477_v24  ;;  %v1582_v36 = vcombine.low %v1486_v25, %v1493_v26  ;;  %v6220_v39 = vcombine.high %v1486_v25, %v1493_v26 }
 0x306   : > { %v1506_v40 = vrot.slane %v1498_v5, %v8107_v10  ;;  %v1513_v41 = vrot.slane %v1499_v6, %v8107_v10  ;;  %v1514_v42 = vcombine.low %v8105_v2, %v1427_v27  ;;  %v1515_v44 = vcombine.high %v8105_v2, %v1427_v27 }
 0x307   : > { %v1898_v45 = vrot.slane %v1890_v7, %v8109_v17  ;;  %v1914_v46 = vrot.slane %v1906_v8, %v8109_v17  ;;  %v1933_v47 = vrot.slane %v1926_v28, %v8107_v10  ;;  %v1941_v48 = vrot.slane %v6225_v30, %v8107_v10 }
 0x308   : > { %v1522_v29 = vrot.slane %v1514_v42, %v8107_v10  ;;  %v1529_v49 = vrot.slane %v1515_v44, %v8107_v10  ;;  %v1949_v50 = vrot.slane %v1942_v31, %v8107_v10  ;;  %v1957_v52 = vrot.slane %v6226_v32, %v8107_v10 }
 0x309   : > { %v8169_v53 = vcombine.low %v1898_v45, %v1914_v46  ;;  %v1958_v54 = vcombine.low %v1933_v47, %v1941_v48  ;;  %v8172_v2 = vrot.slane %v1566_v33, %v8107_v10  ;;  %v8175_v56 = vrot.slane %v6219_v35, %v8107_v10 }
 0x30a   : > { %v1530_v63 = vcombine.low %v1506_v40, %v1522_v29  ;;  %v1531_v0 = vcombine.high %v1506_v40, %v1522_v29  ;;  %v1546_v3 = vcombine.low %v1513_v41, %v1529_v49  ;;  %v1547_v1 = vcombine.high %v1513_v41, %v1529_v49 }
 0x30b   : > { %v2360_v4 = vmul.f32 %v8169_v53, %v8169_v53  ;;  %v1966_v5 = vrot.slane %v1958_v54, %v8109_v17  ;;  %v1974_v6 = vcombine.low %v1949_v50, %v1957_v52  ;;  %v8181_v7 = vrot.slane %v1582_v36, %v8107_v10 }
 0x30c   : > { %v1538_v8 = vrot.slane %v1530_v63, %v8109_v17  ;;  %v1545_v9 = vrot.slane %v1531_v0, %v8109_v17  ;;  %v1554_v11 = vrot.slane %v1546_v3, %v8109_v17  ;;  %v1561_v12 = vrot.slane %v1547_v1, %v8109_v17 }
 0x30d   : > { %v2368_v13 = vsel %vm2294_vm0, %v2360_v4, 0.0  ;;  %v1982_v14 = vrot.slane %v1974_v6, %v8109_v17  ;;  %v8190_v15 = vrot.slane %v6220_v39, %v8107_v10  ;;  %v1598_v16 = vcombine.low %v8172_v2, %v8175_v56 }
 0x30e   : > { %v1634_v18 = vcombine.low %v1538_v8, %v1545_v9  ;;  %v6221_v19 = vcombine.high %v1538_v8, %v1545_v9  ;;  %v1650_v20 = vcombine.low %v1554_v11, %v1561_v12  ;;  %v6222_v37 = vcombine.high %v1554_v11, %v1561_v12  ;;  %2369 = vadd.xlane.f32.xlu0 %v2368_v13 }
 0x30f   : > { %v8194_v21 = vcombine.low %v1966_v5, %v1982_v14  ;;  %v1606_v23 = vrot.slane %v1598_v16, %v8109_v17  ;;  %v1614_v24 = vcombine.low %v8181_v7, %v8190_v15  ;;  %v8199_v25 = vcombine.high %v1966_v5, %v1982_v14 }
 0x310   : > { %v1641_v26 = vrot.slane %v1634_v18, %v8107_v10  ;;  %v1649_v27 = vrot.slane %v6221_v19, %v8107_v10  ;;  %v1657_v28 = vrot.slane %v1650_v20, %v8107_v10  ;;  %v1665_v30 = vrot.slane %v6222_v37, %v8107_v10 }
 0x311   : > { %v2361_v31 = vmul.f32 %v8194_v21, %v8194_v21  ;;  %v1622_v32 = vrot.slane %v1614_v24, %v8109_v17  ;;  %v1959_v33 = vcombine.high %v1933_v47, %v1941_v48  ;;  %v1975_v39 = vcombine.high %v1949_v50, %v1957_v52 }
 0x312   : > { %v1666_v35 = vcombine.low %v1641_v26, %v1649_v27  ;;  %v1682_v36 = vcombine.low %v1657_v28, %v1665_v30  ;;  %v2363_v42 = vmul.f32 %v8199_v25, %v8199_v25  ;;  %v8219_v48 = vcombine.high %v1898_v45, %v1914_v46 }
 0x313   : > { %v2371_v40 = vsel %vm2294_vm0, %v2361_v31, 0.0  ;;  %v8209_v41 = vcombine.low %v1606_v23, %v1622_v32  ;;  %v1973_v44 = vrot.slane %v1959_v33, %v8109_v17  ;;  %v1989_v54 = vrot.slane %v1975_v39, %v8109_v17 }
 0x314   : > { %2372 = vadd.xlane.f32.xlu1 %v2371_v40  ;;  %v1674_v29 = vrot.slane %v1666_v35, %v8109_v17  ;;  %v1690_v49 = vrot.slane %v1682_v36, %v8109_v17  ;;  %v1667_v50 = vcombine.high %v1641_v26, %v1649_v27  ;;  %v1683_v52 = vcombine.high %v1657_v28, %v1665_v30 }
 0x315   : > { %v2286_v47 = vmul.f32 %v8209_v41, %v8209_v41  ;;  %v8225_v3 = vcombine.low %v1973_v44, %v1989_v54  ;;  %v2377_v4 = vsel %vm2294_vm0, %v2363_v42, 0.0  ;;  %v2362_v8 = vmul.f32 %v8219_v48, %v8219_v48 }
 0x316   : > { %v8221_v63 = vcombine.high %v1674_v29, %v1690_v49  ;;  %v8223_v0 = vcombine.low %v1674_v29, %v1690_v49  ;;  %v1681_v5 = vrot.slane %v1667_v50, %v8109_v17  ;;  %v1697_v6 = vrot.slane %v1683_v52, %v8109_v17 }
 0x317   : > { %v2295_v1 = vsel %vm2294_vm0, %v2286_v47, 0.0  ;;  %v8237_v9 = vcombine.high %v1606_v23, %v1622_v32  ;;  %v1891_v11 = vcombine.high %v8128_v57, %v8131_v58  ;;  %v2365_v14 = vmul.f32 %v8225_v3, %v8225_v3 }
 0x318   : > { %2296 = vadd.xlane.f32.xlu0 %v2295_v1  ;;  %2378 = vadd.xlane.f32.xlu1 %v2377_v4  ;;  %v2289_v45 = vmul.f32 %v8221_v63, %v8221_v63  ;;  %v2287_v46 = vmul.f32 %v8223_v0, %v8223_v0  ;;  %v1907_v16 = vcombine.high %v8134_v60, %v8137_v62  ;;  %v2374_v23 = vsel %vm2294_vm0, %v2362_v8, 0.0 }
 0x319   : > { %v8247_v18 = vcombine.low %v1681_v5, %v1697_v6  ;;  %v1905_v19 = vrot.slane %v1891_v11, %v8109_v17  ;;  %v1599_v57 = vcombine.high %v8172_v2, %v8175_v56  ;;  %v1615_v58 = vcombine.high %v8181_v7, %v8190_v15 }
 0x31a   : > { %v2304_v12 = vsel %vm2294_vm0, %v2289_v45, 0.0  ;;  %v2298_v13 = vsel %vm2294_vm0, %v2287_v46, 0.0  ;;  %v1921_v20 = vrot.slane %v1907_v16, %v8109_v17  ;;  %v2383_v37 = vsel %vm2294_vm0, %v2365_v14, 0.0 }
 0x31b   : > { %v2288_v60 = vmul.f32 %v8237_v9, %v8237_v9  ;;  %v8259_v62 = vcombine.high %v1973_v44, %v1989_v54  ;;  %v2291_v24 = vmul.f32 %v8247_v18, %v8247_v18  ;;  %v1613_v27 = vrot.slane %v1599_v57, %v8109_v17 }
 0x31c   : > { %2305 = vadd.xlane.f32.xlu1 %v2304_v12  ;;  %2299 = vadd.xlane.f32.xlu0 %v2298_v13  ;;  %v8263_v26 = vcombine.low %v1905_v19, %v1921_v20  ;;  %v1629_v2 = vrot.slane %v1615_v58, %v8109_v17  ;;  %v8273_v30 = vcombine.high %v1681_v5, %v1697_v6  ;;  %v7645_v50 = vmov 0.0  }
 0x31d   : > { %v2301_v56 = vsel %vm2294_vm0, %v2288_v60, 0.0  ;;  %v2367_v7 = vmul.f32 %v8259_v62, %v8259_v62  ;;  %v2310_v15 = vsel %vm2294_vm0, %v2291_v24, 0.0  ;;  %v8283_v39 = vcombine.high %v1905_v19, %v1921_v20  ;;  %6619 = vmatprep.subr.bf16.mxu1 %v7645_v50  ;;  %6667 = vmatprep.subr.bf16.mxu0 %v7645_v50 }
 0x31e   : > { %v2364_v28 = vmul.f32 %v8263_v26, %v8263_v26  ;;  %v8275_v31 = vcombine.low %v1613_v27, %v1629_v2  ;;  %v2293_v35 = vmul.f32 %v8273_v30, %v8273_v30  ;;  %v8289_v29 = vcombine.high %v1613_v27, %v1629_v2  ;;  %6621 = vmatprep.mubr.msk.bf16.mxu1 %vm7646_vm1, %v7645_v50 }
 0x31f   : > { %v2389_v32 = vsel %vm2294_vm0, %v2367_v7, 0.0  ;;  %v2366_v44 = vmul.f32 %v8283_v39, %v8283_v39  ;;  %6669 = vmatprep.mubr.msk.bf16.mxu0 %vm7646_vm1, %v7645_v50 }
 0x320   : > { %2384 = vadd.xlane.f32.xlu1 %v2383_v37  ;;  %2375 = vadd.xlane.f32.xlu0 %v2374_v23  ;;  %v2380_v33 = vsel %vm2294_vm0, %v2364_v28, 0.0  ;;  %v2290_v36 = vmul.f32 %v8275_v31, %v8275_v31  ;;  %v2316_v40 = vsel %vm2294_vm0, %v2293_v35, 0.0  ;;  %v2292_v54 = vmul.f32 %v8289_v29, %v8289_v29 }
 0x321   : > { %v2386_v49 = vsel %vm2294_vm0, %v2366_v44, 0.0 }
 0x322   : > { %v2307_v42 = vsel %vm2294_vm0, %v2290_v36, 0.0  ;;  %v2313_v47 = vsel %vm2294_vm0, %v2292_v54, 0.0 }
 0x324   : > { %2311 = vadd.xlane.f32.xlu1 %v2310_v15  ;;  %2302 = vadd.xlane.f32.xlu0 %v2301_v56 }
 0x328   : > { %2390 = vadd.xlane.f32.xlu1 %v2389_v32  ;;  %2381 = vadd.xlane.f32.xlu0 %v2380_v33 }
 0x32c   : > { %2317 = vadd.xlane.f32.xlu1 %v2316_v40  ;;  %2308 = vadd.xlane.f32.xlu0 %v2307_v42 }
 0x330   : > { %2387 = vadd.xlane.f32.xlu0 %v2386_v49 }
 0x334   : > { %2314 = vadd.xlane.f32.xlu0 %v2313_v47 }
 0x33d   : > { %3493 = vrot.lane.b32.xlu1 %v8078_v43, %s7640_s21 }
 0x341   : > { %3497 = vrot.lane.b32.xlu1 %v8074_v38, %s7641_s20 }
 0x345   : > { %3499 = vrot.lane.b32.xlu1 %v8078_v43, %s7641_s20 }
 0x349   : > { %3505 = vrot.lane.b32.xlu1 %v8078_v43, %s7642_s28 }
 0x34a   : > { %3491 = vrot.lane.b32.xlu0 %v8074_v38, %s7640_s21 }
 0x34d   : > { %3201 = vrot.lane.b32.xlu1 %v8066_v34, %s7640_s21 }
 0x34e   : > { %3503 = vrot.lane.b32.xlu0 %v8074_v38, %s7642_s28 }
 0x351   : > { %3207 = vrot.lane.b32.xlu1 %v8066_v34, %s7641_s20 }
 0x352   : > { %3199 = vrot.lane.b32.xlu0 %v8062_v22, %s7640_s21 }
 0x355   : > { %3213 = vrot.lane.b32.xlu1 %v8066_v34, %s7642_s28 }
 0x356   : > { %3205 = vrot.lane.b32.xlu0 %v8062_v22, %s7641_s20 }
 0x359   : > { %1998 = vrot.lane.b32.xlu1 %v8103_v61, %s7640_s21 }
 0x35a   : > { %3211 = vrot.lane.b32.xlu0 %v8062_v22, %s7642_s28 }
 0x35d   : > { %2002 = vrot.lane.b32.xlu1 %v8099_v55, %s7641_s20 }
 0x35e   : > { %1996 = vrot.lane.b32.xlu0 %v8099_v55, %s7640_s21 }
 0x361   : > { %2004 = vrot.lane.b32.xlu1 %v8103_v61, %s7641_s20 }
 0x362   : > { %2008 = vrot.lane.b32.xlu0 %v8099_v55, %s7642_s28 }
 0x365   : > { %2010 = vrot.lane.b32.xlu1 %v8103_v61, %s7642_s28 }
 0x397   : > { %v2370_v52 = vpop.xlane.xlu0 %2369 }
 0x398   : > { %v2392_v1 = vmul.f32 0.03125, %v2370_v52 }
 0x39a   : > { %v2400_v4 = vadd.f32 1.1920929e-07, %v2392_v1 }
 0x39c   : > { %7054 = vrsqrt.f32 %v2400_v4 }
 0x39d   : > { %v2373_v5 = vpop.xlane.xlu1 %2372 }
 0x39e   : > { %v2393_v6 = vmul.f32 0.03125, %v2373_v5 }
 0x3a0   : > { %v2401_v45 = vadd.f32 1.1920929e-07, %v2393_v6 }
 0x3a1   : > { %v2297_v46 = vpop.xlane.xlu0 %2296  ;;  %v2379_v8 = vpop.xlane.xlu1 %2378 }
 0x3a2   : > { %7056 = vrsqrt.f32 %v2401_v45  ;;  %v2320_v11 = vmul.f32 0.03125, %v2297_v46  ;;  %v2395_v13 = vmul.f32 0.03125, %v2379_v8 }
 0x3a4   : > { %v2328_v12 = vadd.f32 1.1920929e-07, %v2320_v11  ;;  %v2403_v58 = vadd.f32 1.1920929e-07, %v2395_v13 }
 0x3a5   : > { %v2306_v14 = vpop.xlane.xlu1 %2305  ;;  %v2300_v16 = vpop.xlane.xlu0 %2299 }
 0x3a6   : > { %v2323_v19 = vmul.f32 0.03125, %v2306_v14  ;;  %v2321_v20 = vmul.f32 0.03125, %v2300_v16  ;;  %7058 = vrsqrt.f32 %v2328_v12 }
 0x3a8   : > { %v2329_v57 = vadd.f32 1.1920929e-07, %v2321_v20  ;;  %v2331_v60 = vadd.f32 1.1920929e-07, %v2323_v19 }
 0x3a9   : > { %v2385_v37 = vpop.xlane.xlu1 %2384  ;;  %v2376_v23 = vpop.xlane.xlu0 %2375 }
 0x3aa   : > { %v2394_v24 = vmul.f32 0.03125, %v2376_v23  ;;  %7060 = vrsqrt.f32 %v2329_v57  ;;  %v2397_v27 = vmul.f32 0.03125, %v2385_v37  ;;  %v7055_v56 = vpop.eup %7054 }
 0x3ab   : > { %7062 = vrsqrt.f32 %v2403_v58  ;;  %v2416_v40 = vmul.f32 %v7055_v56, %v8169_v53 }
 0x3ac   : > { %v2402_v2 = vadd.f32 1.1920929e-07, %v2394_v24  ;;  %7064 = vrsqrt.f32 %v2331_v60  ;;  %v2405_v35 = vadd.f32 1.1920929e-07, %v2397_v27 }
 0x3ad   : > { %v2312_v7 = vpop.xlane.xlu1 %2311  ;;  %v2303_v15 = vpop.xlane.xlu0 %2302 }
 0x3ae   : > { %v2325_v28 = vmul.f32 0.03125, %v2312_v7  ;;  %v2322_v32 = vmul.f32 0.03125, %v2303_v15  ;;  %7066 = vrsqrt.f32 %v2402_v2 }
 0x3af   : > { %v7057_v33 = vpop.eup %7056 }
 0x3b0   : > { %v2330_v36 = vadd.f32 1.1920929e-07, %v2322_v32  ;;  %v2417_v42 = vmul.f32 %v7057_v33, %v8194_v21  ;;  %v2333_v44 = vadd.f32 1.1920929e-07, %v2325_v28 }
 0x3b1   : > { %v2391_v49 = vpop.xlane.xlu1 %2390  ;;  %v2382_v54 = vpop.xlane.xlu0 %2381 }
 0x3b2   : > { %v2396_v47 = vmul.f32 0.03125, %v2382_v54  ;;  %v2428_v52 = vpack.c.bf16 %v2417_v42, %v2416_v40  ;;  %7068 = vrsqrt.f32 %v2330_v36  ;;  %v2399_v46 = vmul.f32 0.03125, %v2391_v49 }
 0x3b3   : > { %v7059_v1 = vpop.eup %7058  ;;  %7070 = vrsqrt.f32 %v2405_v35 }
 0x3b4   : > { %v2404_v4 = vadd.f32 1.1920929e-07, %v2396_v47  ;;  %v2436_v5 = vsel %vm2294_vm0, %v2428_v52, 0  ;;  %7072 = vrsqrt.f32 %v2333_v44  ;;  %v2344_v21 = vmul.f32 %v7059_v1, %v8209_v41 }
 0x3b5   : > { %v2318_v6 = vpop.xlane.xlu1 %2317  ;;  %6620 = vmatpush3.bf16.xpose.msra.mxu1 %v2436_v5  ;;  %v2309_v45 = vpop.xlane.xlu0 %2308  ;;  %v2407_v57 = vadd.f32 1.1920929e-07, %v2399_v46 }
 0x3b6   : > { %v2327_v8 = vmul.f32 0.03125, %v2318_v6  ;;  %v2324_v53 = vmul.f32 0.03125, %v2309_v45  ;;  %6625 = vmatprep.subr.bf16.mxu1 %v7645_v50  ;;  %7074 = vrsqrt.f32 %v2404_v4  ;;  %v2352_v23 = vmul.f32 0.17677669, %v2344_v21 }
 0x3b7   : > { %v7061_v11 = vpop.eup %7060 }
 0x3b8   : > { %v2335_v12 = vadd.f32 1.1920929e-07, %v2327_v8  ;;  %v2332_v13 = vadd.f32 1.1920929e-07, %v2324_v53  ;;  %v2345_v19 = vmul.f32 %v7061_v11, %v8223_v0  ;;  %v7063_v20 = vpop.eup %7062 }
 0x3b9   : > { %v3494_v14 = vpop.permute.xlu1 %3493  ;;  %v2388_v16 = vpop.xlane.xlu0 %2387  ;;  %v2419_v15 = vmul.f32 %v7063_v20, %v8199_v25 }
 0x3ba   : > { %7076 = vrsqrt.f32 %v2335_v12  ;;  %v2398_v58 = vmul.f32 0.03125, %v2388_v16  ;;  %v7065_v37 = vpop.eup %7064  ;;  %v2353_v60 = vmul.f32 0.17677669, %v2345_v19 }
 0x3bb   : > { %7078 = vrsqrt.f32 %v2332_v13  ;;  %v7067_v24 = vpop.eup %7066  ;;  %v2347_v35 = vmul.f32 %v7065_v37, %v8221_v63 }
 0x3bc   : > { %v2406_v27 = vadd.f32 1.1920929e-07, %v2398_v58  ;;  %v2424_v41 = vpack.c.bf16 %v2353_v60, %v2352_v23  ;;  %v2418_v7 = vmul.f32 %v7067_v24, %v8219_v48  ;;  %7080 = vrsqrt.f32 %v2407_v57 }
 0x3bd   : > { %v3498_v2 = vpop.permute.xlu1 %3497  ;;  %v2315_v56 = vpop.xlane.xlu0 %2314  ;;  %v2355_v4 = vmul.f32 0.17677669, %v2347_v35 }
 0x3be   : > { %v2326_v28 = vmul.f32 0.03125, %v2315_v56  ;;  %6622 = vmatmul.mubr.msk.bf16.vlgmr.msra.gmra.mxu1 %vm2294_vm0, %v2424_v41  ;;  %v2429_v0 = vpack.c.bf16 %v2419_v15, %v2418_v7  ;;  %7082 = vrsqrt.f32 %v2406_v27  ;;  %v3509_v40 = vcombine.low %v8074_v38, %v3498_v2 }
 0x3bf   : > { %v7069_v32 = vpop.eup %7068  ;;  %6627 = vmatprep.mubr.msk.bf16.mxu1 %vm7646_vm1, %v7645_v50  ;;  %v3510_v48 = vcombine.high %v8074_v38, %v3498_v2 }
 0x3c0   : > { %v2334_v33 = vadd.f32 1.1920929e-07, %v2326_v28  ;;  %v7071_v36 = vpop.eup %7070  ;;  %v2483_v25 = vsel %vm2294_vm0, %v2429_v0, 0  ;;  %v2346_v49 = vmul.f32 %v7069_v32, %v8237_v9  ;;  %v3517_v5 = vrot.slane %v3509_v40, %v8107_v10 }
 0x3c1   : > { %v3500_v42 = vpop.permute.xlu1 %3499  ;;  %v3492_v44 = vpop.permute.xlu0 %3491  ;;  %6626 = vmatpush3.bf16.xpose.msra.mxu1 %v2483_v25  ;;  %v2421_v38 = vmul.f32 %v7071_v36, %v8225_v3  ;;  %v3524_v6 = vrot.slane %v3510_v48, %v8107_v10 }
 0x3c2   : > { %v7073_v54 = vpop.eup %7072  ;;  %7084 = vrsqrt.f32 %v2334_v33  ;;  %v3577_v47 = vcombine.low %v8078_v43, %v3500_v42  ;;  %v3578_v52 = vcombine.high %v8078_v43, %v3500_v42  ;;  %v2354_v1 = vmul.f32 0.17677669, %v2346_v49  ;;  %6631 = vmatprep.subr.bf16.mxu1 %v7645_v50 }
 0x3c3   : > { %v7075_v63 = vpop.eup %7074  ;;  %v2349_v8 = vmul.f32 %v7073_v54, %v8247_v18 }
 0x3c4   : > { %v2420_v46 = vmul.f32 %v7075_v63, %v8263_v26  ;;  %v3585_v13 = vrot.slane %v3577_v47, %v8107_v10  ;;  %v3592_v16 = vrot.slane %v3578_v52, %v8107_v10  ;;  %v2425_v3 = vpack.c.bf16 %v2355_v4, %v2354_v1 }
 0x3c5   : > { %v3506_v45 = vpop.permute.xlu1 %3505  ;;  %v3504_v9 = vpop.permute.xlu0 %3503  ;;  %v2357_v24 = vmul.f32 0.17677669, %v2349_v8 }
 0x3c6   : > { %v3593_v53 = vcombine.low %v3494_v14, %v3506_v45  ;;  %v3594_v21 = vcombine.high %v3494_v14, %v3506_v45  ;;  %v3525_v43 = vcombine.low %v3492_v44, %v3504_v9  ;;  %v3526_v11 = vcombine.high %v3492_v44, %v3504_v9 }
 0x3c7   : > { %v7077_v12 = vpop.eup %7076  ;;  %v2430_v19 = vpack.c.bf16 %v2421_v38, %v2420_v46 }
 0x3c8   : > { %v7079_v20 = vpop.eup %7078  ;;  %v3601_v57 = vrot.slane %v3593_v53, %v8107_v10  ;;  %v3608_v58 = vrot.slane %v3594_v21, %v8107_v10  ;;  %v3533_v26 = vrot.slane %v3525_v43, %v8107_v10  ;;  %v3540_v18 = vrot.slane %v3526_v11, %v8107_v10  ;;  %6628 = vmatmul.mubr.msk.bf16.vlgmr.msra.gmra.mxu1 %vm2294_vm0, %v2425_v3 }
 0x3c9   : > { %v8368_v14 = vpop.permute.xlu1 %3201  ;;  %v2530_v37 = vsel %vm2294_vm0, %v2430_v19, 0  ;;  %v8371_v23 = vpop.permute.xlu0 %3199  ;;  %v2348_v60 = vmul.f32 %v7079_v20, %v8275_v31  ;;  %v2351_v27 = vmul.f32 %v7077_v12, %v8273_v30  ;;  %6633 = vmatprep.mubr.msk.bf16.mxu1 %vm7646_vm1, %v7645_v50 }
 0x3ca   : > { %v3609_v2 = vcombine.low %v3585_v13, %v3601_v57  ;;  %v3610_v56 = vcombine.high %v3585_v13, %v3601_v57  ;;  %v3625_v41 = vcombine.low %v3592_v16, %v3608_v58  ;;  %v3626_v7 = vcombine.high %v3592_v16, %v3608_v58  ;;  %6632 = vmatpush3.bf16.xpose.msra.mxu1 %v2530_v37  ;;  %v7081_v15 = vpop.eup %7080 }
 0x3cb   : > { %v3541_v28 = vcombine.low %v3517_v5, %v3533_v26  ;;  %v3542_v0 = vcombine.high %v3517_v5, %v3533_v26  ;;  %v3557_v32 = vcombine.low %v3524_v6, %v3540_v18  ;;  %v3558_v33 = vcombine.high %v3524_v6, %v3540_v18  ;;  %6637 = vmatprep.subr.bf16.mxu1 %v7645_v50  ;;  %v7083_v40 = vpop.eup %7082 }
 0x3cc   : > { %v8378_v35 = vrot.slane %v3609_v2, %v8109_v17  ;;  %v8381_v31 = vrot.slane %v3610_v56, %v8109_v17  ;;  %v8384_v30 = vrot.slane %v3625_v41, %v8109_v17  ;;  %v8387_v36 = vrot.slane %v3626_v7, %v8109_v17 }
 0x3cd   : > { %v3549_v48 = vrot.slane %v3541_v28, %v8109_v17  ;;  %v3556_v42 = vrot.slane %v3542_v0, %v8109_v17  ;;  %v8393_v25 = vrot.slane %v3557_v32, %v8109_v17  ;;  %v8396_v44 = vrot.slane %v3558_v33, %v8109_v17  ;;  %v3208_v49 = vpop.permute.xlu1 %3207  ;;  %v3206_v54 = vpop.permute.xlu0 %3205 }
 0x3ce   : > { %v3713_v47 = vcombine.low %v8378_v35, %v8381_v31  ;;  %v6249_v52 = vcombine.high %v8378_v35, %v8381_v31  ;;  %v3729_v1 = vcombine.low %v8384_v30, %v8387_v36  ;;  %v2423_v63 = vmul.f32 %v7081_v15, %v8259_v62 }
 0x3cf   : > { %v7085_v4 = vpop.eup %7084  ;;  %v3645_v38 = vcombine.low %v3549_v48, %v3556_v42  ;;  %v6247_v5 = vcombine.high %v3549_v48, %v3556_v42  ;;  %v3661_v6 = vcombine.low %v8393_v25, %v8396_v44  ;;  %v6248_v45 = vcombine.high %v8393_v25, %v8396_v44 }
 0x3d0   : > { %v3285_v9 = vcombine.low %v8066_v34, %v3208_v49  ;;  %v3286_v46 = vcombine.high %v8066_v34, %v3208_v49  ;;  %v3217_v8 = vcombine.low %v8062_v22, %v3206_v54  ;;  %v3218_v53 = vcombine.high %v8062_v22, %v3206_v54 }
 0x3d1   : > { %v2356_v21 = vmul.f32 0.17677669, %v2348_v60  ;;  %v3214_v43 = vpop.permute.xlu1 %3213  ;;  %v2422_v62 = vmul.f32 %v7083_v40, %v8283_v39  ;;  %v3212_v11 = vpop.permute.xlu0 %3211  ;;  %v2350_v12 = vmul.f32 %v7085_v4, %v8289_v29  ;;  %v2359_v13 = vmul.f32 0.17677669, %v2351_v27 }
 0x3d2   : > { %v3293_v16 = vrot.slane %v3285_v9, %v8107_v10  ;;  %v3300_v3 = vrot.slane %v3286_v46, %v8107_v10  ;;  %v3225_v19 = vrot.slane %v3217_v8, %v8107_v10  ;;  %v3232_v34 = vrot.slane %v3218_v53, %v8107_v10 }
 0x3d3   : > { %v2426_v20 = vpack.c.bf16 %v2357_v24, %v2356_v21  ;;  %v3301_v57 = vcombine.low %v8368_v14, %v3214_v43  ;;  %v3302_v22 = vcombine.high %v8368_v14, %v3214_v43  ;;  %v2431_v58 = vpack.c.bf16 %v2423_v63, %v2422_v62 }
 0x3d4   : > { %v3233_v39 = vcombine.low %v8371_v23, %v3212_v11  ;;  %v3234_v26 = vcombine.high %v8371_v23, %v3212_v11  ;;  %v2358_v29 = vmul.f32 0.17677669, %v2350_v12  ;;  %v8424_v18 = vrot.slane %v3645_v38, %v8107_v10 }
 0x3d5   : > { %6634 = vmatmul.mubr.msk.bf16.vlgmr.msra.gmra.mxu1 %vm2294_vm0, %v2426_v20  ;;  %v3309_v37 = vrot.slane %v3301_v57, %v8107_v10  ;;  %v3316_v60 = vrot.slane %v3302_v22, %v8107_v10  ;;  %v2577_v24 = vsel %vm2294_vm0, %v2431_v58, 0  ;;  %v8430_v27 = vpop.permute.xlu1 %1998  ;;  %v1997_v14 = vpop.permute.xlu0 %1996  ;;  %v8433_v2 = vrot.slane %v6247_v5, %v8107_v10 }
 0x3d6   : > { %6638 = vmatpush3.bf16.xpose.msra.mxu1 %v2577_v24  ;;  %v3241_v23 = vrot.slane %v3233_v39, %v8107_v10  ;;  %v3248_v56 = vrot.slane %v3234_v26, %v8107_v10  ;;  %6639 = vmatprep.mubr.msk.bf16.mxu1 %vm7646_vm1, %v7645_v50  ;;  %v2427_v41 = vpack.c.bf16 %v2359_v13, %v2358_v29 }
 0x3d7   : > { %v3317_v7 = vcombine.low %v3293_v16, %v3309_v37  ;;  %v3318_v15 = vcombine.high %v3293_v16, %v3309_v37  ;;  %v3333_v28 = vcombine.low %v3300_v3, %v3316_v60  ;;  %v3334_v0 = vcombine.high %v3300_v3, %v3316_v60  ;;  %6643 = vmatprep.subr.bf16.mxu1 %v7645_v50 }
 0x3d8   : > { %v3249_v32 = vcombine.low %v3225_v19, %v3241_v23  ;;  %v3250_v33 = vcombine.high %v3225_v19, %v3241_v23  ;;  %v3265_v40 = vcombine.low %v3232_v34, %v3248_v56  ;;  %v3266_v48 = vcombine.high %v3232_v34, %v3248_v56 }
 0x3d9   : > { %v8441_v42 = vrot.slane %v3317_v7, %v8109_v17  ;;  %v8444_v49 = vrot.slane %v3318_v15, %v8109_v17  ;;  %v8447_v54 = vrot.slane %v3333_v28, %v8109_v17  ;;  %v8450_v63 = vrot.slane %v3334_v0, %v8109_v17  ;;  %v2003_v4 = vpop.permute.xlu1 %2002  ;;  %v2009_v8 = vpop.permute.xlu0 %2008 }
 0x3da   : > { %v8453_v38 = vrot.slane %v3249_v32, %v8109_v17  ;;  %v8456_v5 = vrot.slane %v3250_v33, %v8109_v17  ;;  %v8459_v9 = vrot.slane %v3265_v40, %v8109_v17  ;;  %v8462_v46 = vrot.slane %v3266_v48, %v8109_v17 }
 0x3db   : > { %v3421_v53 = vcombine.low %v8441_v42, %v8444_v49  ;;  %v6245_v21 = vcombine.high %v8441_v42, %v8444_v49  ;;  %v3437_v43 = vcombine.low %v8447_v54, %v8450_v63  ;;  %v6246_v62 = vcombine.high %v8447_v54, %v8450_v63 }
 0x3dc   : > { %v3353_v11 = vcombine.low %v8453_v38, %v8456_v5  ;;  %v6243_v12 = vcombine.high %v8453_v38, %v8456_v5  ;;  %v3369_v13 = vcombine.low %v8459_v9, %v8462_v46  ;;  %v6244_v16 = vcombine.high %v8459_v9, %v8462_v46 }
 0x3dd   : > { %6640 = vmatmul.mubr.msk.bf16.vlgmr.msra.gmra.mxu1 %vm2294_vm0, %v2427_v41  ;;  %v2014_v3 = vcombine.low %v8099_v55, %v2003_v4  ;;  %v2015_v19 = vcombine.high %v8099_v55, %v2003_v4  ;;  %v2030_v34 = vcombine.low %v1997_v14, %v2009_v8  ;;  %v2031_v20 = vcombine.high %v1997_v14, %v2009_v8  ;;  %v2005_v57 = vpop.permute.xlu1 %2004 }
 0x3de   : > { %v8487_v22 = vrot.slane %v3661_v6, %v8107_v10  ;;  %v8493_v58 = vrot.slane %v6248_v45, %v8107_v10  ;;  %v3677_v39 = vcombine.low %v8424_v18, %v8433_v2  ;;  %v2082_v55 = vcombine.low %v8103_v61, %v2005_v57  ;;  %6645 = vmatprep.mubr.msk.bf16.mxu1 %vm7646_vm1, %v7645_v50 }
 0x3df   : > { %v2022_v26 = vrot.slane %v2014_v3, %v8107_v10  ;;  %v2029_v29 = vrot.slane %v2015_v19, %v8107_v10  ;;  %v2038_v6 = vrot.slane %v2030_v34, %v8107_v10  ;;  %v2045_v37 = vrot.slane %v2031_v20, %v8107_v10 }
 0x3e0   : > { %v6250_v25 = vcombine.high %v8384_v30, %v8387_v36  ;;  %v3685_v44 = vrot.slane %v3677_v39, %v8109_v17  ;;  %v3693_v45 = vcombine.low %v8487_v22, %v8493_v58  ;;  %v2083_v60 = vcombine.high %v8103_v61, %v2005_v57 }
 0x3e1   : > { %v2046_v24 = vcombine.low %v2022_v26, %v2038_v6  ;;  %v2047_v14 = vcombine.high %v2022_v26, %v2038_v6  ;;  %v2062_v23 = vcombine.low %v2029_v29, %v2045_v37  ;;  %v2063_v56 = vcombine.high %v2029_v29, %v2045_v37  ;;  %v2011_v40 = vpop.permute.xlu1 %2010 }
 0x3e2   : > { %v3701_v41 = vrot.slane %v3693_v45, %v8109_v17  ;;  %v2090_v7 = vrot.slane %v2082_v55, %v8107_v10  ;;  %v8516_v15 = vrot.slane %v3713_v47, %v8107_v10  ;;  %v8522_v28 = vrot.slane %v6249_v52, %v8107_v10 }
 0x3e3   : > { %v2054_v61 = vrot.slane %v2046_v24, %v8109_v17  ;;  %v2061_v0 = vrot.slane %v2047_v14, %v8109_v17  ;;  %v2070_v32 = vrot.slane %v2062_v23, %v8109_v17  ;;  %v2077_v33 = vrot.slane %v2063_v56, %v8109_v17 }
 0x3e4   : > { %v8528_v48 = vcombine.low %v3685_v44, %v3701_v41  ;;  %v8534_v47 = vrot.slane %v3729_v1, %v8107_v10  ;;  %v8537_v35 = vrot.slane %v6250_v25, %v8107_v10  ;;  %v3745_v31 = vcombine.low %v8516_v15, %v8522_v28 }
 0x3e5   : > { %v2150_v52 = vcombine.low %v2054_v61, %v2061_v0  ;;  %v6227_v4 = vcombine.high %v2054_v61, %v2061_v0  ;;  %v2166_v8 = vcombine.low %v2070_v32, %v2077_v33  ;;  %v6228_v3 = vcombine.high %v2070_v32, %v2077_v33 }
 0x3e6   : > { %v4145_v19 = vmul.f32 %v8528_v48, %v8528_v48  ;;  %v3753_v34 = vrot.slane %v3745_v31, %v8109_v17  ;;  %v3761_v30 = vcombine.low %v8534_v47, %v8537_v35  ;;  %v2098_v36 = vcombine.low %v8430_v27, %v2011_v40 }
 0x3e7   : > { %v8548_v1 = vrot.slane %v2150_v52, %v8107_v10  ;;  %v8551_v20 = vrot.slane %v6227_v4, %v8107_v10  ;;  %v8554_v57 = vrot.slane %v2166_v8, %v8107_v10  ;;  %v8557_v39 = vrot.slane %v6228_v3, %v8107_v10 }
 0x3e8   : > { %v4153_v55 = vsel %vm2294_vm0, %v4145_v19, 0.0  ;;  %v3769_v26 = vrot.slane %v3761_v30, %v8109_v17  ;;  %v2099_v29 = vcombine.high %v8430_v27, %v2011_v40  ;;  %v2106_v6 = vrot.slane %v2098_v36, %v8107_v10 }
 0x3e9   : > { %4154 = vadd.xlane.f32.xlu0 %v4153_v55  ;;  %v2097_v37 = vrot.slane %v2083_v60, %v8107_v10  ;;  %v8564_v25 = vcombine.high %v3685_v44, %v3701_v41  ;;  %v2182_v45 = vcombine.low %v8548_v1, %v8551_v20  ;;  %v2198_v61 = vcombine.low %v8554_v57, %v8557_v39 }
 0x3ea   : > { %v8568_v24 = vcombine.low %v3753_v34, %v3769_v26  ;;  %v2113_v14 = vrot.slane %v2099_v29, %v8107_v10  ;;  %v2114_v23 = vcombine.low %v2090_v7, %v2106_v6  ;;  %v2115_v56 = vcombine.high %v2090_v7, %v2106_v6 }
 0x3eb   : > { %v8577_v27 = vrot.slane %v3353_v11, %v8107_v10  ;;  %v8583_v44 = vrot.slane %v6243_v12, %v8107_v10  ;;  %v4147_v33 = vmul.f32 %v8564_v25, %v8564_v25  ;;  %v8592_v11 = vrot.slane %v2182_v45, %v8109_v17 }
 0x3ec   : > { %v4146_v60 = vmul.f32 %v8568_v24, %v8568_v24  ;;  %v2122_v41 = vrot.slane %v2114_v23, %v8109_v17  ;;  %v2129_v7 = vrot.slane %v2115_v56, %v8109_v17  ;;  %v2130_v0 = vcombine.low %v2097_v37, %v2113_v14 }
 0x3ed   : > { %v2131_v32 = vcombine.high %v2097_v37, %v2113_v14  ;;  %v8598_v38 = vrot.slane %v3369_v13, %v8107_v10  ;;  %v3384_v4 = vrot.slane %v6244_v16, %v8107_v10  ;;  %v3385_v8 = vcombine.low %v8577_v27, %v8583_v44 }
 0x3ee   : > { %v4156_v5 = vsel %vm2294_vm0, %v4146_v60, 0.0  ;;  %v2138_v12 = vrot.slane %v2130_v0, %v8109_v17  ;;  %v2218_v40 = vcombine.low %v2122_v41, %v2129_v7  ;;  %v6229_v31 = vcombine.high %v2122_v41, %v2129_v7 }
 0x3ef   : > { %4157 = vadd.xlane.f32.xlu0 %v4156_v5  ;;  %v2145_v52 = vrot.slane %v2131_v32, %v8109_v17  ;;  %v8609_v3 = vcombine.high %v3753_v34, %v3769_v26  ;;  %v3428_v30 = vrot.slane %v3421_v53, %v8107_v10  ;;  %v3436_v9 = vrot.slane %v6245_v21, %v8107_v10 }
 0x3f0   : > { %v8612_v13 = vrot.slane %v2218_v40, %v8107_v10  ;;  %v8615_v19 = vrot.slane %v6229_v31, %v8107_v10  ;;  %v3393_v34 = vrot.slane %v3385_v8, %v8109_v17  ;;  %v3401_v36 = vcombine.low %v8598_v38, %v3384_v4 }
 0x3f1   : > { %v2234_v46 = vcombine.low %v2138_v12, %v2145_v52  ;;  %v6230_v16 = vcombine.high %v2138_v12, %v2145_v52  ;;  %v4159_v55 = vsel %vm2294_vm0, %v4147_v33, 0.0  ;;  %v3444_v53 = vrot.slane %v3437_v43, %v8107_v10 }
 0x3f2   : > { %v2250_v26 = vcombine.low %v8612_v13, %v8615_v19  ;;  %v3452_v42 = vrot.slane %v6246_v62, %v8107_v10  ;;  %v3409_v29 = vrot.slane %v3401_v36, %v8109_v17  ;;  %v3453_v6 = vcombine.low %v3428_v30, %v3436_v9 }
 0x3f3   : > { %v2241_v49 = vrot.slane %v2234_v46, %v8107_v10  ;;  %v2249_v21 = vrot.slane %v6230_v16, %v8107_v10  ;;  %4160 = vadd.xlane.f32.xlu0 %v4159_v55  ;;  %v2206_v37 = vrot.slane %v2198_v61, %v8109_v17  ;;  %v3746_v43 = vcombine.high %v8516_v15, %v8522_v28 }
 0x3f4   : > { %v2258_v45 = vrot.slane %v2250_v26, %v8109_v17  ;;  %v3469_v14 = vcombine.low %v3444_v53, %v3452_v42  ;;  %v8645_v56 = vcombine.low %v3393_v34, %v3409_v29  ;;  %v3461_v54 = vrot.slane %v3453_v6, %v8109_v17 }
 0x3f5   : > { %v2266_v23 = vcombine.low %v2241_v49, %v2249_v21  ;;  %v8648_v63 = vcombine.high %v3393_v34, %v3409_v29  ;;  %v3760_v60 = vrot.slane %v3746_v43, %v8109_v17  ;;  %v3762_v61 = vcombine.high %v8534_v47, %v8537_v35 }
 0x3f6   : > { %v3477_v62 = vrot.slane %v3469_v14, %v8109_v17  ;;  %v3678_v41 = vcombine.high %v8424_v18, %v8433_v2  ;;  %v3694_v15 = vcombine.high %v8487_v22, %v8493_v58  ;;  %v2214_v5 = vcombine.low %v8592_v11, %v2206_v37 }
 0x3f7   : > { %v2274_v7 = vrot.slane %v2266_v23, %v8109_v17  ;;  %v3776_v32 = vrot.slane %v3762_v61, %v8109_v17  ;;  %v3454_v58 = vcombine.high %v3428_v30, %v3436_v9  ;;  %v3470_v52 = vcombine.high %v3444_v53, %v3452_v42  ;;  %v8708_v61 = vld [vmem:[#allocation9] sm:$0xff] }
 0x3f8   : > { %v8659_v28 = vcombine.low %v3461_v54, %v3477_v62  ;;  %v8661_v0 = vcombine.high %v3461_v54, %v3477_v62  ;;  %v3692_v33 = vrot.slane %v3678_v41, %v8109_v17  ;;  %v3708_v47 = vrot.slane %v3694_v15, %v8109_v17 }
 0x3f9   : > { %v2282_v12 = vcombine.low %v2258_v45, %v2274_v7  ;;  %v8667_v35 = vcombine.low %v3760_v60, %v3776_v32  ;;  %v8669_v18 = vcombine.high %v3760_v60, %v3776_v32  ;;  %v3468_v31 = vrot.slane %v3454_v58, %v8109_v17 }
 0x3fa   : > { %v8671_v40 = vcombine.low %v3692_v33, %v3708_v47  ;;  %v8673_v22 = vcombine.high %v3692_v33, %v3708_v47  ;;  %v3386_v8 = vcombine.high %v8577_v27, %v8583_v44  ;;  %v3402_v46 = vcombine.high %v8598_v38, %v3384_v4 }
 0x3fb   : > { %v2697_v2 = vpack.c.bf16 %v2282_v12, %v2214_v5  ;;  %v3484_v16 = vrot.slane %v3470_v52, %v8109_v17  ;;  %v2215_v34 = vcombine.high %v8592_v11, %v2206_v37  ;;  %v2283_v30 = vcombine.high %v2258_v45, %v2274_v7  ;;  %v8713_v7 = vld [vmem:[#allocation9 + $0x8] sm:$0xff] }
 0x3fc   : > { %v3400_v36 = vrot.slane %v3386_v8, %v8109_v17  ;;  %v3416_v55 = vrot.slane %v3402_v46, %v8109_v17  ;;  %v2183_v9 = vcombine.high %v8548_v1, %v8551_v20  ;;  %v2199_v27 = vcombine.high %v8554_v57, %v8557_v39 }
 0x3fd   : > { %6644 = vmatpush3.bf16.msra.mxu1 %v2697_v2  ;;  %v8686_v26 = vcombine.low %v3468_v31, %v3484_v16  ;;  %v8688_v53 = vcombine.high %v3468_v31, %v3484_v16  ;;  %v2251_v44 = vcombine.high %v8612_v13, %v8615_v19  ;;  %v8698_v4 = vpack.c.bf16 %v2283_v30, %v2215_v34 }
 0x3fe   : > { %6649 = vmatprep.subr.bf16.mxu1 %v7645_v50  ;;  %v8694_v38 = vcombine.low %v3400_v36, %v3416_v55  ;;  %v8696_v11 = vcombine.high %v3400_v36, %v3416_v55  ;;  %v2197_v42 = vrot.slane %v2183_v9, %v8109_v17  ;;  %v2213_v1 = vrot.slane %v2199_v27, %v8109_v17 }
 0x3ff   : > { %v2265_v20 = vrot.slane %v2251_v44, %v8109_v17  ;;  %v2267_v29 = vcombine.high %v2241_v49, %v2249_v21  ;;  %v4073_v32 = vmul.f32 %v8645_v56, %v8645_v56  ;;  %v4148_v58 = vmul.f32 %v8609_v3, %v8609_v3 }
 0x400   : > { %v2216_v6 = vcombine.low %v2197_v42, %v2213_v1  ;;  %v2217_v37 = vcombine.high %v2197_v42, %v2213_v1  ;;  %v4074_v34 = vmul.f32 %v8659_v28, %v8659_v28 }
 0x401   : > { %v2281_v57 = vrot.slane %v2267_v29, %v8109_v17  ;;  %v4081_v2 = vsel %vm2294_vm0, %v4073_v32, 0.0  ;;  %v4162_v16 = vsel %vm2294_vm0, %v4148_v58, 0.0  ;;  %v4151_v58 = vmul.f32 %v8673_v22, %v8673_v22 }
 0x402   : > { %v4084_v1 = vsel %vm2294_vm0, %v4074_v34, 0.0  ;;  %v4152_v34 = vmul.f32 %v8669_v18, %v8669_v18 }
 0x403   : > { %v2284_v39 = vcombine.low %v2265_v20, %v2281_v57  ;;  %v2285_v45 = vcombine.high %v2265_v20, %v2281_v57  ;;  %v4076_v20 = vmul.f32 %v8661_v0, %v8661_v0 }
 0x405   : > { %v8704_v13 = vpack.c.bf16 %v2284_v39, %v2216_v6  ;;  %v8706_v19 = vpack.c.bf16 %v2285_v45, %v2217_v37  ;;  %v4075_v6 = vmul.f32 %v8648_v63, %v8648_v63  ;;  %v4090_v37 = vsel %vm2294_vm0, %v4076_v20, 0.0 }
 0x406   : > { %v4080_v20 = vmul.f32 %v8688_v53, %v8688_v53 }
 0x407   : > { %v4087_v57 = vsel %vm2294_vm0, %v4075_v6, 0.0 }
 0x472   : > { %v4155_v14 = vpop.xlane.xlu0 %4154 }
 0x473   : > { %v4177_v43 = vmul.f32 0.03125, %v4155_v14 }
 0x475   : > { %v4185_v23 = vadd.f32 1.1920929e-07, %v4177_v43 }
 0x477   : > { %7086 = vrsqrt.f32 %v4185_v23  ;;  %v4149_v23 = vmul.f32 %v8671_v40, %v8671_v40 }
 0x478   : > { %v4158_v54 = vpop.xlane.xlu0 %4157 }
 0x479   : > { %v4178_v62 = vmul.f32 0.03125, %v4158_v54 }
 0x47b   : > { %v4186_v60 = vadd.f32 1.1920929e-07, %v4178_v62 }
 0x47d   : > { %7088 = vrsqrt.f32 %v4186_v60 }
 0x47e   : > { %v2472_v49 = vpop.f32.mrf.mxu1 }
 0x47f   : > { %v8711_v21 = vadd.f32 %v2472_v49, %v8708_v61 }
 0x480   : > { %v6623_v41 = vpop.f32.mrf.mxu1 }
 0x481   : > { %v2621_v15 = vsel %vm2620_vm2, %v8711_v21, -inf  ;;  %v4150_v41 = vmul.f32 %v8667_v35, %v8667_v35 }
 0x482   : > { %v2475_v33 = vpop.f32.mrf.mxu1  ;;  %2622 = vmax.xlane.f32.xlu0 %v2621_v15  ;;  %v4165_v15 = vsel %vm2294_vm0, %v4149_v23, 0.0 }
 0x483   : > { %v8720_v5 = vadd.f32 %v2475_v33, %v8713_v7 }
 0x484   : > { %v6624_v12 = vpop.f32.mrf.mxu1  ;;  %v7087_v31 = vpop.eup %7086 }
 0x485   : > { %v2624_v47 = vsel %vm2620_vm2, %v8720_v5, -inf  ;;  %v4201_v36 = vmul.f32 %v7087_v31, %v8528_v48 }
 0x486   : > { %2625 = vmax.xlane.f32.xlu1 %v2624_v47  ;;  %4082 = vadd.xlane.f32.xlu0 %v4081_v2  ;;  %v4168_v47 = vsel %vm2294_vm0, %v4150_v41, 0.0 }
 0x488   : > { %v2519_v52 = vpop.f32.mrf.mxu1 }
 0x489   : > { %v8728_v46 = vadd.f32 %v2519_v52, %v8708_v61 }
 0x48a   : > { %v7089_v8 = vpop.eup %7088  ;;  %4163 = vadd.xlane.f32.xlu1 %v4162_v16  ;;  %v6629_v30 = vpop.f32.mrf.mxu1 }
 0x48b   : > { %v4202_v55 = vmul.f32 %v7089_v8, %v8568_v24  ;;  %v2627_v9 = vsel %vm2620_vm2, %v8728_v46, -inf  ;;  %v4174_v30 = vsel %vm2294_vm0, %v4152_v34, 0.0 }
 0x48c   : > { %v2522_v44 = vpop.f32.mrf.mxu1  ;;  %2628 = vmax.xlane.f32.xlu0 %v2627_v9  ;;  %v4078_v9 = vmul.f32 %v8686_v26, %v8686_v26 }
 0x48d   : > { %v4213_v27 = vpack.c.bf16 %v4202_v55, %v4201_v36  ;;  %v8738_v42 = vadd.f32 %v2522_v44, %v8713_v7  ;;  %v4171_v36 = vsel %vm2294_vm0, %v4151_v58, 0.0  ;;  %v4077_v55 = vmul.f32 %v8694_v38, %v8694_v38 }
 0x48e   : > { %4085 = vadd.xlane.f32.xlu1 %v4084_v1  ;;  %v6630_v24 = vpop.f32.mrf.mxu1  ;;  %v4079_v44 = vmul.f32 %v8696_v11, %v8696_v11  ;;  %v4096_v1 = vsel %vm2294_vm0, %v4078_v9, 0.0 }
 0x48f   : > { %v4221_v48 = vsel %vm2294_vm0, %v4213_v27, 0  ;;  %v2630_v29 = vsel %vm2620_vm2, %v8738_v42, -inf  ;;  %v4093_v27 = vsel %vm2294_vm0, %v4077_v55, 0.0  ;;  %v4102_v24 = vsel %vm2294_vm0, %v4080_v20, 0.0 }
 0x490   : > { %6668 = vmatpush3.bf16.xpose.msra.mxu0 %v4221_v48  ;;  %2631 = vmax.xlane.f32.xlu0 %v2630_v29  ;;  %v4099_v48 = vsel %vm2294_vm0, %v4079_v44, 0.0  ;;  %v4161_v29 = vpop.xlane.xlu0 %4160 }
 0x491   : > { %6679 = vmatprep.subr.bf16.mxu0 %v7645_v50 }
 0x492   : > { %4091 = vadd.xlane.f32.xlu1 %v4090_v37 }
 0x494   : > { %4088 = vadd.xlane.f32.xlu0 %v4087_v57 }
 0x495   : > { %v2566_v39 = vpop.f32.mrf.mxu1 }
 0x496   : > { %v8752_v45 = vadd.f32 %v2566_v39, %v8708_v61 }
 0x497   : > { %v6635_v14 = vpop.f32.mrf.mxu1 }
 0x498   : > { %v2633_v43 = vsel %vm2620_vm2, %v8752_v45, -inf }
 0x499   : > { %v2569_v54 = vpop.f32.mrf.mxu1  ;;  %2634 = vmax.xlane.f32.xlu0 %v2633_v43 }
 0x49a   : > { %v8759_v62 = vadd.f32 %v2569_v54, %v8713_v7 }
 0x49b   : > { %v6636_v60 = vpop.f32.mrf.mxu1 }
 0x49c   : > { %v2636_v49 = vsel %vm2620_vm2, %v8759_v62, -inf }
 0x49d   : > { %2637 = vmax.xlane.f32.xlu1 %v2636_v49  ;;  %v2613_v32 = vpop.f32.mrf.mxu1  ;;  %4166 = vadd.xlane.f32.xlu0 %v4165_v15 }
 0x49e   : > { %v8767_v33 = vadd.f32 %v2613_v32, %v8708_v61 }
 0x49f   : > { %v6641_v12 = vpop.f32.mrf.mxu1 }
 0x4a0   : > { %v2639_v2 = vsel %vm2620_vm2, %v8767_v33, -inf }
 0x4a1   : > { %4169 = vadd.xlane.f32.xlu1 %v4168_v47  ;;  %v2616_v31 = vpop.f32.mrf.mxu1  ;;  %2640 = vmax.xlane.f32.xlu0 %v2639_v2 }
 0x4a2   : > { %v8775_v52 = vadd.f32 %v2616_v31, %v8713_v7 }
 0x4a3   : > { %v6642_v8 = vpop.f32.mrf.mxu1 }
 0x4a4   : > { %v2642_v16 = vsel %vm2620_vm2, %v8775_v52, -inf  ;;  %v4179_v8 = vmul.f32 0.03125, %v4161_v29 }
 0x4a5   : > { %2643 = vmax.xlane.f32.xlu1 %v2642_v16  ;;  %4172 = vadd.xlane.f32.xlu0 %v4171_v36 }
 0x4a9   : > { %4175 = vadd.xlane.f32.xlu1 %v4174_v30  ;;  %4094 = vadd.xlane.f32.xlu0 %v4093_v27  ;;  %v4187_v27 = vadd.f32 1.1920929e-07, %v4179_v8 }
 0x4ad   : > { %4097 = vadd.xlane.f32.xlu1 %v4096_v1  ;;  %4100 = vadd.xlane.f32.xlu0 %v4099_v48 }
 0x4b1   : > { %4103 = vadd.xlane.f32.xlu1 %v4102_v24 }
 0x50b   : > { %v2623_v6 = vpop.xlane.xlu0 %2622 }
 0x50c   : > { %v2645_v37 = vsub.f32 %v8711_v21, %v2623_v6 }
 0x50e   : > { %v2653_v57 = vmul.f32 1.442695, %v2645_v37 }
 0x50f   : > { %v2626_v39 = vpop.xlane.xlu1 %2625  ;;  %v4083_v14 = vpop.xlane.xlu0 %4082 }
 0x510   : > { %v2646_v43 = vsub.f32 %v8720_v5, %v2626_v39  ;;  %v4105_v23 = vmul.f32 0.03125, %v4083_v14  ;;  %7090 = vpow2.f32 %v2653_v57 }
 0x512   : > { %v2655_v54 = vmul.f32 1.442695, %v2646_v43  ;;  %v4113_v60 = vadd.f32 1.1920929e-07, %v4105_v23 }
 0x513   : > { %v4164_v49 = vpop.xlane.xlu1 %4163 }
 0x514   : > { %7092 = vpow2.f32 %v2655_v54  ;;  %v4180_v36 = vmul.f32 0.03125, %v4164_v49 }
 0x515   : > { %v2629_v41 = vpop.xlane.xlu0 %2628  ;;  %7094 = vrsqrt.f32 %v4113_v60 }
 0x516   : > { %v2647_v15 = vsub.f32 %v8728_v46, %v2629_v41  ;;  %v4188_v1 = vadd.f32 1.1920929e-07, %v4180_v36 }
 0x517   : > { %v4086_v32 = vpop.xlane.xlu1 %4085 }
 0x518   : > { %v4106_v12 = vmul.f32 0.03125, %v4086_v32  ;;  %v2657_v47 = vmul.f32 1.442695, %v2647_v15 }
 0x519   : > { %v2632_v2 = vpop.xlane.xlu0 %2631 }
 0x51a   : > { %v4114_v21 = vadd.f32 1.1920929e-07, %v4106_v12  ;;  %v2648_v58 = vsub.f32 %v8738_v42, %v2632_v2 }
 0x51b   : > { %v4092_v46 = vpop.xlane.xlu1 %4091 }
 0x51c   : > { %7096 = vrsqrt.f32 %v4114_v21  ;;  %v2659_v31 = vmul.f32 1.442695, %v2648_v58  ;;  %v4108_v14 = vmul.f32 0.03125, %v4092_v46 }
 0x51d   : > { %7098 = vpow2.f32 %v2657_v47  ;;  %v4089_v5 = vpop.xlane.xlu0 %4088  ;;  %v8799_v16 = vpop.eup %7090 }
 0x51e   : > { %7100 = vpow2.f32 %v2659_v31  ;;  %v4116_v2 = vadd.f32 1.1920929e-07, %v4108_v14 }
 0x51f   : > { %7102 = vrsqrt.f32 %v4187_v27 }
 0x521   : > { %v8801_v34 = vpop.eup %7092 }
 0x522   : > { %v2635_v55 = vpop.xlane.xlu0 %2634  ;;  %v2693_v9 = vpack.c.bf16 %v8801_v34, %v8799_v16  ;;  %v7095_v42 = vpop.eup %7094 }
 0x523   : > { %v2649_v30 = vsub.f32 %v8752_v45, %v2635_v55  ;;  %v4107_v45 = vmul.f32 0.03125, %v4089_v5  ;;  %v4129_v6 = vmul.f32 %v7095_v42, %v8645_v56 }
 0x524   : > { %6646 = vmatmul.mubr.msk.bf16.vlgmr.msra.gmra.mxu1 %vm2620_vm2, %v2693_v9 }
 0x525   : > { %v2661_v44 = vmul.f32 1.442695, %v2649_v30  ;;  %6650 = vmatpush3.bf16.msra.mxu1 %v8698_v4  ;;  %6651 = vmatprep.mubr.msk.bf16.mxu1 %vm7646_vm1, %v7645_v50  ;;  %v4115_v41 = vadd.f32 1.1920929e-07, %v4107_v45  ;;  %v4137_v56 = vmul.f32 0.17677669, %v4129_v6 }
 0x526   : > { %v2638_v20 = vpop.xlane.xlu1 %2637  ;;  %v4167_v48 = vpop.xlane.xlu0 %4166  ;;  %6655 = vmatprep.subr.bf16.mxu1 %v7645_v50 }
 0x527   : > { %v2650_v24 = vsub.f32 %v8759_v62, %v2638_v20  ;;  %v4181_v29 = vmul.f32 0.03125, %v4167_v48  ;;  %7104 = vpow2.f32 %v2661_v44 }
 0x528   : > { %7106 = vrsqrt.f32 %v4188_v1 }
 0x529   : > { %v2663_v37 = vmul.f32 1.442695, %v2650_v24  ;;  %v4189_v57 = vadd.f32 1.1920929e-07, %v4181_v29  ;;  %v7097_v39 = vpop.eup %7096 }
 0x52a   : > { %v4170_v4 = vpop.xlane.xlu1 %4169  ;;  %v2641_v43 = vpop.xlane.xlu0 %2640  ;;  %v4130_v60 = vmul.f32 %v7097_v39, %v8659_v28 }
 0x52b   : > { %v8813_v23 = vpop.eup %7098  ;;  %7108 = vpow2.f32 %v2663_v37  ;;  %v4182_v54 = vmul.f32 0.03125, %v4170_v4  ;;  %v2651_v62 = vsub.f32 %v8767_v33, %v2641_v43 }
 0x52c   : > { %v8817_v49 = vpop.eup %7100  ;;  %7110 = vrsqrt.f32 %v4189_v57  ;;  %v4138_v47 = vmul.f32 0.17677669, %v4130_v60 }
 0x52d   : > { %v4190_v15 = vadd.f32 1.1920929e-07, %v4182_v54  ;;  %v2665_v32 = vmul.f32 1.442695, %v2651_v62  ;;  %v2694_v12 = vpack.c.bf16 %v8817_v49, %v8813_v23 }
 0x52e   : > { %v2644_v21 = vpop.xlane.xlu1 %2643  ;;  %v4173_v58 = vpop.xlane.xlu0 %4172  ;;  %v4209_v28 = vpack.c.bf16 %v4138_v47, %v4137_v56 }
 0x52f   : > { %7112 = vrsqrt.f32 %v4190_v15  ;;  %v2652_v31 = vsub.f32 %v8775_v52, %v2644_v21  ;;  %v4183_v33 = vmul.f32 0.03125, %v4173_v58  ;;  %6652 = vmatmul.mubr.msk.bf16.vlgmr.msra.gmra.mxu1 %vm2620_vm2, %v2694_v12 }
 0x530   : > { %7114 = vrsqrt.f32 %v4115_v41  ;;  %6656 = vmatpush3.bf16.msra.mxu1 %v8704_v13  ;;  %6657 = vmatprep.mubr.msk.bf16.mxu1 %vm7646_vm1, %v7645_v50  ;;  %v7103_v13 = vpop.eup %7102 }
 0x531   : > { %v2667_v5 = vmul.f32 1.442695, %v2652_v31  ;;  %7116 = vpow2.f32 %v2665_v32  ;;  %v4191_v8 = vadd.f32 1.1920929e-07, %v4183_v33  ;;  %6670 = vmatmul.mubr.msk.bf16.vlgmr.msra.gmra.mxu0 %vm2294_vm0, %v4209_v28  ;;  %6661 = vmatprep.subr.bf16.mxu1 %v7645_v50  ;;  %v4203_v41 = vmul.f32 %v7103_v13, %v8564_v25 }
 0x532   : > { %7118 = vrsqrt.f32 %v4116_v2  ;;  %v4176_v36 = vpop.xlane.xlu1 %4175  ;;  %v4095_v52 = vpop.xlane.xlu0 %4094  ;;  %6681 = vmatprep.mubr.msk.bf16.mxu0 %vm7646_vm1, %v7645_v50 }
 0x533   : > { %7120 = vpow2.f32 %v2667_v5  ;;  %v4184_v46 = vmul.f32 0.03125, %v4176_v36  ;;  %v4109_v55 = vmul.f32 0.03125, %v4095_v52 }
 0x534   : > { %7122 = vrsqrt.f32 %v4191_v8  ;;  %v8830_v27 = vpop.eup %7104 }
 0x535   : > { %v4192_v30 = vadd.f32 1.1920929e-07, %v4184_v46  ;;  %v4117_v9 = vadd.f32 1.1920929e-07, %v4109_v55  ;;  %v7107_v1 = vpop.eup %7106 }
 0x536   : > { %v4098_v42 = vpop.xlane.xlu1 %4097  ;;  %v4101_v44 = vpop.xlane.xlu0 %4100  ;;  %v4204_v4 = vmul.f32 %v7107_v1, %v8609_v3 }
 0x537   : > { %7124 = vrsqrt.f32 %v4192_v30  ;;  %v4110_v20 = vmul.f32 0.03125, %v4098_v42  ;;  %v4111_v48 = vmul.f32 0.03125, %v4101_v44 }
 0x538   : > { %v8832_v24 = vpop.eup %7108  ;;  %7126 = vrsqrt.f32 %v4117_v9  ;;  %v4214_v15 = vpack.c.bf16 %v4204_v4, %v4203_v41 }
 0x539   : > { %v7111_v29 = vpop.eup %7110  ;;  %v4118_v45 = vadd.f32 1.1920929e-07, %v4110_v20  ;;  %v4119_v6 = vadd.f32 1.1920929e-07, %v4111_v48  ;;  %v2695_v37 = vpack.c.bf16 %v8832_v24, %v8830_v27 }
 0x53a   : > { %v4104_v57 = vpop.xlane.xlu1 %4103  ;;  %v4205_v14 = vmul.f32 %v7111_v29, %v8671_v40  ;;  %v4268_v25 = vsel %vm2294_vm0, %v4214_v15, 0 }
 0x53b   : > { %7128 = vrsqrt.f32 %v4118_v45  ;;  %v4112_v39 = vmul.f32 0.03125, %v4104_v57  ;;  %6658 = vmatmul.mubr.msk.bf16.vlgmr.msra.gmra.mxu1 %vm2620_vm2, %v2695_v37 }
 0x53c   : > { %v7113_v43 = vpop.eup %7112  ;;  %7130 = vrsqrt.f32 %v4119_v6  ;;  %6662 = vmatpush3.bf16.msra.mxu1 %v8706_v19  ;;  %6663 = vmatprep.mubr.msk.bf16.mxu1 %vm7646_vm1, %v7645_v50 }
 0x53d   : > { %v7115_v54 = vpop.eup %7114  ;;  %v4120_v62 = vadd.f32 1.1920929e-07, %v4112_v39  ;;  %6673 = vmatprep.subr.bf16.mxu1 %v7645_v50  ;;  %v4206_v60 = vmul.f32 %v7113_v43, %v8667_v35 }
 0x53e   : > { %v8845_v56 = vpop.eup %7116  ;;  %v4131_v2 = vmul.f32 %v7115_v54, %v8648_v63 }
 0x53f   : > { %v7119_v40 = vpop.eup %7118  ;;  %7132 = vrsqrt.f32 %v4120_v62  ;;  %v4215_v3 = vpack.c.bf16 %v4206_v60, %v4205_v14 }
 0x540   : > { %v8847_v32 = vpop.eup %7120  ;;  %v4132_v35 = vmul.f32 %v7119_v40, %v8661_v0  ;;  %v4139_v63 = vmul.f32 0.17677669, %v4131_v2 }
 0x541   : > { %v7123_v19 = vpop.eup %7122  ;;  %v4315_v12 = vsel %vm2294_vm0, %v4215_v3, 0  ;;  %v2696_v47 = vpack.c.bf16 %v8847_v32, %v8845_v56 }
 0x542   : > { %6680 = vmatpush3.bf16.xpose.msra.mxu0 %v4315_v12  ;;  %v4207_v21 = vmul.f32 %v7123_v19, %v8673_v22  ;;  %v4140_v5 = vmul.f32 0.17677669, %v4132_v35 }
 0x543   : > { %6664 = vmatmul.mubr.msk.bf16.vlgmr.msra.gmra.mxu1 %vm2620_vm2, %v2696_v47  ;;  %6691 = vmatprep.subr.bf16.mxu0 %v7645_v50 }
 0x544   : > { %v7125_v58 = vpop.eup %7124  ;;  %6674 = vmatpush3.bf16.xpose.msra.mxu1 %v4268_v25  ;;  %6675 = vmatprep.mubr.msk.bf16.mxu1 %vm7646_vm1, %v7645_v50  ;;  %v4210_v22 = vpack.c.bf16 %v4140_v5, %v4139_v63 }
 0x545   : > { %v7127_v31 = vpop.eup %7126  ;;  %6685 = vmatprep.subr.bf16.mxu1 %v7645_v50  ;;  %v4208_v33 = vmul.f32 %v7125_v58, %v8669_v18 }
 0x546   : > { %v4133_v28 = vmul.f32 %v7127_v31, %v8694_v38 }
 0x547   : > { %v4216_v8 = vpack.c.bf16 %v4208_v33, %v4207_v21 }
 0x548   : > { %v7129_v0 = vpop.eup %7128  ;;  %v4141_v55 = vmul.f32 0.17677669, %v4133_v28 }
 0x549   : > { %v7131_v36 = vpop.eup %7130  ;;  %v4362_v52 = vsel %vm2294_vm0, %v4216_v8, 0  ;;  %v4134_v46 = vmul.f32 %v7129_v0, %v8686_v26 }
 0x54a   : > { %v4135_v13 = vmul.f32 %v7131_v36, %v8696_v11 }
 0x54b   : > { %6676 = vmatmul.mubr.msk.bf16.vlgmr.msra.gmra.mxu1 %vm2294_vm0, %v4210_v22  ;;  %v4142_v30 = vmul.f32 0.17677669, %v4134_v46 }
 0x54c   : > { %v7133_v9 = vpop.eup %7132  ;;  %6686 = vmatpush3.bf16.xpose.msra.mxu1 %v4362_v52  ;;  %6687 = vmatprep.mubr.msk.bf16.mxu1 %vm7646_vm1, %v7645_v50  ;;  %v4143_v42 = vmul.f32 0.17677669, %v4135_v13 }
 0x54d   : > { %v4211_v18 = vpack.c.bf16 %v4142_v30, %v4141_v55  ;;  %v4136_v38 = vmul.f32 %v7133_v9, %v8688_v53  ;;  %6697 = vmatprep.subr.bf16.mxu1 %v7645_v50 }
 0x54f   : > { %6682 = vmatmul.mubr.msk.bf16.vlgmr.msra.gmra.mxu0 %vm2294_vm0, %v4211_v18  ;;  %v4144_v26 = vmul.f32 0.17677669, %v4136_v38 }
 0x550   : > { %6693 = vmatprep.mubr.msk.bf16.mxu0 %vm7646_vm1, %v7645_v50 }
 0x551   : > { %v4212_v11 = vpack.c.bf16 %v4144_v26, %v4143_v42 }
 0x553   : > { %6688 = vmatmul.mubr.msk.bf16.vlgmr.msra.gmra.mxu1 %vm2294_vm0, %v4212_v11 }
 0x554   : > { %6699 = vmatprep.mubr.msk.bf16.mxu1 %vm7646_vm1, %v7645_v50 }
 0x5e4   : > { %v8877_v44 = vpop.f32.mrf.mxu1 }
 0x5e6   : > { %v6647_v1 = vpop.f32.mrf.mxu1 }
 0x5e8   : > { %v8879_v20 = vpop.f32.mrf.mxu1 }
 0x5ea   : > { %v6648_v53 = vpop.f32.mrf.mxu1 }
 0x5ef   : > { %v8881_v48 = vpop.f32.mrf.mxu1 }
 0x5f1   : > { %v6653_v29 = vpop.f32.mrf.mxu1  ;;  %v4257_v45 = vpop.f32.mrf.mxu0 }
 0x5f2   : > { %v4258_v6 = vadd.f32 %v4257_v45, %v8708_v61  ;;  %v2675_v45 = vsel %vm2620_vm2, %v8813_v23, 0.0  ;;  %v2687_v23 = vsel %vm2620_vm2, %v8845_v56, 0.0 }
 0x5f3   : > { %v8884_v37 = vpop.f32.mrf.mxu1  ;;  %v6671_v57 = vpop.f32.mrf.mxu0 }
 0x5f4   : > { %v4405_v39 = vsel %vm2620_vm2, %v4258_v6, -inf }
 0x5f5   : > { %4406 = vmax.xlane.f32.xlu0 %v4405_v39  ;;  %v6654_v14 = vpop.f32.mrf.mxu1  ;;  %v4260_v4 = vpop.f32.mrf.mxu0  ;;  %v2678_v39 = vsel %vm2620_vm2, %v8817_v49, 0.0 }
 0x5f6   : > { %v4261_v43 = vadd.f32 %v4260_v4, %v8713_v7  ;;  %v2684_v4 = vsel %vm2620_vm2, %v8832_v24, 0.0 }
 0x5f7   : > { %v6672_v54 = vpop.f32.mrf.mxu0 }
 0x5f8   : > { %v4408_v62 = vsel %vm2620_vm2, %v4261_v43, -inf }
 0x5f9   : > { %4409 = vmax.xlane.f32.xlu1 %v4408_v62 }
 0x5fb   : > { %v8889_v60 = vpop.f32.mrf.mxu1 }
 0x5fd   : > { %v6659_v41 = vpop.f32.mrf.mxu1 }
 0x5ff   : > { %v8891_v40 = vpop.f32.mrf.mxu1 }
 0x601   : > { %v6660_v3 = vpop.f32.mrf.mxu1 }
 0x603   : > { %v8893_v15 = vpop.f32.mrf.mxu1 }
 0x605   : > { %v6665_v19 = vpop.f32.mrf.mxu1 }
 0x607   : > { %v8895_v12 = vpop.f32.mrf.mxu1 }
 0x609   : > { %v6666_v47 = vpop.f32.mrf.mxu1 }
 0x60b   : > { %v4304_v2 = vpop.f32.mrf.mxu1 }
 0x60c   : > { %v8913_v55 = vadd.f32 %v4304_v2, %v8708_v61 }
 0x60d   : > { %v6677_v25 = vpop.f32.mrf.mxu1 }
 0x60e   : > { %v4411_v30 = vsel %vm2620_vm2, %v8913_v55, -inf }
 0x60f   : > { %v4307_v35 = vpop.f32.mrf.mxu1  ;;  %v4351_v21 = vpop.f32.mrf.mxu0 }
 0x610   : > { %v8898_v58 = vadd.f32 %v4351_v21, %v8708_v61  ;;  %v8923_v18 = vadd.f32 %v4307_v35, %v8713_v7 }
 0x611   : > { %v6678_v31 = vpop.f32.mrf.mxu1  ;;  %v6683_v63 = vpop.f32.mrf.mxu0 }
 0x612   : > { %v4417_v33 = vsel %vm2620_vm2, %v8898_v58, -inf  ;;  %v4414_v42 = vsel %vm2620_vm2, %v8923_v18, -inf }
 0x613   : > { %4418 = vmax.xlane.f32.xlu0 %v4417_v33  ;;  %v4354_v28 = vpop.f32.mrf.mxu0  ;;  %v4398_v5 = vpop.f32.mrf.mxu1 }
 0x614   : > { %v4355_v8 = vadd.f32 %v4354_v28, %v8713_v7  ;;  %v8916_v13 = vadd.f32 %v4398_v5, %v8708_v61 }
 0x615   : > { %v6684_v0 = vpop.f32.mrf.mxu0  ;;  %v6689_v36 = vpop.f32.mrf.mxu1 }
 0x616   : > { %v4420_v22 = vsel %vm2620_vm2, %v4355_v8, -inf  ;;  %v4423_v9 = vsel %vm2620_vm2, %v8916_v13, -inf }
 0x617   : > { %4421 = vmax.xlane.f32.xlu1 %v4420_v22  ;;  %v4401_v52 = vpop.f32.mrf.mxu1 }
 0x618   : > { %v8926_v38 = vadd.f32 %v4401_v52, %v8713_v7  ;;  %v2669_v7 = vsel %vm2620_vm2, %v8799_v16, 0.0  ;;  %v2672_v16 = vsel %vm2620_vm2, %v8801_v34, 0.0  ;;  %v2690_v34 = vsel %vm2620_vm2, %v8847_v32, 0.0 }
 0x619   : > { %v6690_v46 = vpop.f32.mrf.mxu1 }
 0x61a   : > { %v4426_v61 = vsel %vm2620_vm2, %v8926_v38, -inf }
 0x628   : > { %3785 = vrot.lane.b32.xlu1 %v8101_v59, %s7640_s21 }
 0x629   : > { %3783 = vrot.lane.b32.xlu0 %v8097_v51, %s7640_s21 }
 0x62c   : > { %3789 = vrot.lane.b32.xlu1 %v8097_v51, %s7641_s20 }
 0x630   : > { %3791 = vrot.lane.b32.xlu1 %v8101_v59, %s7641_s20 }
 0x648   : > { %4412 = vmax.xlane.f32.xlu0 %v4411_v30 }
 0x64c   : > { %4424 = vmax.xlane.f32.xlu0 %v4423_v9 }
 0x654   : > { %4415 = vmax.xlane.f32.xlu1 %v4414_v42 }
 0x658   : > { %4427 = vmax.xlane.f32.xlu1 %v4426_v61 }
 0x662   : > { %3795 = vrot.lane.b32.xlu0 %v8097_v51, %s7642_s28 }
 0x669   : > { %3797 = vrot.lane.b32.xlu1 %v8101_v59, %s7642_s28 }
 0x67e   : > { %v4407_v26 = vpop.xlane.xlu0 %4406 }
 0x67f   : > { %v4429_v11 = vsub.f32 %v4258_v6, %v4407_v26  ;;  %v2681_v6 = vsel %vm2620_vm2, %v8830_v27, 0.0 }
 0x681   : > { %2670 = vadd.xlane.f32.xlu0 %v2669_v7  ;;  %v4437_v1 = vmul.f32 1.442695, %v4429_v11 }
 0x682   : > { %v4410_v53 = vpop.xlane.xlu1 %4409 }
 0x683   : > { %7134 = vpow2.f32 %v4437_v1  ;;  %v4430_v29 = vsub.f32 %v4261_v43, %v4410_v53 }
 0x685   : > { %2676 = vadd.xlane.f32.xlu0 %v2675_v45  ;;  %v4439_v57 = vmul.f32 1.442695, %v4430_v29 }
 0x687   : > { %7136 = vpow2.f32 %v4439_v57 }
 0x689   : > { %2679 = vadd.xlane.f32.xlu0 %v2678_v39 }
 0x68d   : > { %2682 = vadd.xlane.f32.xlu0 %v2681_v6  ;;  %2673 = vadd.xlane.f32.xlu1 %v2672_v16 }
 0x690   : > { %v8946_v14 = vpop.eup %7134 }
 0x691   : > { %2688 = vadd.xlane.f32.xlu0 %v2687_v23  ;;  %2685 = vadd.xlane.f32.xlu1 %v2684_v4  ;;  %v4453_v49 = vsel %vm2620_vm2, %v8946_v14, 0.0 }
 0x694   : > { %v8954_v43 = vpop.eup %7136 }
 0x695   : > { %2691 = vadd.xlane.f32.xlu1 %v2690_v34  ;;  %4454 = vadd.xlane.f32.xlu0 %v4453_v49  ;;  %v4477_v27 = vpack.c.bf16 %v8954_v43, %v8946_v14  ;;  %v4456_v56 = vsel %vm2620_vm2, %v8954_v43, 0.0 }
 0x699   : > { %4457 = vadd.xlane.f32.xlu1 %v4456_v56 }
 0x69c   : > { %v4419_v24 = vpop.xlane.xlu0 %4418 }
 0x69d   : > { %v4433_v54 = vsub.f32 %v8898_v58, %v4419_v24 }
 0x69f   : > { %v4445_v62 = vmul.f32 1.442695, %v4433_v54 }
 0x6a0   : > { %v4422_v41 = vpop.xlane.xlu1 %4421  ;;  %v3784_v21 = vpop.permute.xlu0 %3783 }
 0x6a1   : > { %7138 = vpow2.f32 %v4445_v62  ;;  %v4434_v3 = vsub.f32 %v4355_v8, %v4422_v41 }
 0x6a3   : > { %v4447_v19 = vmul.f32 1.442695, %v4434_v3 }
 0x6a4   : > { %v3786_v58 = vpop.permute.xlu1 %3785 }
 0x6a5   : > { %7140 = vpow2.f32 %v4447_v19 }
 0x6a8   : > { %v3790_v33 = vpop.permute.xlu1 %3789 }
 0x6a9   : > { %v3801_v0 = vcombine.low %v8097_v51, %v3790_v33  ;;  %v3802_v36 = vcombine.high %v8097_v51, %v3790_v33 }
 0x6ab   : > { %v3809_v42 = vrot.slane %v3801_v0, %v8107_v10 }
 0x6ac   : > { %v3792_v52 = vpop.permute.xlu1 %3791 }
 0x6ad   : > { %v3869_v4 = vcombine.low %v8101_v59, %v3792_v52  ;;  %v3870_v34 = vcombine.high %v8101_v59, %v3792_v52 }
 0x6ae   : > { %v8963_v47 = vpop.eup %7138 }
 0x6af   : > { %v4465_v32 = vsel %vm2620_vm2, %v8963_v47, 0.0 }
 0x6b0   : > { %4466 = vadd.xlane.f32.xlu0 %v4465_v32 }
 0x6b2   : > { %v8967_v2 = vpop.eup %7140 }
 0x6b3   : > { %v4468_v25 = vsel %vm2620_vm2, %v8967_v2, 0.0  ;;  %v4479_v35 = vpack.c.bf16 %v8967_v2, %v8963_v47 }
 0x6b4   : > { %4469 = vadd.xlane.f32.xlu1 %v4468_v25 }
 0x6d1   : > { %v4413_v31 = vpop.xlane.xlu0 %4412 }
 0x6d2   : > { %v4431_v63 = vsub.f32 %v8913_v55, %v4413_v31  ;;  %v3816_v55 = vrot.slane %v3802_v36, %v8107_v10 }
 0x6d4   : > { %v4441_v28 = vmul.f32 1.442695, %v4431_v63 }
 0x6d5   : > { %v4425_v5 = vpop.xlane.xlu0 %4424 }
 0x6d6   : > { %7142 = vpow2.f32 %v4441_v28  ;;  %v4435_v8 = vsub.f32 %v8916_v13, %v4425_v5 }
 0x6d8   : > { %v4449_v22 = vmul.f32 1.442695, %v4435_v8 }
 0x6d9   : > { %v3796_v46 = vpop.permute.xlu0 %3795 }
 0x6da   : > { %7144 = vpow2.f32 %v4449_v22  ;;  %v3817_v30 = vcombine.low %v3784_v21, %v3796_v46  ;;  %v3818_v9 = vcombine.high %v3784_v21, %v3796_v46  ;;  %v3877_v21 = vrot.slane %v3869_v4, %v8107_v10 }
 0x6dc   : > { %v3825_v61 = vrot.slane %v3817_v30, %v8107_v10  ;;  %v3832_v26 = vrot.slane %v3818_v9, %v8107_v10 }
 0x6dd   : > { %v4416_v11 = vpop.xlane.xlu1 %4415 }
 0x6de   : > { %v3833_v13 = vcombine.low %v3809_v42, %v3825_v61  ;;  %v3834_v7 = vcombine.high %v3809_v42, %v3825_v61  ;;  %v3849_v1 = vcombine.low %v3816_v55, %v3832_v26  ;;  %v3850_v53 = vcombine.high %v3816_v55, %v3832_v26 }
 0x6df   : > { %v4432_v51 = vsub.f32 %v8923_v18, %v4416_v11 }
 0x6e0   : > { %v3841_v29 = vrot.slane %v3833_v13, %v8109_v17  ;;  %v3848_v45 = vrot.slane %v3834_v7, %v8109_v17  ;;  %v3857_v57 = vrot.slane %v3849_v1, %v8109_v17  ;;  %v3864_v39 = vrot.slane %v3850_v53, %v8109_v17 }
 0x6e1   : > { %v4443_v6 = vmul.f32 1.442695, %v4432_v51  ;;  %v4428_v16 = vpop.xlane.xlu1 %4427 }
 0x6e2   : > { %v4436_v49 = vsub.f32 %v8926_v38, %v4428_v16  ;;  %v3937_v18 = vcombine.low %v3841_v29, %v3848_v45  ;;  %v6251_v56 = vcombine.high %v3841_v29, %v3848_v45  ;;  %v3953_v24 = vcombine.low %v3857_v57, %v3864_v39 }
 0x6e3   : > { %v8986_v23 = vpop.eup %7142  ;;  %7146 = vpow2.f32 %v4443_v6  ;;  %v6252_v54 = vcombine.high %v3857_v57, %v3864_v39  ;;  %v3884_v38 = vrot.slane %v3870_v34, %v8107_v10 }
 0x6e4   : > { %v4451_v62 = vmul.f32 1.442695, %v4436_v49  ;;  %v4459_v3 = vsel %vm2620_vm2, %v8986_v23, 0.0  ;;  %v3944_v33 = vrot.slane %v3937_v18, %v8107_v10  ;;  %v3952_v28 = vrot.slane %v6251_v56, %v8107_v10 }
 0x6e5   : > { %v3798_v41 = vpop.permute.xlu1 %3797  ;;  %4460 = vadd.xlane.f32.xlu0 %v4459_v3  ;;  %v3968_v5 = vrot.slane %v6252_v54, %v8107_v10 }
 0x6e6   : > { %v3885_v19 = vcombine.low %v3786_v58, %v3798_v41  ;;  %v3886_v32 = vcombine.high %v3786_v58, %v3798_v41  ;;  %7148 = vpow2.f32 %v4451_v62  ;;  %v3960_v58 = vrot.slane %v3953_v24, %v8107_v10 }
 0x6e7   : > { %v8993_v25 = vpop.eup %7144  ;;  %v3969_v42 = vcombine.low %v3944_v33, %v3952_v28  ;;  %v3970_v7 = vcombine.high %v3944_v33, %v3952_v28 }
 0x6e8   : > { %v3893_v59 = vrot.slane %v3885_v19, %v8107_v10  ;;  %v3900_v31 = vrot.slane %v3886_v32, %v8107_v10  ;;  %v4471_v63 = vsel %vm2620_vm2, %v8993_v25, 0.0  ;;  %v3985_v55 = vcombine.low %v3960_v58, %v3968_v5 }
 0x6e9   : > { %4472 = vadd.xlane.f32.xlu0 %v4471_v63  ;;  %v3977_v39 = vrot.slane %v3969_v42, %v8109_v17  ;;  %v3986_v16 = vcombine.high %v3960_v58, %v3968_v5  ;;  %v3984_v19 = vrot.slane %v3970_v7, %v8109_v17 }
 0x6ea   : > { %v3901_v8 = vcombine.low %v3877_v21, %v3893_v59  ;;  %v3902_v0 = vcombine.high %v3877_v21, %v3893_v59  ;;  %v3917_v36 = vcombine.low %v3884_v38, %v3900_v31  ;;  %v3918_v22 = vcombine.high %v3884_v38, %v3900_v31 }
 0x6eb   : > { %v3993_v6 = vrot.slane %v3985_v55, %v8109_v17  ;;  %v4000_v32 = vrot.slane %v3986_v16, %v8109_v17 }
 0x6ec   : > { %v3909_v52 = vrot.slane %v3901_v8, %v8109_v17  ;;  %v3916_v46 = vrot.slane %v3902_v0, %v8109_v17  ;;  %v3925_v30 = vrot.slane %v3917_v36, %v8109_v17  ;;  %v3932_v9 = vrot.slane %v3918_v22, %v8109_v17 }
 0x6ed   : > { %v4001_v21 = vcombine.low %v3977_v39, %v3993_v6  ;;  %v4002_v59 = vcombine.high %v3977_v39, %v3993_v6  ;;  %v4003_v5 = vcombine.low %v3984_v19, %v4000_v32  ;;  %v4004_v8 = vcombine.high %v3984_v19, %v4000_v32 }
 0x6ee   : > { %v4005_v61 = vcombine.low %v3909_v52, %v3916_v46  ;;  %v6253_v26 = vcombine.high %v3909_v52, %v3916_v46  ;;  %v4021_v11 = vcombine.low %v3925_v30, %v3932_v9  ;;  %v6254_v13 = vcombine.high %v3925_v30, %v3932_v9 }
 0x6f0   : > { %v7147_v1 = vpop.eup %7146  ;;  %v4012_v53 = vrot.slane %v4005_v61, %v8107_v10  ;;  %v4020_v51 = vrot.slane %v6253_v26, %v8107_v10  ;;  %v4028_v29 = vrot.slane %v4021_v11, %v8107_v10  ;;  %v4036_v45 = vrot.slane %v6254_v13, %v8107_v10 }
 0x6f1   : > { %v4462_v57 = vsel %vm2620_vm2, %v7147_v1, 0.0  ;;  %v4478_v0 = vpack.c.bf16 %v7147_v1, %v8986_v23 }
 0x6f2   : > { %4463 = vadd.xlane.f32.xlu1 %v4462_v57  ;;  %v4037_v4 = vcombine.low %v4012_v53, %v4020_v51  ;;  %v4053_v49 = vcombine.low %v4028_v29, %v4036_v45  ;;  %v4038_v34 = vcombine.high %v4012_v53, %v4020_v51  ;;  %v4054_v18 = vcombine.high %v4028_v29, %v4036_v45 }
 0x6f3   : > { %v7149_v56 = vpop.eup %7148 }
 0x6f4   : > { %v4045_v24 = vrot.slane %v4037_v4, %v8109_v17  ;;  %v4061_v54 = vrot.slane %v4053_v49, %v8109_v17  ;;  %v4052_v62 = vrot.slane %v4038_v34, %v8109_v17  ;;  %v4068_v41 = vrot.slane %v4054_v18, %v8109_v17 }
 0x6f5   : > { %v4474_v3 = vsel %vm2620_vm2, %v7149_v56, 0.0  ;;  %v4480_v23 = vpack.c.bf16 %v7149_v56, %v8993_v25 }
 0x6f6   : > { %4475 = vadd.xlane.f32.xlu1 %v4474_v3  ;;  %v4069_v38 = vcombine.low %v4045_v24, %v4061_v54  ;;  %v4070_v31 = vcombine.high %v4045_v24, %v4061_v54  ;;  %v4071_v28 = vcombine.low %v4052_v62, %v4068_v41  ;;  %v4072_v58 = vcombine.high %v4052_v62, %v4068_v41 }
 0x6f8   : > { %v4481_v63 = vpack.c.bf16 %v4069_v38, %v4001_v21  ;;  %v4482_v33 = vpack.c.bf16 %v4070_v31, %v4002_v59  ;;  %v4483_v36 = vpack.c.bf16 %v4071_v28, %v4003_v5  ;;  %v4484_v22 = vpack.c.bf16 %v4072_v58, %v4004_v8 }
 0x6fa   : > { %6692 = vmatpush3.bf16.msra.mxu0 %v4481_v63  ;;  %6698 = vmatpush3.bf16.msra.mxu1 %v4482_v33 }
 0x6fb   : > { %6703 = vmatprep.subr.bf16.mxu0 %v7645_v50  ;;  %6709 = vmatprep.subr.bf16.mxu1 %v7645_v50 }
 0x6fd   : > { %6694 = vmatmul.mubr.msk.bf16.vlgmr.msra.gmra.mxu0 %vm2620_vm2, %v4477_v27  ;;  %6700 = vmatmul.mubr.msk.bf16.vlgmr.msra.gmra.mxu1 %vm2620_vm2, %v4478_v0 }
 0x6fe   : > { %6704 = vmatpush3.bf16.msra.mxu0 %v4483_v36  ;;  %6710 = vmatpush3.bf16.msra.mxu1 %v4484_v22 }
 0x6ff   : > { %6705 = vmatprep.mubr.msk.bf16.mxu0 %vm7646_vm1, %v7645_v50  ;;  %6711 = vmatprep.mubr.msk.bf16.mxu1 %vm7646_vm1, %v7645_v50 }
 0x705   : > { %6706 = vmatmul.mubr.msk.bf16.vlgmr.msra.gmra.mxu0 %vm2620_vm2, %v4479_v35  ;;  %6712 = vmatmul.mubr.msk.bf16.vlgmr.msra.gmra.mxu1 %vm2620_vm2, %v4480_v23 }
 0x70a   : > { %v2671_v14 = vpop.xlane.xlu0 %2670 }
 0x70b   : > { %7150 = vrcp.f32 %v2671_v14 }
 0x70e   : > { %v2677_v43 = vpop.xlane.xlu0 %2676 }
 0x712   : > { %v2680_v27 = vpop.xlane.xlu0 %2679 }
 0x716   : > { %v2674_v52 = vpop.xlane.xlu1 %2673  ;;  %v2683_v46 = vpop.xlane.xlu0 %2682 }
 0x717   : > { %7152 = vrcp.f32 %v2683_v46 }
 0x718   : > { %7154 = vrcp.f32 %v2677_v43  ;;  %v7151_v47 = vpop.eup %7150 }
 0x719   : > { %7156 = vrcp.f32 %v2674_v52  ;;  %v2885_v61 = vmul.f32 %v7151_v47, %v8877_v44 }
 0x71a   : > { %v2686_v30 = vpop.xlane.xlu1 %2685  ;;  %v2689_v50 = vpop.xlane.xlu0 %2688 }
 0x71b   : > { %7158 = vrcp.f32 %v2686_v30 }
 0x71c   : > { %7160 = vrcp.f32 %v2689_v50 }
 0x71d   : > { %7162 = vrcp.f32 %v2680_v27 }
 0x71e   : > { %v2692_v25 = vpop.xlane.xlu1 %2691 }
 0x71f   : > { %7164 = vrcp.f32 %v2692_v25 }
 0x724   : > { %v7153_v2 = vpop.eup %7152 }
 0x725   : > { %v7155_v35 = vpop.eup %7154  ;;  %v2889_v9 = vmul.f32 %v7153_v2, %v8889_v60 }
 0x726   : > { %v7157_v42 = vpop.eup %7156  ;;  %v2887_v7 = vmul.f32 %v7155_v35, %v8881_v48 }
 0x727   : > { %v2893_v1 = vcombine.low %v2885_v61, %v2889_v9  ;;  %v2894_v53 = vcombine.high %v2885_v61, %v2889_v9  ;;  %v2886_v29 = vmul.f32 %v7157_v42, %v8879_v20 }
 0x728   : > { %v7159_v55 = vpop.eup %7158 }
 0x729   : > { %v7161_v26 = vpop.eup %7160  ;;  %v2890_v11 = vmul.f32 %v7159_v55, %v8891_v40  ;;  %v2901_v40 = vrot.slane %v2893_v1, %v8107_v10  ;;  %v2908_v4 = vrot.slane %v2894_v53, %v8107_v10 }
 0x72a   : > { %v7163_v13 = vpop.eup %7162  ;;  %v2891_v51 = vmul.f32 %v7161_v26, %v8893_v15 }
 0x72b   : > { %v2888_v60 = vmul.f32 %v7163_v13, %v8884_v37  ;;  %v2961_v6 = vcombine.low %v2886_v29, %v2890_v11  ;;  %v2962_v16 = vcombine.high %v2886_v29, %v2890_v11 }
 0x72c   : > { %v7165_v45 = vpop.eup %7164  ;;  %v2909_v57 = vcombine.low %v2887_v7, %v2891_v51  ;;  %v2910_v39 = vcombine.high %v2887_v7, %v2891_v51 }
 0x72d   : > { %v2892_v44 = vmul.f32 %v7165_v45, %v8895_v12  ;;  %v2969_v37 = vrot.slane %v2961_v6, %v8107_v10  ;;  %v2976_v54 = vrot.slane %v2962_v16, %v8107_v10 }
 0x72e   : > { %v2917_v48 = vrot.slane %v2909_v57, %v8107_v10  ;;  %v2924_v49 = vrot.slane %v2910_v39, %v8107_v10 }
 0x72f   : > { %v2977_v15 = vcombine.low %v2888_v60, %v2892_v44  ;;  %v2978_v34 = vcombine.high %v2888_v60, %v2892_v44 }
 0x730   : > { %v2925_v20 = vcombine.low %v2901_v40, %v2917_v48  ;;  %v2926_v18 = vcombine.high %v2901_v40, %v2917_v48  ;;  %v2941_v56 = vcombine.low %v2908_v4, %v2924_v49  ;;  %v2942_v24 = vcombine.high %v2908_v4, %v2924_v49 }
 0x731   : > { %v2985_v12 = vrot.slane %v2977_v15, %v8107_v10  ;;  %v2992_v62 = vrot.slane %v2978_v34, %v8107_v10 }
 0x732   : > { %v2933_v41 = vrot.slane %v2925_v20, %v8109_v17  ;;  %v2940_v3 = vrot.slane %v2926_v18, %v8109_v17  ;;  %v2949_v19 = vrot.slane %v2941_v56, %v8109_v17  ;;  %v2956_v32 = vrot.slane %v2942_v24, %v8109_v17  ;;  %v6958_v18 = vld [vmem:[%s7988_s15 + $0x38] sm:$0xff]   ;;  %v6959_v56 = vld [vmem:[%s7988_s15 + $0x30] sm:$0xff]   ;;  %v6960_v24 = vld [vmem:[%s7988_s15 + $0x28] sm:$0xff]  }
 0x733   : > { %v2993_v21 = vcombine.low %v2969_v37, %v2985_v12  ;;  %v2994_v38 = vcombine.high %v2969_v37, %v2985_v12  ;;  %v3009_v59 = vcombine.low %v2976_v54, %v2992_v62  ;;  %v3010_v31 = vcombine.high %v2976_v54, %v2992_v62  ;;  %6715 = vmatprep.subr.bf16.mxu0 %v6958_v18  ;;  %v6961_v37 = vld [vmem:[%s7988_s15 + $0x20] sm:$0xff]   ;;  %v6962_v54 = vld [vmem:[%s7988_s15 + $0x18] sm:$0xff]   ;;  %v6963_v12 = vld [vmem:[%s7988_s15 + $0x10] sm:$0xff]   ;;  %v4458_v62 = vpop.xlane.xlu1 %4457 }
 0x734   : > { %v3029_v63 = vcombine.low %v2933_v41, %v2940_v3  ;;  %v6239_v33 = vcombine.high %v2933_v41, %v2940_v3  ;;  %v3045_v28 = vcombine.low %v2949_v19, %v2956_v32  ;;  %v6240_v58 = vcombine.high %v2949_v19, %v2956_v32  ;;  %6716 = vmatpush3.bf16.msra.mxu0 %v6958_v18  ;;  %v4455_v41 = vpop.xlane.xlu0 %4454 }
 0x735   : > { %v3001_v5 = vrot.slane %v2993_v21, %v8109_v17  ;;  %v3008_v8 = vrot.slane %v2994_v38, %v8109_v17  ;;  %v3017_v0 = vrot.slane %v3009_v59, %v8109_v17  ;;  %v3024_v36 = vrot.slane %v3010_v31, %v8109_v17  ;;  %6717 = vmatprep.subr.bf16.mxu0 %v6959_v56 }
 0x736   : > { %v3036_v22 = vrot.slane %v3029_v63, %v8107_v10  ;;  %v3044_v23 = vrot.slane %v6239_v33, %v8107_v10  ;;  %v3052_v14 = vrot.slane %v3045_v28, %v8107_v10  ;;  %v3060_v43 = vrot.slane %v6240_v58, %v8107_v10 }
 0x737   : > { %v3097_v27 = vcombine.low %v3001_v5, %v3008_v8  ;;  %v6241_v52 = vcombine.high %v3001_v5, %v3008_v8  ;;  %v3113_v46 = vcombine.low %v3017_v0, %v3024_v36  ;;  %v6242_v30 = vcombine.high %v3017_v0, %v3024_v36 }
 0x738   : > { %v3062_v50 = vcombine.high %v3036_v22, %v3044_v23  ;;  %v3078_v25 = vcombine.high %v3052_v14, %v3060_v43  ;;  %v3061_v47 = vcombine.low %v3036_v22, %v3044_v23  ;;  %v3077_v2 = vcombine.low %v3052_v14, %v3060_v43  ;;  %6718 = vmatpush3.bf16.msra.mxu0 %v6959_v56 }
 0x739   : > { %v3104_v35 = vrot.slane %v3097_v27, %v8107_v10  ;;  %v3112_v9 = vrot.slane %v6241_v52, %v8107_v10  ;;  %v3120_v42 = vrot.slane %v3113_v46, %v8107_v10  ;;  %v3128_v55 = vrot.slane %v6242_v30, %v8107_v10  ;;  %6719 = vmatprep.subr.bf16.mxu0 %v6960_v24  ;;  %v4467_v19 = vpop.xlane.xlu0 %4466 }
 0x73a   : > { %v3076_v61 = vrot.slane %v3062_v50, %v8109_v17  ;;  %v3092_v26 = vrot.slane %v3078_v25, %v8109_v17  ;;  %v9076_v11 = vrot.slane %v3061_v47, %v8109_v17  ;;  %v3085_v1 = vrot.slane %v3077_v2, %v8109_v17 }
 0x73b   : > { %v3130_v13 = vcombine.high %v3104_v35, %v3112_v9  ;;  %v3146_v7 = vcombine.high %v3120_v42, %v3128_v55  ;;  %v3129_v53 = vcombine.low %v3104_v35, %v3112_v9  ;;  %v3145_v51 = vcombine.low %v3120_v42, %v3128_v55 }
 0x73c   : > { %v3093_v60 = vcombine.low %v9076_v11, %v3085_v1  ;;  %v3095_v6 = vcombine.low %v3076_v61, %v3092_v26  ;;  %v3094_v44 = vcombine.high %v9076_v11, %v3085_v1  ;;  %v3096_v34 = vcombine.high %v3076_v61, %v3092_v26  ;;  %6720 = vmatpush3.bf16.msra.mxu0 %v6960_v24 }
 0x73d   : > { %v3144_v29 = vrot.slane %v3130_v13, %v8109_v17  ;;  %v3160_v45 = vrot.slane %v3146_v7, %v8109_v17  ;;  %v3137_v57 = vrot.slane %v3129_v53, %v8109_v17  ;;  %v3153_v39 = vrot.slane %v3145_v51, %v8109_v17  ;;  %6721 = vmatprep.subr.bf16.mxu0 %v6961_v37  ;;  %v4470_v3 = vpop.xlane.xlu1 %4469 }
 0x73e   : > { %7166 = vrcp.f32 %v4455_v41 }
 0x73f   : > { %v3163_v16 = vcombine.low %v3144_v29, %v3160_v45  ;;  %v3162_v40 = vcombine.high %v3137_v57, %v3153_v39  ;;  %v3161_v4 = vcombine.low %v3137_v57, %v3153_v39  ;;  %v3164_v49 = vcombine.high %v3144_v29, %v3160_v45 }
 0x740   : > { %6722 = vmatpush3.bf16.msra.mxu0 %v6961_v37  ;;  %7168 = vrcp.f32 %v4467_v19 }
 0x741   : > { %v6893_v48 = vpack.i.bf16 %v3163_v16, %v3095_v6  ;;  %v6888_v15 = vpack.i.bf16 %v3162_v40, %v3094_v44  ;;  %v6898_v20 = vpack.i.bf16 %v3164_v49, %v3096_v34  ;;  %6723 = vmatprep.subr.bf16.mxu0 %v6962_v54 }
 0x743   : > { %6894 = vrot.lane.b32.xlu1 %v6893_v48, %s7641_s20  ;;  %6889 = vrot.lane.b32.xlu0 %v6888_v15, %s7642_s28 }
 0x744   : > { %6724 = vmatpush3.bf16.msra.mxu0 %v6962_v54 }
 0x745   : > { %6725 = vmatprep.subr.bf16.mxu0 %v6963_v12 }
 0x747   : > { %6899 = vrot.lane.b32.xlu1 %v6898_v20, %s7640_s21 }
 0x748   : > { %6726 = vmatpush3.bf16.msra.mxu0 %v6963_v12 }
 0x74b   : > { %v7167_v2 = vpop.eup %7166 }
 0x74d   : > { %v7169_v42 = vpop.eup %7168 }
 0x76e   : > { %v4461_v21 = vpop.xlane.xlu0 %4460 }
 0x76f   : > { %7170 = vrcp.f32 %v4461_v21 }
 0x772   : > { %v4473_v59 = vpop.xlane.xlu0 %4472 }
 0x773   : > { %7172 = vrcp.f32 %v4473_v59 }
 0x774   : > { %7174 = vrcp.f32 %v4458_v62 }
 0x775   : > { %7176 = vrcp.f32 %v4470_v3 }
 0x77b   : > { %v4464_v32 = vpop.xlane.xlu1 %4463 }
 0x77c   : > { %7178 = vrcp.f32 %v4464_v32  ;;  %v7171_v55 = vpop.eup %7170 }
 0x77f   : > { %v4476_v38 = vpop.xlane.xlu1 %4475 }
 0x780   : > { %7180 = vrcp.f32 %v4476_v38  ;;  %v7173_v11 = vpop.eup %7172 }
 0x781   : > { %v7175_v45 = vpop.eup %7174 }
 0x7b5   : > { %v6895_v31 = vpop.permute.xlu1 %6894  ;;  %v6890_v63 = vpop.permute.xlu0 %6889 }
 0x7b6   : > { %v6897_v33 = vunpack.i.h.bf16 %v6895_v31  ;;  %v6896_v28 = vunpack.i.l.bf16 %v6895_v31  ;;  %v6892_v58 = vunpack.i.h.bf16 %v6890_v63  ;;  %v6891_v5 = vunpack.i.l.bf16 %v6890_v63 }
 0x7b8   : > { %v3190_v8 = vsel %vm2294_vm0, %v3161_v4, %v6892_v58  ;;  %v3189_v0 = vsel %vm2294_vm0, %v3093_v60, %v6891_v5  ;;  %v7177_v60 = vpop.eup %7176 }
 0x7b9   : > { %v6900_v36 = vpop.permute.xlu1 %6899  ;;  %v3192_v14 = vsel %vm3191_vm3, %v3189_v0, %v6896_v28  ;;  %v3193_v43 = vsel %vm3191_vm3, %v3190_v8, %v6897_v33  ;;  %v7179_v4 = vpop.eup %7178 }
 0x7ba   : > { %v6902_v22 = vunpack.i.h.bf16 %v6900_v36  ;;  %v6901_v23 = vunpack.i.l.bf16 %v6900_v36  ;;  %v7181_v15 = vpop.eup %7180 }
 0x7bc   : > { %v3195_v27 = vsel %vm3194_vm4, %v3192_v14, %v6901_v23  ;;  %v3196_v52 = vsel %vm3194_vm4, %v3193_v43, %v6902_v22 }
 0x7bd   : > { %v4522_v46 = vpop.f32.mrf.mxu0  ;;  %v4566_v30 = vpop.f32.mrf.mxu1  ;;  %v4979_v50 = vpack.c.bf16 %v3196_v52, %v3195_v27 }
 0x7be   : > { %v4669_v1 = vmul.f32 %v7167_v2, %v4522_v46  ;;  %v4671_v53 = vmul.f32 %v7171_v55, %v4566_v30 }
 0x7bf   : > { %v6695_v25 = vpop.f32.mrf.mxu0  ;;  %v6701_v47 = vpop.f32.mrf.mxu1  ;;  %6731 = vmatprep.mubr.bf16.mxu0 %v4979_v50 }
 0x7c1   : > { %v4525_v35 = vpop.f32.mrf.mxu0  ;;  %v4569_v9 = vpop.f32.mrf.mxu1 }
 0x7c2   : > { %v4670_v24 = vmul.f32 %v7175_v45, %v4525_v35  ;;  %v4672_v37 = vmul.f32 %v7179_v4, %v4569_v9 }
 0x7c3   : > { %v6696_v61 = vpop.f32.mrf.mxu0  ;;  %v6702_v26 = vpop.f32.mrf.mxu1 }
 0x7c5   : > { %v4610_v13 = vpop.f32.mrf.mxu0  ;;  %v4654_v7 = vpop.f32.mrf.mxu1 }
 0x7c6   : > { %v4673_v51 = vmul.f32 %v7169_v42, %v4610_v13  ;;  %v4675_v29 = vmul.f32 %v7173_v11, %v4654_v7 }
 0x7c7   : > { %v6707_v57 = vpop.f32.mrf.mxu0  ;;  %v6713_v39 = vpop.f32.mrf.mxu1 }
 0x7c8   : > { %v4677_v6 = vcombine.low %v4669_v1, %v4673_v51  ;;  %v4678_v16 = vcombine.high %v4669_v1, %v4673_v51  ;;  %v4693_v44 = vcombine.low %v4671_v53, %v4675_v29  ;;  %v4694_v40 = vcombine.high %v4671_v53, %v4675_v29 }
 0x7c9   : > { %v4613_v48 = vpop.f32.mrf.mxu0  ;;  %v4657_v49 = vpop.f32.mrf.mxu1 }
 0x7ca   : > { %v4685_v34 = vrot.slane %v4677_v6, %v8107_v10  ;;  %v4692_v20 = vrot.slane %v4678_v16, %v8107_v10  ;;  %v4701_v18 = vrot.slane %v4693_v44, %v8107_v10  ;;  %v4708_v56 = vrot.slane %v4694_v40, %v8107_v10  ;;  %v6964_v44 = vld [vmem:[%s7988_s15 + $0x8] sm:$0xff]  }
 0x7cb   : > { %v4674_v54 = vmul.f32 %v7177_v60, %v4613_v48  ;;  %v4676_v12 = vmul.f32 %v7181_v15, %v4657_v49  ;;  %v6708_v62 = vpop.f32.mrf.mxu0  ;;  %v6714_v41 = vpop.f32.mrf.mxu1  ;;  %6727 = vmatprep.subr.bf16.mxu0 %v6964_v44 }
 0x7cc   : > { %v4709_v3 = vcombine.low %v4685_v34, %v4701_v18  ;;  %v4710_v19 = vcombine.high %v4685_v34, %v4701_v18  ;;  %v4725_v32 = vcombine.low %v4692_v20, %v4708_v56  ;;  %v4726_v21 = vcombine.high %v4692_v20, %v4708_v56  ;;  %6728 = vmatpush3.bf16.msra.mxu0 %v6964_v44  ;;  %v6980_v44 = vld [vmem:[%s7990_s18 + $0xa4] ss:$16 sps:$4 sm:$0xff]  }
 0x7cd   : > { %v4745_v38 = vcombine.low %v4670_v24, %v4674_v54  ;;  %v4746_v59 = vcombine.high %v4670_v24, %v4674_v54  ;;  %v4761_v31 = vcombine.low %v4672_v37, %v4676_v12  ;;  %v4762_v63 = vcombine.high %v4672_v37, %v4676_v12  ;;  %v6965_v37 = vld [vmem:[%s7988_s15] sm:$0xff]  }
 0x7ce   : > { %v4717_v33 = vrot.slane %v4709_v3, %v8109_v17  ;;  %v4724_v28 = vrot.slane %v4710_v19, %v8109_v17  ;;  %v4733_v58 = vrot.slane %v4725_v32, %v8109_v17  ;;  %v4740_v5 = vrot.slane %v4726_v21, %v8109_v17  ;;  %6729 = vmatprep.subr.bf16.mxu0 %v6965_v37 }
 0x7cf   : > { %v4753_v8 = vrot.slane %v4745_v38, %v8107_v10  ;;  %v4760_v0 = vrot.slane %v4746_v59, %v8107_v10  ;;  %v4769_v36 = vrot.slane %v4761_v31, %v8107_v10  ;;  %v4776_v22 = vrot.slane %v4762_v63, %v8107_v10 }
 0x7d0   : > { %v4813_v23 = vcombine.low %v4717_v33, %v4724_v28  ;;  %v6263_v14 = vcombine.high %v4717_v33, %v4724_v28  ;;  %v4829_v43 = vcombine.low %v4733_v58, %v4740_v5  ;;  %v6264_v27 = vcombine.high %v4733_v58, %v4740_v5  ;;  %6730 = vmatpush3.bf16.msra.mxu0 %v6965_v37  ;;  %v7001_v37 = vld [vmem:[%s7990_s18 + $0x4c] ss:$16 sps:$4 sm:$0xff]  }
 0x7d1   : > { %v4777_v52 = vcombine.low %v4753_v8, %v4769_v36  ;;  %v4778_v46 = vcombine.high %v4753_v8, %v4769_v36  ;;  %v4793_v30 = vcombine.low %v4760_v0, %v4776_v22  ;;  %v4794_v50 = vcombine.high %v4760_v0, %v4776_v22 }
 0x7d2   : > { %v4820_v25 = vrot.slane %v4813_v23, %v8107_v10  ;;  %v4828_v47 = vrot.slane %v6263_v14, %v8107_v10  ;;  %v4836_v2 = vrot.slane %v4829_v43, %v8107_v10  ;;  %v4844_v35 = vrot.slane %v6264_v27, %v8107_v10 }
 0x7d3   : > { %v4785_v9 = vrot.slane %v4777_v52, %v8109_v17  ;;  %v4792_v42 = vrot.slane %v4778_v46, %v8109_v17  ;;  %v4801_v55 = vrot.slane %v4793_v30, %v8109_v17  ;;  %v4808_v61 = vrot.slane %v4794_v50, %v8109_v17  ;;  %v6966_v46 = vld [vmem:[%s7990_s18 + $0xe0] ss:$16 sps:$4 sm:$0xff]   ;;  %v6968_v30 = vld [vmem:[%s7990_s18 + $0xe4] ss:$16 sps:$4 sm:$0xff]   ;;  %v6969_v50 = vld [vmem:[%s7990_s18 + $0xe8] ss:$16 sps:$4 sm:$0xff]  }
 0x7d4   : > { %v4846_v26 = vcombine.high %v4820_v25, %v4828_v47  ;;  %v4862_v11 = vcombine.high %v4836_v2, %v4844_v35  ;;  %v4845_v13 = vcombine.low %v4820_v25, %v4828_v47  ;;  %v4861_v7 = vcombine.low %v4836_v2, %v4844_v35  ;;  %v6971_v25 = vld [vmem:[%s7990_s18 + $0xec] ss:$16 sps:$4 sm:$0xff]   ;;  %v6974_v47 = vld [vmem:[%s7990_s18 + $0xc4] ss:$16 sps:$4 sm:$0xff]   ;;  %5320 = vmatprep.subr.bf16.mxu1 %v6968_v30  ;;  %v6972_v35 = vld [vmem:[%s7990_s18 + $0xc0] ss:$16 sps:$4 sm:$0xff]  }
 0x7d5   : > { %v4881_v1 = vcombine.low %v4785_v9, %v4792_v42  ;;  %v6265_v53 = vcombine.high %v4785_v9, %v4792_v42  ;;  %v4897_v51 = vcombine.low %v4801_v55, %v4808_v61  ;;  %v6266_v29 = vcombine.high %v4801_v55, %v4808_v61  ;;  %v6977_v2 = vld [vmem:[%s7990_s18 + $0xcc] ss:$16 sps:$4 sm:$0xff]   ;;  %5373 = vmatprep.subr.bf16.mxu0 %v6971_v25  ;;  %v6975_v9 = vld [vmem:[%s7990_s18 + $0xc8] ss:$16 sps:$4 sm:$0xff]   ;;  %v7190_v61 = vld [vmem:[#allocation2 + $0x10] sm:$0xff] }
 0x7d6   : > { %v4853_v45 = vrot.slane %v4845_v13, %v8109_v17  ;;  %v4869_v57 = vrot.slane %v4861_v7, %v8109_v17  ;;  %v4860_v40 = vrot.slane %v4846_v26, %v8109_v17  ;;  %v4876_v4 = vrot.slane %v4862_v11, %v8109_v17  ;;  %5321 = vmatpush1.bf16.msra.mxu1 %v6966_v46  ;;  %v7191_v13 = vld [vmem:[#allocation2 + $0x18] sm:$0xff] }
 0x7d7   : > { %v4888_v39 = vrot.slane %v4881_v1, %v8107_v10  ;;  %v4896_v60 = vrot.slane %v6265_v53, %v8107_v10  ;;  %v4904_v6 = vrot.slane %v4897_v51, %v8107_v10  ;;  %v4912_v16 = vrot.slane %v6266_v29, %v8107_v10  ;;  %5322 = vmatprep.subr.bf16.mxu1 %v6974_v47  ;;  %v7192_v51 = vld [vmem:[#allocation2] sm:$0xff]  ;;  %v7016_v47 = vld [vmem:[%s7992_s22 + $0x38] sm:$0xff]  }
 0x7d8   : > { %v4877_v48 = vcombine.low %v4853_v45, %v4869_v57  ;;  %v4879_v54 = vcombine.low %v4860_v40, %v4876_v4  ;;  %v4878_v62 = vcombine.high %v4853_v45, %v4869_v57  ;;  %v4880_v38 = vcombine.high %v4860_v40, %v4876_v4  ;;  %v7193_v45 = vld [vmem:[#allocation2 + $0x8] sm:$0xff] }
 0x7d9   : > { %v4914_v49 = vcombine.high %v4888_v39, %v4896_v60  ;;  %v4930_v15 = vcombine.high %v4904_v6, %v4912_v16  ;;  %v4913_v34 = vcombine.low %v4888_v39, %v4896_v60  ;;  %v4929_v20 = vcombine.low %v4904_v6, %v4912_v16  ;;  %v6978_v16 = vld [vmem:[%s7990_s18 + $0xa0] ss:$16 sps:$4 sm:$0xff]   ;;  %v6981_v40 = vld [vmem:[%s7990_s18 + $0xa8] ss:$16 sps:$4 sm:$0xff]   ;;  %v6983_v4 = vld [vmem:[%s7990_s18 + $0xac] ss:$16 sps:$4 sm:$0xff]  }
 0x7da   : > { %5323 = vmatpush1.bf16.msra.mxu1 %v6972_v35 }
 0x7db   : > { %v4928_v18 = vrot.slane %v4914_v49, %v8109_v17  ;;  %v4944_v56 = vrot.slane %v4930_v15, %v8109_v17  ;;  %v4921_v24 = vrot.slane %v4913_v34, %v8109_v17  ;;  %v4937_v10 = vrot.slane %v4929_v20, %v8109_v17  ;;  %5324 = vmatprep.subr.bf16.mxu1 %v6980_v44  ;;  %v6986_v49 = vld [vmem:[%s7990_s18 + $0x84] ss:$16 sps:$4 sm:$0xff]   ;;  %v6987_v15 = vld [vmem:[%s7990_s18 + $0x88] ss:$16 sps:$4 sm:$0xff]   ;;  %v6989_v34 = vld [vmem:[%s7990_s18 + $0x8c] ss:$16 sps:$4 sm:$0xff]  }
 0x7dc   : > { %v6990_v20 = vld [vmem:[%s7990_s18 + $0x60] ss:$16 sps:$4 sm:$0xff]  }
 0x7dd   : > { %v4947_v12 = vcombine.low %v4928_v18, %v4944_v56  ;;  %v4946_v41 = vcombine.high %v4921_v24, %v4937_v10  ;;  %v4945_v3 = vcombine.low %v4921_v24, %v4937_v10  ;;  %v4948_v21 = vcombine.high %v4928_v18, %v4944_v56  ;;  %v6992_v18 = vld [vmem:[%s7990_s18 + $0x64] ss:$16 sps:$4 sm:$0xff]   ;;  %v6993_v56 = vld [vmem:[%s7990_s18 + $0x68] ss:$16 sps:$4 sm:$0xff]   ;;  %v6995_v24 = vld [vmem:[%s7990_s18 + $0x6c] ss:$16 sps:$4 sm:$0xff]  }
 0x7de   : > { %5325 = vmatpush1.bf16.msra.mxu1 %v6978_v16  ;;  %v6998_v10 = vld [vmem:[%s7990_s18 + $0x44] ss:$16 sps:$4 sm:$0xff]  }
 0x7df   : > { %v6908_v19 = vpack.i.bf16 %v4947_v12, %v4879_v54  ;;  %v6903_v32 = vpack.i.bf16 %v4946_v41, %v4878_v62  ;;  %v6913_v59 = vpack.i.bf16 %v4948_v21, %v4880_v38  ;;  %5326 = vmatprep.subr.bf16.mxu1 %v6986_v49  ;;  %v6996_v54 = vld [vmem:[%s7990_s18 + $0x40] ss:$16 sps:$4 sm:$0xff]   ;;  %v6999_v12 = vld [vmem:[%s7990_s18 + $0x48] ss:$16 sps:$4 sm:$0xff]   ;;  %v7004_v62 = vld [vmem:[%s7990_s18 + $0x24] ss:$16 sps:$4 sm:$0xff]  }
 0x7e0   : > { %v7007_v41 = vld [vmem:[%s7990_s18 + $0x2c] ss:$16 sps:$4 sm:$0xff]   ;;  %v7010_v21 = vld [vmem:[%s7990_s18 + $0x4] ss:$16 sps:$4 sm:$0xff]  }
 0x7e1   : > { %6909 = vrot.lane.b32.xlu0 %v6908_v19, %s7641_s20  ;;  %6904 = vrot.lane.b32.xlu1 %v6903_v32, %s7642_s28  ;;  %v7002_v19 = vld [vmem:[%s7990_s18 + $0x20] ss:$16 sps:$4 sm:$0xff]   ;;  %v7005_v32 = vld [vmem:[%s7990_s18 + $0x28] ss:$16 sps:$4 sm:$0xff]  }
 0x7e2   : > { %v7013_v38 = vld [vmem:[%s7990_s18 + $0xc] ss:$16 sps:$4 sm:$0xff]   ;;  %v7027_v16 = vld [vmem:[%s7992_s22 + $0xe0] sm:$0xff]  }
 0x7e3   : > { %v7028_v44 = vld [vmem:[%s7992_s22 + $0x20] sm:$0xff]   ;;  %v7032_v49 = vld [vmem:[%s7992_s22 + $0x18] sm:$0xff]  }
 0x7e5   : > { %6914 = vrot.lane.b32.xlu1 %v6913_v59, %s7640_s21  ;;  %v7008_v59 = vld [vmem:[%s7990_s18] ss:$16 sps:$4 sm:$0xff]  }
 0x853   : > { %v6905_v17 = vpop.permute.xlu1 %6904  ;;  %v6910_v31 = vpop.permute.xlu0 %6909 }
 0x854   : > { %v6907_v63 = vunpack.i.h.bf16 %v6905_v17  ;;  %v6906_v33 = vunpack.i.l.bf16 %v6905_v17  ;;  %v6912_v28 = vunpack.i.h.bf16 %v6910_v31  ;;  %v6911_v58 = vunpack.i.l.bf16 %v6910_v31  ;;  %v7011_v17 = vld [vmem:[%s7990_s18 + $0x8] ss:$16 sps:$4 sm:$0xff]  }
 0x855   : > { %v7014_v31 = vld [vmem:[%s7992_s22 + $0x78] sm:$0xff]  }
 0x856   : > { %v4974_v5 = vsel %vm2294_vm0, %v4945_v3, %v6907_v63  ;;  %v4973_v8 = vsel %vm2294_vm0, %v4877_v48, %v6906_v33  ;;  %v6984_v48 = vld [vmem:[%s7990_s18 + $0x80] ss:$16 sps:$4 sm:$0xff]   ;;  %v7647_v3 = vmov 0   ;;  %v7015_v63 = vld [vmem:[%s7992_s22 + $0xf8] sm:$0xff]  }
 0x857   : > { %v6915_v0 = vpop.permute.xlu1 %6914  ;;  %v4976_v23 = vsel %vm3191_vm3, %v4974_v5, %v6912_v28  ;;  %v4975_v14 = vsel %vm3191_vm3, %v4973_v8, %v6911_v58  ;;  %5327 = vmatpush1.bf16.msra.mxu1 %v6984_v48  ;;  %5352 = vmatprep.mubr.bf16.mxu1 %v7647_v3  ;;  %v7031_v48 = vld [vmem:[%s7992_s22 + $0xd8] sm:$0xff]  }
 0x858   : > { %v6917_v36 = vunpack.i.h.bf16 %v6915_v0  ;;  %v6916_v22 = vunpack.i.l.bf16 %v6915_v0  ;;  %5328 = vmatprep.subr.bf16.mxu1 %v6992_v18  ;;  %v7036_v18 = vld [vmem:[%s7992_s22 + $0x10] sm:$0xff]  }
 0x85a   : > { %v4977_v43 = vsel %vm3194_vm4, %v4975_v14, %v6916_v22  ;;  %v4978_v27 = vsel %vm3194_vm4, %v4976_v23, %v6917_v36 }
 0x85b   : > { %v4980_v52 = vpack.c.bf16 %v4978_v27, %v4977_v43  ;;  %5329 = vmatpush1.bf16.msra.mxu1 %v6990_v20  ;;  %v7035_v20 = vld [vmem:[%s7992_s22 + $0xd0] sm:$0xff]  }
 0x85c   : > { %5330 = vmatprep.subr.bf16.mxu1 %v6998_v10  ;;  %v7039_v10 = vld [vmem:[%s7992_s22 + $0xc8] sm:$0xff]  }
 0x85d   : > { %6732 = vmatmul.mubr.bf16.vlgmr.msra.gmra.mxu0 %v4980_v52 }
 0x85e   : > { %5374 = vmatpush1.bf16.msra.mxu0 %v6969_v50  ;;  %5405 = vmatprep.mubr.bf16.mxu0 %v7647_v3 }
 0x85f   : > { %5375 = vmatprep.subr.bf16.mxu0 %v6977_v2  ;;  %5331 = vmatpush1.bf16.msra.mxu1 %v6996_v54  ;;  %v7017_v2 = vld [vmem:[%s7992_s22 + $0xb8] sm:$0xff]   ;;  %v7041_v54 = vld [vmem:[%s7992_s22 + $0x88] sm:$0xff]  }
 0x860   : > { %5332 = vmatprep.subr.bf16.mxu1 %v7004_v62  ;;  %v7043_v62 = vld [vmem:[%s7992_s22 + $0xc0] sm:$0xff]  }
 0x862   : > { %5376 = vmatpush1.bf16.msra.mxu0 %v6975_v9  ;;  %v7018_v9 = vld [vmem:[%s7992_s22 + $0x70] sm:$0xff]  }
 0x863   : > { %5377 = vmatprep.subr.bf16.mxu0 %v6983_v4  ;;  %5333 = vmatpush1.bf16.msra.mxu1 %v7002_v19  ;;  %v7030_v4 = vld [vmem:[%s7992_s22 + $0x58] sm:$0xff]  }
 0x864   : > { %5334 = vmatprep.subr.bf16.mxu1 %v7010_v21 }
 0x866   : > { %5378 = vmatpush1.bf16.msra.mxu0 %v6981_v40  ;;  %v7029_v40 = vld [vmem:[%s7992_s22 + $0xa0] sm:$0xff]  }
 0x867   : > { %5379 = vmatprep.subr.bf16.mxu0 %v6989_v34  ;;  %5335 = vmatpush1.bf16.msra.mxu1 %v7008_v59  ;;  %v7034_v34 = vld [vmem:[%s7992_s22 + $0x50] sm:$0xff]  }
 0x868   : > { %6463 = vmatprep.subr.bf16.mxu1 %v7014_v31 }
 0x86a   : > { %5380 = vmatpush1.bf16.msra.mxu0 %v6987_v15  ;;  %v7033_v15 = vld [vmem:[%s7992_s22 + $0x98] sm:$0xff]  }
 0x86b   : > { %5381 = vmatprep.subr.bf16.mxu0 %v6995_v24  ;;  %v7038_v24 = vld [vmem:[%s7992_s22 + $0x48] sm:$0xff]  }
 0x86e   : > { %5382 = vmatpush1.bf16.msra.mxu0 %v6993_v56  ;;  %v7037_v56 = vld [vmem:[%s7992_s22 + $0x90] sm:$0xff]  }
 0x86f   : > { %5383 = vmatprep.subr.bf16.mxu0 %v7001_v37  ;;  %v7040_v37 = vld [vmem:[%s7992_s22 + $0x8] sm:$0xff]  }
 0x872   : > { %5384 = vmatpush1.bf16.msra.mxu0 %v6999_v12  ;;  %v7042_v12 = vld [vmem:[%s7992_s22 + $0x40] sm:$0xff]  }
 0x873   : > { %5385 = vmatprep.subr.bf16.mxu0 %v7007_v41  ;;  %v7044_v41 = vld [vmem:[%s7992_s22] sm:$0xff]  }
 0x876   : > { %5386 = vmatpush1.bf16.msra.mxu0 %v7005_v32 }
 0x877   : > { %5387 = vmatprep.subr.bf16.mxu0 %v7013_v38 }
 0x87a   : > { %5388 = vmatpush1.bf16.msra.mxu0 %v7011_v17 }
 0x87b   : > { %6491 = vmatprep.subr.bf16.mxu0 %v7015_v63 }
 0x91d   : > { %v6733_v42 = vpop.f32.mrf.mxu0 }
 0x91e   : > { %v9153_v7 = vadd.f32 %v7191_v13, %v6733_v42  ;;  %v7019_v42 = vld [vmem:[%s7992_s22 + $0xf0] sm:$0xff]  }
 0x91f   : > { %v5079_v55 = vpop.f32.mrf.mxu0  ;;  %v7021_v13 = vld [vmem:[%s7992_s22 + $0xb0] sm:$0xff]  }
 0x920   : > { %v9151_v26 = vadd.f32 %v7190_v61, %v5079_v55  ;;  %v5100_v39 = vmul.f32 %v9153_v7, %v9153_v7 }
 0x921   : > { %v6734_v11 = vpop.f32.mrf.mxu0 }
 0x922   : > { %v5098_v1 = vmul.f32 %v9151_v26, %v9151_v26  ;;  %v9159_v57 = vadd.f32 %v7193_v45, %v6734_v11  ;;  %v7020_v11 = vld [vmem:[%s7992_s22 + $0x30] sm:$0xff]  }
 0x923   : > { %v5082_v53 = vpop.f32.mrf.mxu0 }
 0x924   : > { %v9157_v29 = vadd.f32 %v7192_v51, %v5082_v53  ;;  %5102 = vadd.xlane.f32.xlu0 %v5098_v1  ;;  %v5101_v6 = vmul.f32 %v9159_v57, %v9159_v57  ;;  %v7022_v1 = vld [vmem:[%s7992_s22 + $0x68] sm:$0xff]  }
 0x925   : > { %v7023_v53 = vld [vmem:[%s7992_s22 + $0xe8] sm:$0xff]  }
 0x926   : > { %v5099_v60 = vmul.f32 %v9157_v29, %v9157_v29 }
 0x928   : > { %5106 = vadd.xlane.f32.xlu0 %v5100_v39  ;;  %5104 = vadd.xlane.f32.xlu1 %v5099_v60  ;;  %v7024_v39 = vld [vmem:[%s7992_s22 + $0x28] sm:$0xff]  }
 0x929   : > { %v7025_v60 = vld [vmem:[%s7992_s22 + $0xa8] sm:$0xff]  }
 0x92c   : > { %5108 = vadd.xlane.f32.xlu0 %v5101_v6  ;;  %v7026_v6 = vld [vmem:[%s7992_s22 + $0x60] sm:$0xff]  }
 0x9ad   : > { %v5103_v33 = vpop.xlane.xlu0 %5102 }
 0x9ae   : > { %v5110_v28 = vmul.f32 0.0078125, %v5103_v33 }
 0x9b0   : > { %v5114_v58 = vadd.f32 1.1920929e-07, %v5110_v28 }
 0x9b1   : > { %v5107_v5 = vpop.xlane.xlu0 %5106  ;;  %v5105_v8 = vpop.xlane.xlu1 %5104 }
 0x9b2   : > { %v5111_v0 = vmul.f32 0.0078125, %v5105_v8  ;;  %7182 = vrsqrt.f32 %v5114_v58  ;;  %v5112_v22 = vmul.f32 0.0078125, %v5107_v5 }
 0x9b4   : > { %v5115_v36 = vadd.f32 1.1920929e-07, %v5111_v0  ;;  %v5116_v27 = vadd.f32 1.1920929e-07, %v5112_v22 }
 0x9b5   : > { %v5109_v23 = vpop.xlane.xlu0 %5108 }
 0x9b6   : > { %v5113_v14 = vmul.f32 0.0078125, %v5109_v23  ;;  %7184 = vrsqrt.f32 %v5115_v36 }
 0x9b8   : > { %v5117_v43 = vadd.f32 1.1920929e-07, %v5113_v14 }
 0x9ba   : > { %7186 = vrsqrt.f32 %v5117_v43 }
 0x9bb   : > { %7188 = vrsqrt.f32 %v5116_v27 }
 0x9bf   : > { %v7183_v52 = vpop.eup %7182 }
 0x9c0   : > { %v5122_v30 = vmul.f32 %v7183_v52, %v9151_v26 }
 0x9c3   : > { %v7185_v46 = vpop.eup %7184 }
 0x9c4   : > { %v5123_v50 = vmul.f32 %v7185_v46, %v9157_v29 }
 0x9c6   : > { %v5126_v25 = vpack.c.bf16 %v5123_v50, %v5122_v30 }
 0x9c7   : > { %v7187_v35 = vpop.eup %7186 }
 0x9c8   : > { %5353 = vmatmul.mubr.bf16.vlgmr.msra.gmra.mxu1 %v5126_v25  ;;  %5406 = vmatmul.mubr.bf16.vlgmr.msra.gmra.mxu0 %v5126_v25  ;;  %v7189_v55 = vpop.eup %7188  ;;  %v5125_v61 = vmul.f32 %v7187_v35, %v9159_v57 }
 0x9c9   : > { %5362 = vmatprep.mubr.bf16.mxu1 %v7647_v3  ;;  %5415 = vmatprep.mubr.bf16.mxu0 %v7647_v3  ;;  %v5124_v51 = vmul.f32 %v7189_v55, %v9153_v7  ;;  %v7045_v3 = vld [vmem:[%s7992_s22 + $0x80] sm:$0xff]  }
 0x9ca   : > { %6464 = vmatpush3.bf16.msra.mxu1 %v7016_v47  ;;  %6492 = vmatpush3.bf16.msra.mxu0 %v7017_v2 }
 0x9cb   : > { %6465 = vmatprep.subr.bf16.mxu1 %v7018_v9  ;;  %6493 = vmatprep.subr.bf16.mxu0 %v7019_v42  ;;  %v5127_v45 = vpack.c.bf16 %v5125_v61, %v5124_v51 }
 0x9ce   : > { %6466 = vmatpush3.bf16.msra.mxu1 %v7020_v11  ;;  %6494 = vmatpush3.bf16.msra.mxu0 %v7021_v13 }
 0x9cf   : > { %6467 = vmatprep.subr.bf16.mxu1 %v7022_v1  ;;  %6495 = vmatprep.subr.bf16.mxu0 %v7023_v53 }
 0x9d0   : > { %5363 = vmatmul.mubr.bf16.gmra.mxu1 %v5127_v45  ;;  %5416 = vmatmul.mubr.bf16.gmra.mxu0 %v5127_v45 }
 0x9d2   : > { %6468 = vmatpush3.bf16.msra.mxu1 %v7024_v39  ;;  %6496 = vmatpush3.bf16.msra.mxu0 %v7025_v60 }
 0x9d3   : > { %6469 = vmatprep.subr.bf16.mxu1 %v7026_v6  ;;  %6497 = vmatprep.subr.bf16.mxu0 %v7027_v16 }
 0x9d6   : > { %6470 = vmatpush3.bf16.msra.mxu1 %v7028_v44  ;;  %6498 = vmatpush3.bf16.msra.mxu0 %v7029_v40 }
 0x9d7   : > { %6471 = vmatprep.subr.bf16.mxu1 %v7030_v4  ;;  %6499 = vmatprep.subr.bf16.mxu0 %v7031_v48 }
 0x9da   : > { %6472 = vmatpush3.bf16.msra.mxu1 %v7032_v49  ;;  %6500 = vmatpush3.bf16.msra.mxu0 %v7033_v15 }
 0x9db   : > { %6473 = vmatprep.subr.bf16.mxu1 %v7034_v34  ;;  %6501 = vmatprep.subr.bf16.mxu0 %v7035_v20 }
 0x9de   : > { %6474 = vmatpush3.bf16.msra.mxu1 %v7036_v18  ;;  %6502 = vmatpush3.bf16.msra.mxu0 %v7037_v56 }
 0x9df   : > { %6475 = vmatprep.subr.bf16.mxu1 %v7038_v24  ;;  %6503 = vmatprep.subr.bf16.mxu0 %v7039_v10 }
 0x9e2   : > { %6476 = vmatpush3.bf16.msra.mxu1 %v7040_v37  ;;  %6504 = vmatpush3.bf16.msra.mxu0 %v7041_v54 }
 0x9e3   : > { %6477 = vmatprep.subr.bf16.mxu1 %v7042_v12  ;;  %6505 = vmatprep.subr.bf16.mxu0 %v7043_v62 }
 0x9e6   : > { %6478 = vmatpush3.bf16.msra.mxu1 %v7044_v41  ;;  %6506 = vmatpush3.bf16.msra.mxu0 %v7045_v3 }
 0xa88   : > { %v5354_v19 = vpop.f32.mrf.mxu1  ;;  %v5407_v32 = vpop.f32.mrf.mxu0 }
 0xa89   : > { %v5426_v58 = vmax.f32 %v5354_v19, 0.0  ;;  %v5428_v5 = vmax.f32 %v5407_v32, 0.0 }
 0xa8a   : > { %v5356_v21 = vpop.f32.mrf.mxu1  ;;  %v5409_v38 = vpop.f32.mrf.mxu0 }
 0xa8b   : > { %v5427_v31 = vmax.f32 %v5356_v21, 0.0  ;;  %v5429_v63 = vmax.f32 %v5409_v38, 0.0  ;;  %v5442_v25 = vmul.f32 %v5426_v58, %v5426_v58  ;;  %v5444_v47 = vmul.f32 %v5428_v5, %v5428_v5 }
 0xa8c   : > { %v5358_v59 = vpop.f32.mrf.mxu1  ;;  %v5411_v17 = vpop.f32.mrf.mxu0 }
 0xa8d   : > { %v5430_v33 = vmax.f32 %v5358_v59, 0.0  ;;  %v5432_v28 = vmax.f32 %v5411_v17, 0.0  ;;  %v5443_v52 = vmul.f32 %v5427_v31, %v5427_v31  ;;  %v5445_v46 = vmul.f32 %v5429_v63, %v5429_v63 }
 0xa8e   : > { %v5360_v8 = vpop.f32.mrf.mxu1  ;;  %v5413_v0 = vpop.f32.mrf.mxu0 }
 0xa8f   : > { %v5431_v36 = vmax.f32 %v5360_v8, 0.0  ;;  %v5433_v22 = vmax.f32 %v5413_v0, 0.0  ;;  %v5446_v23 = vmul.f32 %v5430_v33, %v5430_v33  ;;  %v5448_v14 = vmul.f32 %v5432_v28, %v5432_v28 }
 0xa90   : > { %v5364_v43 = vpop.f32.mrf.mxu1  ;;  %v5417_v27 = vpop.f32.mrf.mxu0 }
 0xa91   : > { %v5447_v30 = vmul.f32 %v5431_v36, %v5431_v36  ;;  %v5449_v50 = vmul.f32 %v5433_v22, %v5433_v22  ;;  %v5458_v55 = vpack.c.bf16 %v5446_v23, %v5442_v25  ;;  %v5460_v61 = vpack.c.bf16 %v5448_v14, %v5444_v47 }
 0xa92   : > { %v5366_v2 = vpop.f32.mrf.mxu1  ;;  %v5419_v35 = vpop.f32.mrf.mxu0  ;;  %v5434_v39 = vmax.f32 %v5364_v43, 0.0  ;;  %v5436_v60 = vmax.f32 %v5417_v27, 0.0 }
 0xa93   : > { %v5459_v9 = vpack.c.bf16 %v5447_v30, %v5443_v52  ;;  %v5461_v42 = vpack.c.bf16 %v5449_v50, %v5445_v46  ;;  %v5435_v1 = vmax.f32 %v5366_v2, 0.0  ;;  %v5437_v53 = vmax.f32 %v5419_v35, 0.0 }
 0xa94   : > { %v5368_v11 = vpop.f32.mrf.mxu1  ;;  %v5421_v13 = vpop.f32.mrf.mxu0  ;;  %v5450_v18 = vmul.f32 %v5434_v39, %v5434_v39  ;;  %v5452_v56 = vmul.f32 %v5436_v60, %v5436_v60 }
 0xa95   : > { %v5438_v51 = vmax.f32 %v5368_v11, 0.0  ;;  %v5440_v45 = vmax.f32 %v5421_v13, 0.0  ;;  %5754 = vmatprep.mubr.bf16.mxu1 %v5459_v9  ;;  %5803 = vmatprep.mubr.bf16.mxu0 %v5461_v42  ;;  %v5451_v49 = vmul.f32 %v5435_v1, %v5435_v1  ;;  %v5453_v15 = vmul.f32 %v5437_v53, %v5437_v53 }
 0xa96   : > { %v5370_v6 = vpop.f32.mrf.mxu1  ;;  %v5423_v16 = vpop.f32.mrf.mxu0  ;;  %5755 = vmatmul.mubr.bf16.vlgmr.msra.gmra.mxu1 %v5458_v55  ;;  %5804 = vmatmul.mubr.bf16.vlgmr.msra.gmra.mxu0 %v5460_v61 }
 0xa97   : > { %v5439_v44 = vmax.f32 %v5370_v6, 0.0  ;;  %v5441_v40 = vmax.f32 %v5423_v16, 0.0  ;;  %v5454_v4 = vmul.f32 %v5438_v51, %v5438_v51  ;;  %v5456_v48 = vmul.f32 %v5440_v45, %v5440_v45 }
 0xa99   : > { %v5455_v34 = vmul.f32 %v5439_v44, %v5439_v44  ;;  %v5457_v20 = vmul.f32 %v5441_v40, %v5441_v40  ;;  %v5462_v37 = vpack.c.bf16 %v5454_v4, %v5450_v18  ;;  %v5464_v54 = vpack.c.bf16 %v5456_v48, %v5452_v56 }
 0xa9b   : > { %v5463_v24 = vpack.c.bf16 %v5455_v34, %v5451_v49  ;;  %v5465_v10 = vpack.c.bf16 %v5457_v20, %v5453_v15 }
 0xa9d   : > { %5762 = vmatprep.mubr.bf16.mxu1 %v5463_v24  ;;  %5811 = vmatprep.mubr.bf16.mxu0 %v5465_v10 }
 0xa9e   : > { %5763 = vmatmul.mubr.bf16.gmra.mxu1 %v5462_v37  ;;  %5812 = vmatmul.mubr.bf16.gmra.mxu0 %v5464_v54 }
 0xb56   : > { %v6479_v12 = vpop.f32.mrf.mxu1  ;;  %v6507_v62 = vpop.f32.mrf.mxu0 }
 0xb58   : > { %v6480_v41 = vpop.f32.mrf.mxu1  ;;  %v6508_v3 = vpop.f32.mrf.mxu0 }
 0xb59   : > { %v6481_v19 = vadd.f32 %v6480_v41, %v6479_v12  ;;  %v6509_v32 = vadd.f32 %v6508_v3, %v6507_v62 }
 0xb5a   : > { %v6482_v21 = vpop.f32.mrf.mxu1  ;;  %v6510_v38 = vpop.f32.mrf.mxu0 }
 0xb5b   : > { %v5806_v59 = vadd.f32 %v6509_v32, %v6481_v19 }
 0xb5c   : > { %v6483_v17 = vpop.f32.mrf.mxu1  ;;  %v6511_v31 = vpop.f32.mrf.mxu0 }
 0xb5d   : > { %v5820_v63 = vadd.f32 %v5806_v59, %v9151_v26  ;;  %v6484_v33 = vadd.f32 %v6483_v17, %v6482_v21  ;;  %v6512_v28 = vadd.f32 %v6511_v31, %v6510_v38 }
 0xb5e   : > { %v6485_v58 = vpop.f32.mrf.mxu1  ;;  %v6513_v5 = vpop.f32.mrf.mxu0 }
 0xb5f   : > { %5824 = vst [vmem:[#allocation2 + $0x10] sm:$0xff] %v5820_v63  ;;  %v5809_v8 = vadd.f32 %v6512_v28, %v6484_v33 }
 0xb60   : > { %v6486_v0 = vpop.f32.mrf.mxu1  ;;  %v6514_v36 = vpop.f32.mrf.mxu0 }
 0xb61   : > { %v5821_v22 = vadd.f32 %v5809_v8, %v9157_v29  ;;  %v6487_v23 = vadd.f32 %v6486_v0, %v6485_v58  ;;  %v6515_v14 = vadd.f32 %v6514_v36, %v6513_v5 }
 0xb62   : > { %v6488_v43 = vpop.f32.mrf.mxu1  ;;  %v6516_v27 = vpop.f32.mrf.mxu0 }
 0xb63   : > { %5825 = vst [vmem:[#allocation2] sm:$0xff] %v5821_v22  ;;  %v5814_v52 = vadd.f32 %v6515_v14, %v6487_v23 }
 0xb64   : > { %v6489_v46 = vpop.f32.mrf.mxu1  ;;  %v6517_v30 = vpop.f32.mrf.mxu0 }
 0xb65   : > { %v5822_v26 = vadd.f32 %v5814_v52, %v9153_v7  ;;  %v6490_v50 = vadd.f32 %v6489_v46, %v6488_v43  ;;  %v6518_v25 = vadd.f32 %v6517_v30, %v6516_v27 }
 0xb67   : > { %5826 = vst [vmem:[#allocation2 + $0x18] sm:$0xff] %v5822_v26  ;;  %v5817_v47 = vadd.f32 %v6518_v25, %v6490_v50  ;;  %5831 = sbr.rel (%p6339_p13) target bundleno = 3092 (0xc14), region = 124 }
 0xb69   : > { %v5823_v2 = vadd.f32 %v5817_v47, %v9159_v57 }
 0xb6b   : > { %5827 = vst [vmem:[#allocation2 + $0x8] sm:$0xff] %v5823_v2 }
 0xb6c   : > { %v5834_v29 = vmul.f32 %v5822_v26, %v5822_v26  ;;  %v5832_v35 = vmul.f32 %v5820_v63, %v5820_v63  ;;  %v5835_v9 = vmul.f32 %v5823_v2, %v5823_v2  ;;  %v5833_v42 = vmul.f32 %v5821_v22, %v5821_v22 }
 0xb6e   : > { %5840 = vadd.xlane.f32.xlu1 %v5834_v29  ;;  %5836 = vadd.xlane.f32.xlu0 %v5832_v35 }
 0xb72   : > { %5842 = vadd.xlane.f32.xlu1 %v5835_v9  ;;  %5838 = vadd.xlane.f32.xlu0 %v5833_v42 }
 0xbf7   : > { %v5841_v55 = vpop.xlane.xlu1 %5840  ;;  %v5837_v7 = vpop.xlane.xlu0 %5836 }
 0xbf8   : > { %v5846_v61 = vmul.f32 0.0078125, %v5841_v55  ;;  %v5844_v11 = vmul.f32 0.0078125, %v5837_v7 }
 0xbfa   : > { %v5850_v13 = vadd.f32 1.1920929e-07, %v5846_v61  ;;  %v5848_v1 = vadd.f32 1.1920929e-07, %v5844_v11 }
 0xbfb   : > { %v5843_v53 = vpop.xlane.xlu1 %5842  ;;  %v5839_v57 = vpop.xlane.xlu0 %5838 }
 0xbfc   : > { %v5847_v51 = vmul.f32 0.0078125, %v5843_v53  ;;  %v5845_v45 = vmul.f32 0.0078125, %v5839_v57  ;;  %7194 = vrsqrt.f32 %v5850_v13 }
 0xbfd   : > { %7196 = vrsqrt.f32 %v5848_v1 }
 0xbfe   : > { %v5851_v39 = vadd.f32 1.1920929e-07, %v5847_v51  ;;  %v5849_v60 = vadd.f32 1.1920929e-07, %v5845_v45 }
 0xc00   : > { %7198 = vrsqrt.f32 %v5851_v39 }
 0xc01   : > { %7200 = vrsqrt.f32 %v5849_v60 }
 0xc09   : > { %v7195_v6 = vpop.eup %7194 }
 0xc0a   : > { %v7197_v16 = vpop.eup %7196  ;;  %v5858_v4 = vmul.f32 %v7195_v6, %v5822_v26 }
 0xc0b   : > { %v5856_v49 = vmul.f32 %v7197_v16, %v5820_v63 }
 0xc0d   : > { %v7199_v44 = vpop.eup %7198 }
 0xc0e   : > { %v7201_v40 = vpop.eup %7200  ;;  %v5859_v48 = vmul.f32 %v7199_v44, %v5823_v2 }
 0xc0f   : > { %v5857_v15 = vmul.f32 %v7201_v40, %v5821_v22 }
 0xc10   : > { %v6368_v34 = vpack.c.bf16 %v5859_v48, %v5858_v4 }
 0xc11   : > { %v6363_v20 = vpack.c.bf16 %v5857_v15, %v5856_v49 }
 0xc12   : > { %6370 = vst [vmem:[#allocation19 + $0x8] sm:$0xff] %v6368_v34  }
 0xc13   : > { %6364 = vst [vmem:[#allocation19] sm:$0xff] %v6363_v20  }
 0xc14 PF: > { %s9334_s16 = sld [smem:[#allocation28_spill]]  ;;  %s7648_s30 = smov [#allocation19]  }
 0xc15   : > { %s5890_s27 = sshll.u32 %s7648_s30, 4  ;;  %s5891_s27 = int_to_ptr.vmem [resolvable:$true] %s5890_s27 }
 0xc16   : > { %s7530_s4 = scalar_lea.vmem %s5891_s27, 256  ;;  %p7537_p0 = scmp.lt.s32.totalorder %s5891_s27, %s5891_s27 }
 0xc17   : > { %p7531_p3 = scmp.ne.s32.totalorder %s5891_s27, %s7530_s4  ;;  %p7538_p10 = scmp.lt.s32.totalorder %s7530_s4, %s7530_s4 }
 0xc19   : > { %p7539_p1 = por %p7538_p10, %p7537_p0 }
 0xc1a   : > { %p6818_p9 = scmp.eq.s32.totalorder %s9334_s16, 2 }
 0xc1c   : > { %p7532_p4 = pnand %p7531_p3, %p6818_p9 }
 0xc1e   : > { %p7533_p11 = pneg %p7532_p4 }
 0xc20   : > { %p7540_p5 = pnand %p7539_p1, %p7533_p11 }
 0xc22   : > { %7543 = shalt.err (!%p7540_p5)
}
 0xc23   : > { %s7649_s14 = smov 4   ;;  %s9335_s24 = sld [smem:[#allocation35_spill]] }
 0xc29   : > { %6768 = dma.vmem_to_hbm [thread:$0]  (%p6818_p9), %s5891_s27, 256, %s9335_s24, [#allocation5], %s7641_s20, %s7641_s20, %s7649_s14  }
 0xc2a   : > { %7595 = dma.done.wait (%p6818_p9), [#allocation5], 256  }
 0xc2b   : > { %7597 = vsyncadd (%p6818_p9), [#allocation5], 4294967040 }
 0xc2c PF: > { %s9336_s12 = sld [smem:[#allocation27_spill]]  ;;  %s9340_s22 = smov %s7608_s23 }
 0xc2d   : > { %s9337_s21 = sld [smem:[#allocation25_spill]]  ;;  %s9342_s24 = smov %s7616_s25 }
 0xc2e   : > { %s9338_s19 = sld [smem:[#allocation32_spill]] }
 0xc2f   : > { %s9339_s15 = sld [smem:[#allocation31_spill]] }
 0xc32   : > { %s26_s26 = sadd.s32 1, %s9336_s12  }
 0xc33   : > { %p23_p2 = scmp.ge.s32.totalorder %s26_s26, 5  }
 0xc34   : > { %s9341_s23 = smov %s9338_s19 }
 0xc35   : > { %s9343_s25 = smov %s9339_s15  ;;  %25 = sbr.rel (!%p23_p2) target bundleno = 10 (0xa), region = 207 }
 0xc3a   :  { %5906 = vsyncpa [#allocation4], 1 }
 0xc3b   :  { %5908 = vsyncpa [#allocation4 + $0x1], 1 }
 0xc3c   :  { %5909 = vsyncpa [#allocation7], 1 }
 0xc3d   :  { %5910 = vsyncpa [#allocation10], 1 }
 0xc3e   :  { %5911 = vsyncpa [#allocation5], 1 }
 0xc3f   :  { %5913 = vsyncpa [#allocation5 + $0x1], 1 }

</bundles_post_ra>
